<compile_context>
chip_gen: v7x
topology: tpu7x:2x2x1
jax: 0.10.0
libtpu: 0.0.40
codegen_flags: <defaults>
</compile_context>

<pallas_src>
import functools
import math

import jax
import jax.numpy as jnp
from jax.experimental import pallas as pl
from jax.experimental.pallas import tpu as pltpu


# --------------------------------------------------------------------------
# Kernel 1: conv_reduce (3x3, padding=1) without im2col.
#   grid = (B,)  ["parallel"]; per step: padded NHWC image -> (C, S) output.
#   out[c, h*W+w] = sum_{dh,dw,cin} wk[dh,dw][c,cin] * xp[h+dh, w+dw, cin]
# --------------------------------------------------------------------------
def _conv3x3_kernel(x_ref, w_ref, b_ref, o_ref, *, H, W):
    x = x_ref[0]                                    # (H+2, W+2, Cin) bf16
    cin = x.shape[-1]
    acc = None
    for t in range(9):                              # 9 taps, accumulated in f32
        dh, dw = t // 3, t % 3
        xs = x[dh:dh + H, dw:dw + W, :].reshape(H * W, cin)        # (S, Cin)
        part = jax.lax.dot_general(                 # (C,Cin) x (S,Cin) -> (C,S)
            w_ref[t], xs,
            dimension_numbers=(((1,), (1,)), ((), ())),
            preferred_element_type=jnp.float32)
        acc = part if acc is None else acc + part
    o_ref[0] = (acc + b_ref[...]).astype(o_ref.dtype)   # channel-major (C, S)


def conv_reduce(xp, w, b, *, H, W):
    # TODO(synk): one whole padded image per grid step; for very large H*W this
    # block should additionally be tiled over output rows to bound VMEM.
    Bn, Hp, Wp, Cin = xp.shape
    C = w.shape[1]
    S = H * W
    kernel = functools.partial(_conv3x3_kernel, H=H, W=W)
    return pl.pallas_call(
        kernel,
        out_shape=jax.ShapeDtypeStruct((Bn, C, S), jnp.bfloat16),
        grid=(Bn,),
        in_specs=[
            pl.BlockSpec((1, Hp, Wp, Cin), lambda b_: (b_, 0, 0, 0)),
            pl.BlockSpec((9, C, Cin), lambda b_: (0, 0, 0)),
            pl.BlockSpec((C, 1), lambda b_: (0, 0)),
        ],
        out_specs=pl.BlockSpec((1, C, S), lambda b_: (b_, 0, 0)),
        compiler_params=pltpu.CompilerParams(
            dimension_semantics=("parallel",),
            vmem_limit_bytes=32 * 1024 * 1024),
    )(xp, w, b)


# --------------------------------------------------------------------------
# Kernel 2: fused in_proj -> attention core -> sum over S.
#   grid = (S // ts,)  [reduction, "arbitrary"]; output (C, B) accumulator is
#   resident across the grid (constant out index map) and holds
#   sum_S of the pre-out_proj attention output.
#   Layout: the S tile lives on the 128-lane dim; seq (=B) and head_dim are
#   tiny and fully unrolled on the VPU.
# --------------------------------------------------------------------------
def _mhsa_reduce_kernel(x_ref, w_in_ref, b_in_ref, acc_ref,
                        *, num_heads, head_dim, scale):
    Bn = x_ref.shape[0]                 # torch MHA seq length (assumed small)
    C = num_heads * head_dim

    @pl.when(pl.program_id(0) == 0)
    def _init():
        acc_ref[...] = jnp.zeros_like(acc_ref)

    w_in = w_in_ref[...]                # (3C, C) bf16 (torch in_proj_weight)
    b_in = b_in_ref[...]                # (3C, 1) f32

    q, k, v = [], [], []
    for b in range(Bn):
        # qkv^T = W_in @ x^T + b  -> (3C, ts) f32, S-tile on lanes.
        qkv = jnp.dot(w_in, x_ref[b], preferred_element_type=jnp.float32) + b_in
        q.append(qkv[0:C].reshape(num_heads, head_dim, -1))
        k.append(qkv[C:2 * C].reshape(num_heads, head_dim, -1))
        v.append(qkv[2 * C:3 * C].reshape(num_heads, head_dim, -1))

    for l in range(Bn):
        # scores over keys l' (size Bn), per head, lane-major over the S tile.
        s = [jnp.sum(q[l] * k[lp], axis=1) * scale for lp in range(Bn)]  # (nh, ts)
        m = s[0]
        for lp in range(1, Bn):
            m = jnp.maximum(m, s[lp])
        e = [jnp.exp(s[lp] - m) for lp in range(Bn)]
        denom = e[0]
        for lp in range(1, Bn):
            denom = denom + e[lp]
        r = pl.reciprocal(denom, approx=True)                            # (nh, ts)
        o = (e[0] * r)[:, None, :] * v[0]
        for lp in range(1, Bn):
            o = o + (e[lp] * r)[:, None, :] * v[lp]                      # (nh, hd, ts)
        # contribution of this S tile to sum_S of the pre-out_proj output.
        col = jnp.sum(o.reshape(C, -1), axis=-1, keepdims=True)          # (C, 1)
        acc_ref[:, l:l + 1] = acc_ref[:, l:l + 1] + col


def _pick_seq_tile(S):
    for t in (512, 256, 128):
        if S > t and S % t == 0:
            return t
    return S


def mhsa_sum(x_cm, w_in, b_in, *, num_heads):
    Bn, C, S = x_cm.shape
    hd = C // num_heads
    ts = _pick_seq_tile(S)
    kernel = functools.partial(_mhsa_reduce_kernel, num_heads=num_heads,
                               head_dim=hd, scale=1.0 / math.sqrt(hd))
    return pl.pallas_call(
        kernel,
        out_shape=jax.ShapeDtypeStruct((C, Bn), jnp.float32),
        grid=(S // ts,),
        in_specs=[
            pl.BlockSpec((Bn, C, ts), lambda s: (0, 0, s)),
            pl.BlockSpec((3 * C, C), lambda s: (0, 0)),
            pl.BlockSpec((3 * C, 1), lambda s: (0, 0)),
        ],
        out_specs=pl.BlockSpec((C, Bn), lambda s: (0, 0)),
        compiler_params=pltpu.CompilerParams(
            dimension_semantics=("arbitrary",),
            vmem_limit_bytes=32 * 1024 * 1024),
    )(x_cm, w_in, b_in)


# --------------------------------------------------------------------------
# Kernel 3: gating tail (runs once).
#   out_proj (folded through the mean) -> mlp_pos1 -> mlp_pos2 ->
#   conv_final (1x1 Conv1d as split matmul) -> softmax -> iterative top-k.
# --------------------------------------------------------------------------
def _gating_kernel(mp_ref, wo_ref, bo_ref, w1_ref, b1_ref, w2_ref, b2_ref,
                   wfa_ref, wfb_ref, bf_ref, vals_ref, idx_ref,
                   *, num_experts, top_k):
    # mean over S of attn_out == mean(pre_out_proj) @ Wout^T + b_out
    mean = jnp.dot(mp_ref[...], wo_ref[...],
                   preferred_element_type=jnp.float32) + bo_ref[...]      # (B, C)
    h = jnp.dot(mean, w1_ref[...], preferred_element_type=jnp.float32) + b1_ref[...]
    pos = jnp.dot(h, w2_ref[...], preferred_element_type=jnp.float32) + b2_ref[...]
    logits = (jnp.dot(mean, wfa_ref[...], preferred_element_type=jnp.float32)
              + jnp.dot(pos, wfb_ref[...], preferred_element_type=jnp.float32)
              + bf_ref[...])                                              # (B, E)

    m = jnp.max(logits, axis=-1, keepdims=True)
    e = jnp.exp(logits - m)
    # approx reciprocal rescales each row by the same factor -> top-k order exact.
    probs = e * pl.reciprocal(jnp.sum(e, axis=-1, keepdims=True), approx=True)

    Bn = probs.shape[0]
    lane = jax.lax.broadcasted_iota(jnp.int32, probs.shape, 1)
    out_lane = jax.lax.broadcasted_iota(jnp.int32, (Bn, top_k), 1)
    vals = jnp.zeros((Bn, top_k), jnp.float32)
    idxs = jnp.zeros((Bn, top_k), jnp.int32)
    s = probs
    for kk in range(top_k):                        # iterative top-k (descending)
        mx = jnp.max(s, axis=-1, keepdims=True)
        sel = jnp.min(jnp.where(s >= mx, lane, num_experts),
                      axis=-1, keepdims=True)      # first index of the max
        vals = jnp.where(out_lane == kk, mx, vals)
        idxs = jnp.where(out_lane == kk, sel, idxs)
        s = jnp.where(lane == sel, -1.0, s)        # probs >= 0, so -1 masks it
    vals_ref[...] = vals
    idx_ref[...] = idxs


def gating_head(mean_pre, wo, bo, w1, b1, w2, b2, wfa, wfb, bf,
                *, num_experts, top_k):
    Bn, C = mean_pre.shape
    E = num_experts
    kernel = functools.partial(_gating_kernel, num_experts=E, top_k=top_k)
    full2d = lambda shape: pl.BlockSpec(shape, lambda i: (0, 0))
    return pl.pallas_call(
        kernel,
        out_shape=(jax.ShapeDtypeStruct((Bn, top_k), jnp.float32),
                   jax.ShapeDtypeStruct((Bn, top_k), jnp.int32)),
        grid=(1,),
        in_specs=[
            full2d((Bn, C)),
            full2d((C, C)), full2d((1, C)),
            full2d((C, C)), full2d((1, C)),
            full2d((C, E)), full2d((1, E)),
            full2d((C, E)), full2d((E, E)), full2d((1, E)),
        ],
        out_specs=(full2d((Bn, top_k)), full2d((Bn, top_k))),
        compiler_params=pltpu.CompilerParams(dimension_semantics=("arbitrary",)),
    )(mean_pre, wo, bo, w1, b1, w2, b2, wfa, wfb, bf)


# --------------------------------------------------------------------------
# Parameters (deterministic, synthetic, torch layouts) + one-time preparation.
# --------------------------------------------------------------------------
def init_params(key, input_channels, num_experts):
    C = input_channels // 4
    ks = jax.random.split(key, 12)

    def rnd(k, shape, scale=0.05):
        return scale * jax.random.normal(k, shape, jnp.float32)

    return dict(
        conv_reduce_w=rnd(ks[0], (C, input_channels, 3, 3)),
        conv_reduce_b=rnd(ks[1], (C,)),
        in_proj_w=rnd(ks[2], (3 * C, C)),
        in_proj_b=rnd(ks[3], (3 * C,)),
        out_proj_w=rnd(ks[4], (C, C)),
        out_proj_b=rnd(ks[5], (C,)),
        mlp1_w=rnd(ks[6], (C, C)),
        mlp1_b=rnd(ks[7], (C,)),
        mlp2_w=rnd(ks[8], (num_experts, C)),
        mlp2_b=rnd(ks[9], (num_experts,)),
        conv_final_w=rnd(ks[10], (num_experts, C + num_experts, 1)),
        conv_final_b=rnd(ks[11], (num_experts,)),
    )


def prepare_params(p):
    """One-time layout/dtype prep: no per-forward transposes, bf16 MXU weights."""
    C, Cin = p["conv_reduce_w"].shape[0], p["conv_reduce_w"].shape[1]
    E = p["conv_final_b"].shape[0]
    conv_w = jnp.transpose(p["conv_reduce_w"], (2, 3, 0, 1)).reshape(9, C, Cin)
    wf = p["conv_final_w"][:, :, 0]                       # (E, C+E)
    return dict(
        conv_w=conv_w.astype(jnp.bfloat16),               # (9, C, Cin)
        conv_b=p["conv_reduce_b"].reshape(C, 1),
        w_in=p["in_proj_w"].astype(jnp.bfloat16),          # (3C, C) torch layout
        b_in=p["in_proj_b"].reshape(3 * C, 1),
        w_out_t=p["out_proj_w"].T,                         # (C, C)
        b_out=p["out_proj_b"].reshape(1, C),
        w1_t=p["mlp1_w"].T, b1=p["mlp1_b"].reshape(1, C),
        w2_t=p["mlp2_w"].T, b2=p["mlp2_b"].reshape(1, E),
        wfa=wf[:, :C].T,                                   # (C, E)
        wfb=wf[:, C:].T,                                   # (E, E)
        bf=p["conv_final_b"].reshape(1, E),
    )


# --------------------------------------------------------------------------
# Forward pass
# --------------------------------------------------------------------------
def gated_expert_forward(prep, x, *, num_experts, num_heads=8, top_k=8):
    Bn, Cin, H, W = x.shape
    C = Cin // 4
    S = H * W

    # conv_reduce: pad once in XLA (1x the input, bf16), 9 accumulated matmuls
    # inside the kernel -> channel-major (B, C, S) bf16 (S lane-dense).
    x_nhwc = jnp.transpose(x, (0, 2, 3, 1)).astype(jnp.bfloat16)
    xp = jnp.pad(x_nhwc, ((0, 0), (1, 1), (1, 1), (0, 0)))
    x_cm = conv_reduce(xp, prep["conv_w"], prep["conv_b"], H=H, W=W)

    # fused in_proj + attention + sum over S (attn_out never hits HBM).
    acc = mhsa_sum(x_cm, prep["w_in"], prep["b_in"], num_heads=num_heads)  # (C, B)
    mean_pre = jnp.transpose(acc) * (1.0 / S)                              # (B, C)

    # gating tail (out_proj folded through the mean) + softmax + top-k.
    vals, idxs = gating_head(
        mean_pre, prep["w_out_t"], prep["b_out"],
        prep["w1_t"], prep["b1"], prep["w2_t"], prep["b2"],
        prep["wfa"], prep["wfb"], prep["bf"],
        num_experts=num_experts, top_k=top_k)
    # TODO(synk): torch.topk returns int64 indices; we return int32.
    return vals, idxs


if __name__ == "__main__":
    input_channels, num_experts, top_k = 64, 16, 8    # C = 16, heads = 8, hd = 2
    B, H, W = 2, 8, 8                                  # S = 64

    key = jax.random.PRNGKey(0)
    kp, kx = jax.random.split(key)
    params = init_params(kp, input_channels, num_experts)
    prep = prepare_params(params)
    x = jax.random.normal(kx, (B, input_channels, H, W), jnp.float32)

    fwd = jax.jit(functools.partial(gated_expert_forward,
                                    num_experts=num_experts,
                                    num_heads=8, top_k=top_k))
    scores, indices = fwd(prep, x)
    jax.block_until_ready((scores, indices))

    assert scores.shape == (B, top_k) and indices.shape == (B, top_k)
    assert indices.dtype == jnp.int32
    print("KERNEL_OK")
</pallas_src>

<mosaic_0001>
module attributes {stable_mosaic.version = 11 : i64} {
  func.func @_conv3x3_kernel(%arg0: i32, %arg1: memref<1x10x10x64xbf16, #tpu.memory_space<vmem>>, %arg2: memref<9x16x64xbf16, #tpu.memory_space<vmem>>, %arg3: memref<16x1xf32, #tpu.memory_space<vmem>>, %arg4: memref<1x16x64xbf16, #tpu.memory_space<vmem>>) attributes {dimension_semantics = [#tpu.dimension_semantics<parallel>], iteration_bounds = array<i64: 2>, scalar_prefetch = 0 : i64, scratch_operands = 0 : i64, tpu.core_type = #tpu.core_type<tc>, window_params = [{transform_indices = @transform_0, window_bounds = array<i64: 1, 10, 10, 64>}, {pipeline_mode = #tpu.pipeline_mode<synchronous>, transform_indices = @transform_1, window_bounds = array<i64: 9, 16, 64>}, {pipeline_mode = #tpu.pipeline_mode<synchronous>, transform_indices = @transform_2, window_bounds = array<i64: 16, 1>}, {transform_indices = @transform_3, window_bounds = array<i64: 1, 16, 64>}]} {
    %c0 = arith.constant 0 : index
    %c0_0 = arith.constant 0 : index
    %c0_1 = arith.constant 0 : index
    %c0_2 = arith.constant 0 : index
    %0 = vector.load %arg1[%c0, %c0_0, %c0_1, %c0_2] : memref<1x10x10x64xbf16, #tpu.memory_space<vmem>>, vector<1x10x10x64xbf16>
    %1 = vector.shape_cast %0 : vector<1x10x10x64xbf16> to vector<10x10x64xbf16>
    %2 = vector.extract_strided_slice %1 {offsets = [0, 0, 0], sizes = [8, 8, 64], strides = [1, 1, 1]} : vector<10x10x64xbf16> to vector<8x8x64xbf16>
    %3 = vector.shape_cast %2 : vector<8x8x64xbf16> to vector<64x64xbf16>
    %c0_3 = arith.constant 0 : index
    %c0_4 = arith.constant 0 : index
    %c0_5 = arith.constant 0 : index
    %4 = vector.load %arg2[%c0_3, %c0_4, %c0_5] : memref<9x16x64xbf16, #tpu.memory_space<vmem>>, vector<1x16x64xbf16>
    %5 = vector.shape_cast %4 : vector<1x16x64xbf16> to vector<16x64xbf16>
    %cst = arith.constant dense<0.000000e+00> : vector<16x64xf32>
    %6 = tpu.matmul %5, %3, %cst {dimension_numbers = #tpu.dot_dimension_numbers<[1], [1], [0], [0], [0, 0, 1, 0], [], []>} : vector<16x64xbf16>, vector<64x64xbf16>, vector<16x64xf32> -> vector<16x64xf32>
    %7 = vector.extract_strided_slice %1 {offsets = [0, 1, 0], sizes = [8, 8, 64], strides = [1, 1, 1]} : vector<10x10x64xbf16> to vector<8x8x64xbf16>
    %8 = vector.shape_cast %7 : vector<8x8x64xbf16> to vector<64x64xbf16>
    %c1 = arith.constant 1 : index
    %c0_6 = arith.constant 0 : index
    %c0_7 = arith.constant 0 : index
    %9 = vector.load %arg2[%c1, %c0_6, %c0_7] : memref<9x16x64xbf16, #tpu.memory_space<vmem>>, vector<1x16x64xbf16>
    %10 = vector.shape_cast %9 : vector<1x16x64xbf16> to vector<16x64xbf16>
    %cst_8 = arith.constant dense<0.000000e+00> : vector<16x64xf32>
    %11 = tpu.matmul %10, %8, %cst_8 {dimension_numbers = #tpu.dot_dimension_numbers<[1], [1], [0], [0], [0, 0, 1, 0], [], []>} : vector<16x64xbf16>, vector<64x64xbf16>, vector<16x64xf32> -> vector<16x64xf32>
    %12 = arith.addf %6, %11 : vector<16x64xf32>
    %13 = vector.extract_strided_slice %1 {offsets = [0, 2, 0], sizes = [8, 8, 64], strides = [1, 1, 1]} : vector<10x10x64xbf16> to vector<8x8x64xbf16>
    %14 = vector.shape_cast %13 : vector<8x8x64xbf16> to vector<64x64xbf16>
    %c2 = arith.constant 2 : index
    %c0_9 = arith.constant 0 : index
    %c0_10 = arith.constant 0 : index
    %15 = vector.load %arg2[%c2, %c0_9, %c0_10] : memref<9x16x64xbf16, #tpu.memory_space<vmem>>, vector<1x16x64xbf16>
    %16 = vector.shape_cast %15 : vector<1x16x64xbf16> to vector<16x64xbf16>
    %cst_11 = arith.constant dense<0.000000e+00> : vector<16x64xf32>
    %17 = tpu.matmul %16, %14, %cst_11 {dimension_numbers = #tpu.dot_dimension_numbers<[1], [1], [0], [0], [0, 0, 1, 0], [], []>} : vector<16x64xbf16>, vector<64x64xbf16>, vector<16x64xf32> -> vector<16x64xf32>
    %18 = arith.addf %12, %17 : vector<16x64xf32>
    %19 = vector.extract_strided_slice %1 {offsets = [1, 0, 0], sizes = [8, 8, 64], strides = [1, 1, 1]} : vector<10x10x64xbf16> to vector<8x8x64xbf16>
    %20 = vector.shape_cast %19 : vector<8x8x64xbf16> to vector<64x64xbf16>
    %c3 = arith.constant 3 : index
    %c0_12 = arith.constant 0 : index
    %c0_13 = arith.constant 0 : index
    %21 = vector.load %arg2[%c3, %c0_12, %c0_13] : memref<9x16x64xbf16, #tpu.memory_space<vmem>>, vector<1x16x64xbf16>
    %22 = vector.shape_cast %21 : vector<1x16x64xbf16> to vector<16x64xbf16>
    %cst_14 = arith.constant dense<0.000000e+00> : vector<16x64xf32>
    %23 = tpu.matmul %22, %20, %cst_14 {dimension_numbers = #tpu.dot_dimension_numbers<[1], [1], [0], [0], [0, 0, 1, 0], [], []>} : vector<16x64xbf16>, vector<64x64xbf16>, vector<16x64xf32> -> vector<16x64xf32>
    %24 = arith.addf %18, %23 : vector<16x64xf32>
    %25 = vector.extract_strided_slice %1 {offsets = [1, 1, 0], sizes = [8, 8, 64], strides = [1, 1, 1]} : vector<10x10x64xbf16> to vector<8x8x64xbf16>
    %26 = vector.shape_cast %25 : vector<8x8x64xbf16> to vector<64x64xbf16>
    %c4 = arith.constant 4 : index
    %c0_15 = arith.constant 0 : index
    %c0_16 = arith.constant 0 : index
    %27 = vector.load %arg2[%c4, %c0_15, %c0_16] : memref<9x16x64xbf16, #tpu.memory_space<vmem>>, vector<1x16x64xbf16>
    %28 = vector.shape_cast %27 : vector<1x16x64xbf16> to vector<16x64xbf16>
    %cst_17 = arith.constant dense<0.000000e+00> : vector<16x64xf32>
    %29 = tpu.matmul %28, %26, %cst_17 {dimension_numbers = #tpu.dot_dimension_numbers<[1], [1], [0], [0], [0, 0, 1, 0], [], []>} : vector<16x64xbf16>, vector<64x64xbf16>, vector<16x64xf32> -> vector<16x64xf32>
    %30 = arith.addf %24, %29 : vector<16x64xf32>
    %31 = vector.extract_strided_slice %1 {offsets = [1, 2, 0], sizes = [8, 8, 64], strides = [1, 1, 1]} : vector<10x10x64xbf16> to vector<8x8x64xbf16>
    %32 = vector.shape_cast %31 : vector<8x8x64xbf16> to vector<64x64xbf16>
    %c5 = arith.constant 5 : index
    %c0_18 = arith.constant 0 : index
    %c0_19 = arith.constant 0 : index
    %33 = vector.load %arg2[%c5, %c0_18, %c0_19] : memref<9x16x64xbf16, #tpu.memory_space<vmem>>, vector<1x16x64xbf16>
    %34 = vector.shape_cast %33 : vector<1x16x64xbf16> to vector<16x64xbf16>
    %cst_20 = arith.constant dense<0.000000e+00> : vector<16x64xf32>
    %35 = tpu.matmul %34, %32, %cst_20 {dimension_numbers = #tpu.dot_dimension_numbers<[1], [1], [0], [0], [0, 0, 1, 0], [], []>} : vector<16x64xbf16>, vector<64x64xbf16>, vector<16x64xf32> -> vector<16x64xf32>
    %36 = arith.addf %30, %35 : vector<16x64xf32>
    %37 = vector.extract_strided_slice %1 {offsets = [2, 0, 0], sizes = [8, 8, 64], strides = [1, 1, 1]} : vector<10x10x64xbf16> to vector<8x8x64xbf16>
    %38 = vector.shape_cast %37 : vector<8x8x64xbf16> to vector<64x64xbf16>
    %c6 = arith.constant 6 : index
    %c0_21 = arith.constant 0 : index
    %c0_22 = arith.constant 0 : index
    %39 = vector.load %arg2[%c6, %c0_21, %c0_22] : memref<9x16x64xbf16, #tpu.memory_space<vmem>>, vector<1x16x64xbf16>
    %40 = vector.shape_cast %39 : vector<1x16x64xbf16> to vector<16x64xbf16>
    %cst_23 = arith.constant dense<0.000000e+00> : vector<16x64xf32>
    %41 = tpu.matmul %40, %38, %cst_23 {dimension_numbers = #tpu.dot_dimension_numbers<[1], [1], [0], [0], [0, 0, 1, 0], [], []>} : vector<16x64xbf16>, vector<64x64xbf16>, vector<16x64xf32> -> vector<16x64xf32>
    %42 = arith.addf %36, %41 : vector<16x64xf32>
    %43 = vector.extract_strided_slice %1 {offsets = [2, 1, 0], sizes = [8, 8, 64], strides = [1, 1, 1]} : vector<10x10x64xbf16> to vector<8x8x64xbf16>
    %44 = vector.shape_cast %43 : vector<8x8x64xbf16> to vector<64x64xbf16>
    %c7 = arith.constant 7 : index
    %c0_24 = arith.constant 0 : index
    %c0_25 = arith.constant 0 : index
    %45 = vector.load %arg2[%c7, %c0_24, %c0_25] : memref<9x16x64xbf16, #tpu.memory_space<vmem>>, vector<1x16x64xbf16>
    %46 = vector.shape_cast %45 : vector<1x16x64xbf16> to vector<16x64xbf16>
    %cst_26 = arith.constant dense<0.000000e+00> : vector<16x64xf32>
    %47 = tpu.matmul %46, %44, %cst_26 {dimension_numbers = #tpu.dot_dimension_numbers<[1], [1], [0], [0], [0, 0, 1, 0], [], []>} : vector<16x64xbf16>, vector<64x64xbf16>, vector<16x64xf32> -> vector<16x64xf32>
    %48 = arith.addf %42, %47 : vector<16x64xf32>
    %49 = vector.extract_strided_slice %1 {offsets = [2, 2, 0], sizes = [8, 8, 64], strides = [1, 1, 1]} : vector<10x10x64xbf16> to vector<8x8x64xbf16>
    %50 = vector.shape_cast %49 : vector<8x8x64xbf16> to vector<64x64xbf16>
    %c8 = arith.constant 8 : index
    %c0_27 = arith.constant 0 : index
    %c0_28 = arith.constant 0 : index
    %51 = vector.load %arg2[%c8, %c0_27, %c0_28] : memref<9x16x64xbf16, #tpu.memory_space<vmem>>, vector<1x16x64xbf16>
    %52 = vector.shape_cast %51 : vector<1x16x64xbf16> to vector<16x64xbf16>
    %cst_29 = arith.constant dense<0.000000e+00> : vector<16x64xf32>
    %53 = tpu.matmul %52, %50, %cst_29 {dimension_numbers = #tpu.dot_dimension_numbers<[1], [1], [0], [0], [0, 0, 1, 0], [], []>} : vector<16x64xbf16>, vector<64x64xbf16>, vector<16x64xf32> -> vector<16x64xf32>
    %54 = arith.addf %48, %53 : vector<16x64xf32>
    %c0_30 = arith.constant 0 : index
    %c0_31 = arith.constant 0 : index
    %55 = vector.load %arg3[%c0_30, %c0_31] : memref<16x1xf32, #tpu.memory_space<vmem>>, vector<16x1xf32>
    %56 = vector.broadcast %55 : vector<16x1xf32> to vector<16x64xf32>
    %57 = arith.addf %54, %56 : vector<16x64xf32>
    %58 = arith.truncf %57 : vector<16x64xf32> to vector<16x64xbf16>
    %c0_32 = arith.constant 0 : index
    %c0_33 = arith.constant 0 : index
    %c0_34 = arith.constant 0 : index
    %59 = vector.load %arg4[%c0_32, %c0_33, %c0_34] : memref<1x16x64xbf16, #tpu.memory_space<vmem>>, vector<1x16x64xbf16>
    %60 = vector.shape_cast %59 : vector<1x16x64xbf16> to vector<16x64xbf16>
    %61 = vector.shape_cast %58 : vector<16x64xbf16> to vector<1x16x64xbf16>
    tpu.vector_store %arg4[%c0_32, %c0_33, %c0_34], %61 {strides = array<i32>} : memref<1x16x64xbf16, #tpu.memory_space<vmem>>, vector<1x16x64xbf16>,
    return
  }
  func.func @transform_0(%arg0: i32) -> (i32, i32, i32, i32) {
    %c0_i32 = arith.constant 0 : i32
    %c0_i32_0 = arith.constant 0 : i32
    %c0_i32_1 = arith.constant 0 : i32
    %c0_i32_2 = arith.constant 0 : i32
    return %arg0, %c0_i32, %c0_i32_0, %c0_i32_1 : i32, i32, i32, i32
  }
  func.func @transform_1(%arg0: i32) -> (i32, i32, i32) {
    %c0_i32 = arith.constant 0 : i32
    %c0_i32_0 = arith.constant 0 : i32
    %c0_i32_1 = arith.constant 0 : i32
    %c0_i32_2 = arith.constant 0 : i32
    return %c0_i32, %c0_i32_0, %c0_i32_1 : i32, i32, i32
  }
  func.func @transform_2(%arg0: i32) -> (i32, i32) {
    %c0_i32 = arith.constant 0 : i32
    %c0_i32_0 = arith.constant 0 : i32
    %c0_i32_1 = arith.constant 0 : i32
    return %c0_i32, %c0_i32_0 : i32, i32
  }
  func.func @transform_3(%arg0: i32) -> (i32, i32, i32) {
    %c0_i32 = arith.constant 0 : i32
    %c0_i32_0 = arith.constant 0 : i32
    %c0_i32_1 = arith.constant 0 : i32
    return %arg0, %c0_i32, %c0_i32_0 : i32, i32, i32
  }
}

module attributes {stable_mosaic.version = 11 : i64} {
  func.func @_mhsa_reduce_kernel(%arg0: i32, %arg1: memref<2x16x64xbf16, #tpu.memory_space<vmem>>, %arg2: memref<48x16xbf16, #tpu.memory_space<vmem>>, %arg3: memref<48x1xf32, #tpu.memory_space<vmem>>, %arg4: memref<16x2xf32, #tpu.memory_space<vmem>>) attributes {dimension_semantics = [#tpu.dimension_semantics<arbitrary>], iteration_bounds = array<i64: 1>, scalar_prefetch = 0 : i64, scratch_operands = 0 : i64, tpu.core_type = #tpu.core_type<tc>, window_params = [{transform_indices = @transform_0, window_bounds = array<i64: 2, 16, 64>}, {pipeline_mode = #tpu.pipeline_mode<synchronous>, transform_indices = @transform_1, window_bounds = array<i64: 48, 16>}, {pipeline_mode = #tpu.pipeline_mode<synchronous>, transform_indices = @transform_2, window_bounds = array<i64: 48, 1>}, {pipeline_mode = #tpu.pipeline_mode<synchronous>, transform_indices = @transform_3, window_bounds = array<i64: 16, 2>}]} {
    %c0_i32 = arith.constant 0 : i32
    %0 = arith.cmpi eq, %arg0, %c0_i32 : i32
    %1 = arith.extui %0 : i1 to i32
    %c0_i32_0 = arith.constant 0 : i32
    %2 = arith.cmpi ne, %1, %c0_i32_0 : i32
    scf.if %2 {
      %cst_28 = arith.constant 0.000000e+00 : f32
      %87 = vector.broadcast %cst_28 : f32 to vector<16x2xf32>
      %c0_29 = arith.constant 0 : index
      %c0_30 = arith.constant 0 : index
      %88 = vector.load %arg4[%c0_29, %c0_30] : memref<16x2xf32, #tpu.memory_space<vmem>>, vector<16x2xf32>
      tpu.vector_store %arg4[%c0_29, %c0_30], %87 {strides = array<i32>} : memref<16x2xf32, #tpu.memory_space<vmem>>, vector<16x2xf32>,
    } else {
    }
    %c0 = arith.constant 0 : index
    %c0_1 = arith.constant 0 : index
    %3 = vector.load %arg2[%c0, %c0_1] : memref<48x16xbf16, #tpu.memory_space<vmem>>, vector<48x16xbf16>
    %c0_2 = arith.constant 0 : index
    %c0_3 = arith.constant 0 : index
    %4 = vector.load %arg3[%c0_2, %c0_3] : memref<48x1xf32, #tpu.memory_space<vmem>>, vector<48x1xf32>
    %c0_4 = arith.constant 0 : index
    %c0_5 = arith.constant 0 : index
    %c0_6 = arith.constant 0 : index
    %5 = vector.load %arg1[%c0_4, %c0_5, %c0_6] : memref<2x16x64xbf16, #tpu.memory_space<vmem>>, vector<1x16x64xbf16>
    %6 = vector.shape_cast %5 : vector<1x16x64xbf16> to vector<16x64xbf16>
    %cst = arith.constant dense<0.000000e+00> : vector<48x64xf32>
    %7 = tpu.matmul %3, %6, %cst {dimension_numbers = #tpu.dot_dimension_numbers<[1], [0], [0], [1], [0, 0, 1, 1], [], []>} : vector<48x16xbf16>, vector<16x64xbf16>, vector<48x64xf32> -> vector<48x64xf32>
    %8 = vector.broadcast %4 : vector<48x1xf32> to vector<48x64xf32>
    %9 = arith.addf %7, %8 : vector<48x64xf32>
    %10 = vector.extract_strided_slice %9 {offsets = [0, 0], sizes = [16, 64], strides = [1, 1]} : vector<48x64xf32> to vector<16x64xf32>
    %11 = vector.shape_cast %10 : vector<16x64xf32> to vector<8x2x64xf32>
    %12 = vector.extract_strided_slice %9 {offsets = [16, 0], sizes = [16, 64], strides = [1, 1]} : vector<48x64xf32> to vector<16x64xf32>
    %13 = vector.shape_cast %12 : vector<16x64xf32> to vector<8x2x64xf32>
    %14 = vector.extract_strided_slice %9 {offsets = [32, 0], sizes = [16, 64], strides = [1, 1]} : vector<48x64xf32> to vector<16x64xf32>
    %15 = vector.shape_cast %14 : vector<16x64xf32> to vector<8x2x64xf32>
    %c1 = arith.constant 1 : index
    %c0_7 = arith.constant 0 : index
    %c0_8 = arith.constant 0 : index
    %16 = vector.load %arg1[%c1, %c0_7, %c0_8] : memref<2x16x64xbf16, #tpu.memory_space<vmem>>, vector<1x16x64xbf16>
    %17 = vector.shape_cast %16 : vector<1x16x64xbf16> to vector<16x64xbf16>
    %cst_9 = arith.constant dense<0.000000e+00> : vector<48x64xf32>
    %18 = tpu.matmul %3, %17, %cst_9 {dimension_numbers = #tpu.dot_dimension_numbers<[1], [0], [0], [1], [0, 0, 1, 1], [], []>} : vector<48x16xbf16>, vector<16x64xbf16>, vector<48x64xf32> -> vector<48x64xf32>
    %19 = vector.broadcast %4 : vector<48x1xf32> to vector<48x64xf32>
    %20 = arith.addf %18, %19 : vector<48x64xf32>
    %21 = vector.extract_strided_slice %20 {offsets = [0, 0], sizes = [16, 64], strides = [1, 1]} : vector<48x64xf32> to vector<16x64xf32>
    %22 = vector.shape_cast %21 : vector<16x64xf32> to vector<8x2x64xf32>
    %23 = vector.extract_strided_slice %20 {offsets = [16, 0], sizes = [16, 64], strides = [1, 1]} : vector<48x64xf32> to vector<16x64xf32>
    %24 = vector.shape_cast %23 : vector<16x64xf32> to vector<8x2x64xf32>
    %25 = vector.extract_strided_slice %20 {offsets = [32, 0], sizes = [16, 64], strides = [1, 1]} : vector<48x64xf32> to vector<16x64xf32>
    %26 = vector.shape_cast %25 : vector<16x64xf32> to vector<8x2x64xf32>
    %27 = arith.mulf %11, %13 : vector<8x2x64xf32>
    %cst_10 = arith.constant dense<0.000000e+00> : vector<8x64xf32>
    %28 = vector.multi_reduction <add>, %27, %cst_10 [1] : vector<8x2x64xf32> to vector<8x64xf32>
    %cst_11 = arith.constant 0.707106769 : f32
    %29 = vector.broadcast %cst_11 : f32 to vector<8x64xf32>
    %30 = arith.mulf %28, %29 : vector<8x64xf32>
    %31 = arith.mulf %11, %24 : vector<8x2x64xf32>
    %cst_12 = arith.constant dense<0.000000e+00> : vector<8x64xf32>
    %32 = vector.multi_reduction <add>, %31, %cst_12 [1] : vector<8x2x64xf32> to vector<8x64xf32>
    %cst_13 = arith.constant 0.707106769 : f32
    %33 = vector.broadcast %cst_13 : f32 to vector<8x64xf32>
    %34 = arith.mulf %32, %33 : vector<8x64xf32>
    %35 = arith.maximumf %30, %34 : vector<8x64xf32>
    %36 = arith.subf %30, %35 : vector<8x64xf32>
    %37 = math.exp %36 : vector<8x64xf32>
    %38 = arith.subf %34, %35 : vector<8x64xf32>
    %39 = math.exp %38 : vector<8x64xf32>
    %40 = arith.addf %37, %39 : vector<8x64xf32>
    %41 = tpu.reciprocal %40 {approx = true} : vector<8x64xf32> -> vector<8x64xf32>
    %42 = arith.mulf %37, %41 : vector<8x64xf32>
    %43 = vector.shape_cast %42 : vector<8x64xf32> to vector<8x1x64xf32>
    %44 = vector.broadcast %43 : vector<8x1x64xf32> to vector<8x2x64xf32>
    %45 = arith.mulf %44, %15 : vector<8x2x64xf32>
    %46 = arith.mulf %39, %41 : vector<8x64xf32>
    %47 = vector.shape_cast %46 : vector<8x64xf32> to vector<8x1x64xf32>
    %48 = vector.broadcast %47 : vector<8x1x64xf32> to vector<8x2x64xf32>
    %49 = arith.mulf %48, %26 : vector<8x2x64xf32>
    %50 = arith.addf %45, %49 : vector<8x2x64xf32>
    %51 = vector.shape_cast %50 : vector<8x2x64xf32> to vector<16x64xf32>
    %cst_14 = arith.constant dense<0.000000e+00> : vector<16xf32>
    %52 = vector.multi_reduction <add>, %51, %cst_14 [1] : vector<16x64xf32> to vector<16xf32>
    %53 = vector.shape_cast %52 : vector<16xf32> to vector<16x1xf32>
    %c0_15 = arith.constant 0 : index
    %c0_16 = arith.constant 0 : index
    %54 = vector.load %arg4[%c0_15, %c0_16] : memref<16x2xf32, #tpu.memory_space<vmem>>, vector<16x1xf32>
    %55 = arith.addf %54, %53 : vector<16x1xf32>
    %c0_17 = arith.constant 0 : index
    %c0_18 = arith.constant 0 : index
    %56 = vector.load %arg4[%c0_17, %c0_18] : memref<16x2xf32, #tpu.memory_space<vmem>>, vector<16x1xf32>
    tpu.vector_store %arg4[%c0_17, %c0_18], %55 {strides = array<i32>} : memref<16x2xf32, #tpu.memory_space<vmem>>, vector<16x1xf32>,
    %57 = arith.mulf %22, %13 : vector<8x2x64xf32>
    %cst_19 = arith.constant dense<0.000000e+00> : vector<8x64xf32>
    %58 = vector.multi_reduction <add>, %57, %cst_19 [1] : vector<8x2x64xf32> to vector<8x64xf32>
    %cst_20 = arith.constant 0.707106769 : f32
    %59 = vector.broadcast %cst_20 : f32 to vector<8x64xf32>
    %60 = arith.mulf %58, %59 : vector<8x64xf32>
    %61 = arith.mulf %22, %24 : vector<8x2x64xf32>
    %cst_21 = arith.constant dense<0.000000e+00> : vector<8x64xf32>
    %62 = vector.multi_reduction <add>, %61, %cst_21 [1] : vector<8x2x64xf32> to vector<8x64xf32>
    %cst_22 = arith.constant 0.707106769 : f32
    %63 = vector.broadcast %cst_22 : f32 to vector<8x64xf32>
    %64 = arith.mulf %62, %63 : vector<8x64xf32>
    %65 = arith.maximumf %60, %64 : vector<8x64xf32>
    %66 = arith.subf %60, %65 : vector<8x64xf32>
    %67 = math.exp %66 : vector<8x64xf32>
    %68 = arith.subf %64, %65 : vector<8x64xf32>
    %69 = math.exp %68 : vector<8x64xf32>
    %70 = arith.addf %67, %69 : vector<8x64xf32>
    %71 = tpu.reciprocal %70 {approx = true} : vector<8x64xf32> -> vector<8x64xf32>
    %72 = arith.mulf %67, %71 : vector<8x64xf32>
    %73 = vector.shape_cast %72 : vector<8x64xf32> to vector<8x1x64xf32>
    %74 = vector.broadcast %73 : vector<8x1x64xf32> to vector<8x2x64xf32>
    %75 = arith.mulf %74, %15 : vector<8x2x64xf32>
    %76 = arith.mulf %69, %71 : vector<8x64xf32>
    %77 = vector.shape_cast %76 : vector<8x64xf32> to vector<8x1x64xf32>
    %78 = vector.broadcast %77 : vector<8x1x64xf32> to vector<8x2x64xf32>
    %79 = arith.mulf %78, %26 : vector<8x2x64xf32>
    %80 = arith.addf %75, %79 : vector<8x2x64xf32>
    %81 = vector.shape_cast %80 : vector<8x2x64xf32> to vector<16x64xf32>
    %cst_23 = arith.constant dense<0.000000e+00> : vector<16xf32>
    %82 = vector.multi_reduction <add>, %81, %cst_23 [1] : vector<16x64xf32> to vector<16xf32>
    %83 = vector.shape_cast %82 : vector<16xf32> to vector<16x1xf32>
    %c0_24 = arith.constant 0 : index
    %c1_25 = arith.constant 1 : index
    %84 = vector.load %arg4[%c0_24, %c1_25] : memref<16x2xf32, #tpu.memory_space<vmem>>, vector<16x1xf32>
    %85 = arith.addf %84, %83 : vector<16x1xf32>
    %c0_26 = arith.constant 0 : index
    %c1_27 = arith.constant 1 : index
    %86 = vector.load %arg4[%c0_26, %c1_27] : memref<16x2xf32, #tpu.memory_space<vmem>>, vector<16x1xf32>
    tpu.vector_store %arg4[%c0_26, %c1_27], %85 {strides = array<i32>} : memref<16x2xf32, #tpu.memory_space<vmem>>, vector<16x1xf32>,
    return
  }
  func.func @transform_0(%arg0: i32) -> (i32, i32, i32) {
    %c0_i32 = arith.constant 0 : i32
    %c0_i32_0 = arith.constant 0 : i32
    %c0_i32_1 = arith.constant 0 : i32
    return %c0_i32, %c0_i32_0, %arg0 : i32, i32, i32
  }
  func.func @transform_1(%arg0: i32) -> (i32, i32) {
    %c0_i32 = arith.constant 0 : i32
    %c0_i32_0 = arith.constant 0 : i32
    %c0_i32_1 = arith.constant 0 : i32
    return %c0_i32, %c0_i32_0 : i32, i32
  }
  func.func @transform_2(%arg0: i32) -> (i32, i32) {
    %c0_i32 = arith.constant 0 : i32
    %c0_i32_0 = arith.constant 0 : i32
    %c0_i32_1 = arith.constant 0 : i32
    return %c0_i32, %c0_i32_0 : i32, i32
  }
  func.func @transform_3(%arg0: i32) -> (i32, i32) {
    %c0_i32 = arith.constant 0 : i32
    %c0_i32_0 = arith.constant 0 : i32
    %c0_i32_1 = arith.constant 0 : i32
    return %c0_i32, %c0_i32_0 : i32, i32
  }
}

module attributes {stable_mosaic.version = 11 : i64} {
  func.func @_gating_kernel(%arg0: i32, %arg1: memref<2x16xf32, #tpu.memory_space<vmem>>, %arg2: memref<16x16xf32, #tpu.memory_space<vmem>>, %arg3: memref<1x16xf32, #tpu.memory_space<vmem>>, %arg4: memref<16x16xf32, #tpu.memory_space<vmem>>, %arg5: memref<1x16xf32, #tpu.memory_space<vmem>>, %arg6: memref<16x16xf32, #tpu.memory_space<vmem>>, %arg7: memref<1x16xf32, #tpu.memory_space<vmem>>, %arg8: memref<16x16xf32, #tpu.memory_space<vmem>>, %arg9: memref<16x16xf32, #tpu.memory_space<vmem>>, %arg10: memref<1x16xf32, #tpu.memory_space<vmem>>, %arg11: memref<2x8xf32, #tpu.memory_space<vmem>>, %arg12: memref<2x8xi32, #tpu.memory_space<vmem>>) attributes {dimension_semantics = [#tpu.dimension_semantics<arbitrary>], iteration_bounds = array<i64: 1>, scalar_prefetch = 0 : i64, scratch_operands = 0 : i64, tpu.core_type = #tpu.core_type<tc>, window_params = [{pipeline_mode = #tpu.pipeline_mode<synchronous>, transform_indices = @transform_0, window_bounds = array<i64: 2, 16>}, {pipeline_mode = #tpu.pipeline_mode<synchronous>, transform_indices = @transform_1, window_bounds = array<i64: 16, 16>}, {pipeline_mode = #tpu.pipeline_mode<synchronous>, transform_indices = @transform_2, window_bounds = array<i64: 1, 16>}, {pipeline_mode = #tpu.pipeline_mode<synchronous>, transform_indices = @transform_3, window_bounds = array<i64: 16, 16>}, {pipeline_mode = #tpu.pipeline_mode<synchronous>, transform_indices = @transform_4, window_bounds = array<i64: 1, 16>}, {pipeline_mode = #tpu.pipeline_mode<synchronous>, transform_indices = @transform_5, window_bounds = array<i64: 16, 16>}, {pipeline_mode = #tpu.pipeline_mode<synchronous>, transform_indices = @transform_6, window_bounds = array<i64: 1, 16>}, {pipeline_mode = #tpu.pipeline_mode<synchronous>, transform_indices = @transform_7, window_bounds = array<i64: 16, 16>}, {pipeline_mode = #tpu.pipeline_mode<synchronous>, transform_indices = @transform_8, window_bounds = array<i64: 16, 16>}, {pipeline_mode = #tpu.pipeline_mode<synchronous>, transform_indices = @transform_9, window_bounds = array<i64: 1, 16>}, {pipeline_mode = #tpu.pipeline_mode<synchronous>, transform_indices = @transform_10, window_bounds = array<i64: 2, 8>}, {pipeline_mode = #tpu.pipeline_mode<synchronous>, transform_indices = @transform_11, window_bounds = array<i64: 2, 8>}]} {
    %c0 = arith.constant 0 : index
    %c0_0 = arith.constant 0 : index
    %0 = vector.load %arg1[%c0, %c0_0] : memref<2x16xf32, #tpu.memory_space<vmem>>, vector<2x16xf32>
    %c0_1 = arith.constant 0 : index
    %c0_2 = arith.constant 0 : index
    %1 = vector.load %arg2[%c0_1, %c0_2] : memref<16x16xf32, #tpu.memory_space<vmem>>, vector<16x16xf32>
    %cst = arith.constant dense<0.000000e+00> : vector<2x16xf32>
    %2 = tpu.matmul %0, %1, %cst {dimension_numbers = #tpu.dot_dimension_numbers<[1], [0], [0], [1], [0, 0, 1, 1], [], []>} : vector<2x16xf32>, vector<16x16xf32>, vector<2x16xf32> -> vector<2x16xf32>
    %c0_3 = arith.constant 0 : index
    %c0_4 = arith.constant 0 : index
    %3 = vector.load %arg3[%c0_3, %c0_4] : memref<1x16xf32, #tpu.memory_space<vmem>>, vector<1x16xf32>
    %4 = vector.broadcast %3 : vector<1x16xf32> to vector<2x16xf32>
    %5 = arith.addf %2, %4 : vector<2x16xf32>
    %c0_5 = arith.constant 0 : index
    %c0_6 = arith.constant 0 : index
    %6 = vector.load %arg4[%c0_5, %c0_6] : memref<16x16xf32, #tpu.memory_space<vmem>>, vector<16x16xf32>
    %cst_7 = arith.constant dense<0.000000e+00> : vector<2x16xf32>
    %7 = tpu.matmul %5, %6, %cst_7 {dimension_numbers = #tpu.dot_dimension_numbers<[1], [0], [0], [1], [0, 0, 1, 1], [], []>} : vector<2x16xf32>, vector<16x16xf32>, vector<2x16xf32> -> vector<2x16xf32>
    %c0_8 = arith.constant 0 : index
    %c0_9 = arith.constant 0 : index
    %8 = vector.load %arg5[%c0_8, %c0_9] : memref<1x16xf32, #tpu.memory_space<vmem>>, vector<1x16xf32>
    %9 = vector.broadcast %8 : vector<1x16xf32> to vector<2x16xf32>
    %10 = arith.addf %7, %9 : vector<2x16xf32>
    %c0_10 = arith.constant 0 : index
    %c0_11 = arith.constant 0 : index
    %11 = vector.load %arg6[%c0_10, %c0_11] : memref<16x16xf32, #tpu.memory_space<vmem>>, vector<16x16xf32>
    %cst_12 = arith.constant dense<0.000000e+00> : vector<2x16xf32>
    %12 = tpu.matmul %10, %11, %cst_12 {dimension_numbers = #tpu.dot_dimension_numbers<[1], [0], [0], [1], [0, 0, 1, 1], [], []>} : vector<2x16xf32>, vector<16x16xf32>, vector<2x16xf32> -> vector<2x16xf32>
    %c0_13 = arith.constant 0 : index
    %c0_14 = arith.constant 0 : index
    %13 = vector.load %arg7[%c0_13, %c0_14] : memref<1x16xf32, #tpu.memory_space<vmem>>, vector<1x16xf32>
    %14 = vector.broadcast %13 : vector<1x16xf32> to vector<2x16xf32>
    %15 = arith.addf %12, %14 : vector<2x16xf32>
    %c0_15 = arith.constant 0 : index
    %c0_16 = arith.constant 0 : index
    %16 = vector.load %arg8[%c0_15, %c0_16] : memref<16x16xf32, #tpu.memory_space<vmem>>, vector<16x16xf32>
    %cst_17 = arith.constant dense<0.000000e+00> : vector<2x16xf32>
    %17 = tpu.matmul %5, %16, %cst_17 {dimension_numbers = #tpu.dot_dimension_numbers<[1], [0], [0], [1], [0, 0, 1, 1], [], []>} : vector<2x16xf32>, vector<16x16xf32>, vector<2x16xf32> -> vector<2x16xf32>
    %c0_18 = arith.constant 0 : index
    %c0_19 = arith.constant 0 : index
    %18 = vector.load %arg9[%c0_18, %c0_19] : memref<16x16xf32, #tpu.memory_space<vmem>>, vector<16x16xf32>
    %cst_20 = arith.constant dense<0.000000e+00> : vector<2x16xf32>
    %19 = tpu.matmul %15, %18, %cst_20 {dimension_numbers = #tpu.dot_dimension_numbers<[1], [0], [0], [1], [0, 0, 1, 1], [], []>} : vector<2x16xf32>, vector<16x16xf32>, vector<2x16xf32> -> vector<2x16xf32>
    %20 = arith.addf %17, %19 : vector<2x16xf32>
    %c0_21 = arith.constant 0 : index
    %c0_22 = arith.constant 0 : index
    %21 = vector.load %arg10[%c0_21, %c0_22] : memref<1x16xf32, #tpu.memory_space<vmem>>, vector<1x16xf32>
    %22 = vector.broadcast %21 : vector<1x16xf32> to vector<2x16xf32>
    %23 = arith.addf %20, %22 : vector<2x16xf32>
    %cst_23 = arith.constant dense<0xFF800000> : vector<2xf32>
    %24 = vector.multi_reduction <maximumf>, %23, %cst_23 [1] : vector<2x16xf32> to vector<2xf32>
    %25 = vector.shape_cast %24 : vector<2xf32> to vector<2x1xf32>
    %26 = vector.broadcast %25 : vector<2x1xf32> to vector<2x16xf32>
    %27 = arith.subf %23, %26 : vector<2x16xf32>
    %28 = math.exp %27 : vector<2x16xf32>
    %cst_24 = arith.constant dense<0.000000e+00> : vector<2xf32>
    %29 = vector.multi_reduction <add>, %28, %cst_24 [1] : vector<2x16xf32> to vector<2xf32>
    %30 = vector.shape_cast %29 : vector<2xf32> to vector<2x1xf32>
    %31 = tpu.reciprocal %30 {approx = true} : vector<2x1xf32> -> vector<2x1xf32>
    %32 = vector.broadcast %31 : vector<2x1xf32> to vector<2x16xf32>
    %33 = arith.mulf %28, %32 : vector<2x16xf32>
    %34 = tpu.iota {dimensions = array<i32: 1>} : vector<2x16xi32>
    %35 = tpu.iota {dimensions = array<i32: 1>} : vector<2x8xi32>
    %cst_25 = arith.constant 0.000000e+00 : f32
    %36 = vector.broadcast %cst_25 : f32 to vector<2x8xf32>
    %c0_i32 = arith.constant 0 : i32
    %37 = vector.broadcast %c0_i32 : i32 to vector<2x8xi32>
    %cst_26 = arith.constant dense<0xFF800000> : vector<2xf32>
    %38 = vector.multi_reduction <maximumf>, %33, %cst_26 [1] : vector<2x16xf32> to vector<2xf32>
    %39 = vector.shape_cast %38 : vector<2xf32> to vector<2x1xf32>
    %40 = vector.broadcast %39 : vector<2x1xf32> to vector<2x16xf32>
    %41 = arith.cmpf oge, %33, %40 : vector<2x16xf32>
    %c16_i32 = arith.constant 16 : i32
    %42 = vector.broadcast %c16_i32 : i32 to vector<2x16xi32>
    %43 = arith.select %41, %34, %42 : vector<2x16xi1>, vector<2x16xi32>
    %cst_27 = arith.constant dense<2147483647> : vector<2xi32>
    %44 = vector.multi_reduction <minsi>, %43, %cst_27 [1] : vector<2x16xi32> to vector<2xi32>
    %45 = vector.shape_cast %44 : vector<2xi32> to vector<2x1xi32>
    %c0_i32_28 = arith.constant 0 : i32
    %46 = vector.broadcast %c0_i32_28 : i32 to vector<2x8xi32>
    %47 = arith.cmpi eq, %35, %46 : vector<2x8xi32>
    %48 = vector.shape_cast %39 : vector<2x1xf32> to vector<2x1xf32>
    %49 = vector.broadcast %48 : vector<2x1xf32> to vector<2x8xf32>
    %50 = arith.select %47, %49, %36 : vector<2x8xi1>, vector<2x8xf32>
    %c0_i32_29 = arith.constant 0 : i32
    %51 = vector.broadcast %c0_i32_29 : i32 to vector<2x8xi32>
    %52 = arith.cmpi eq, %35, %51 : vector<2x8xi32>
    %53 = vector.shape_cast %45 : vector<2x1xi32> to vector<2x1xi32>
    %54 = vector.broadcast %53 : vector<2x1xi32> to vector<2x8xi32>
    %55 = arith.select %52, %54, %37 : vector<2x8xi1>, vector<2x8xi32>
    %56 = vector.broadcast %45 : vector<2x1xi32> to vector<2x16xi32>
    %57 = arith.cmpi eq, %34, %56 : vector<2x16xi32>
    %cst_30 = arith.constant -1.000000e+00 : f32
    %58 = vector.broadcast %cst_30 : f32 to vector<2x16xf32>
    %59 = arith.select %57, %58, %33 : vector<2x16xi1>, vector<2x16xf32>
    %cst_31 = arith.constant dense<0xFF800000> : vector<2xf32>
    %60 = vector.multi_reduction <maximumf>, %59, %cst_31 [1] : vector<2x16xf32> to vector<2xf32>
    %61 = vector.shape_cast %60 : vector<2xf32> to vector<2x1xf32>
    %62 = vector.broadcast %61 : vector<2x1xf32> to vector<2x16xf32>
    %63 = arith.cmpf oge, %59, %62 : vector<2x16xf32>
    %c16_i32_32 = arith.constant 16 : i32
    %64 = vector.broadcast %c16_i32_32 : i32 to vector<2x16xi32>
    %65 = arith.select %63, %34, %64 : vector<2x16xi1>, vector<2x16xi32>
    %cst_33 = arith.constant dense<2147483647> : vector<2xi32>
    %66 = vector.multi_reduction <minsi>, %65, %cst_33 [1] : vector<2x16xi32> to vector<2xi32>
    %67 = vector.shape_cast %66 : vector<2xi32> to vector<2x1xi32>
    %c1_i32 = arith.constant 1 : i32
    %68 = vector.broadcast %c1_i32 : i32 to vector<2x8xi32>
    %69 = arith.cmpi eq, %35, %68 : vector<2x8xi32>
    %70 = vector.shape_cast %61 : vector<2x1xf32> to vector<2x1xf32>
    %71 = vector.broadcast %70 : vector<2x1xf32> to vector<2x8xf32>
    %72 = arith.select %69, %71, %50 : vector<2x8xi1>, vector<2x8xf32>
    %c1_i32_34 = arith.constant 1 : i32
    %73 = vector.broadcast %c1_i32_34 : i32 to vector<2x8xi32>
    %74 = arith.cmpi eq, %35, %73 : vector<2x8xi32>
    %75 = vector.shape_cast %67 : vector<2x1xi32> to vector<2x1xi32>
    %76 = vector.broadcast %75 : vector<2x1xi32> to vector<2x8xi32>
    %77 = arith.select %74, %76, %55 : vector<2x8xi1>, vector<2x8xi32>
    %78 = vector.broadcast %67 : vector<2x1xi32> to vector<2x16xi32>
    %79 = arith.cmpi eq, %34, %78 : vector<2x16xi32>
    %cst_35 = arith.constant -1.000000e+00 : f32
    %80 = vector.broadcast %cst_35 : f32 to vector<2x16xf32>
    %81 = arith.select %79, %80, %59 : vector<2x16xi1>, vector<2x16xf32>
    %cst_36 = arith.constant dense<0xFF800000> : vector<2xf32>
    %82 = vector.multi_reduction <maximumf>, %81, %cst_36 [1] : vector<2x16xf32> to vector<2xf32>
    %83 = vector.shape_cast %82 : vector<2xf32> to vector<2x1xf32>
    %84 = vector.broadcast %83 : vector<2x1xf32> to vector<2x16xf32>
    %85 = arith.cmpf oge, %81, %84 : vector<2x16xf32>
    %c16_i32_37 = arith.constant 16 : i32
    %86 = vector.broadcast %c16_i32_37 : i32 to vector<2x16xi32>
    %87 = arith.select %85, %34, %86 : vector<2x16xi1>, vector<2x16xi32>
    %cst_38 = arith.constant dense<2147483647> : vector<2xi32>
    %88 = vector.multi_reduction <minsi>, %87, %cst_38 [1] : vector<2x16xi32> to vector<2xi32>
    %89 = vector.shape_cast %88 : vector<2xi32> to vector<2x1xi32>
    %c2_i32 = arith.constant 2 : i32
    %90 = vector.broadcast %c2_i32 : i32 to vector<2x8xi32>
    %91 = arith.cmpi eq, %35, %90 : vector<2x8xi32>
    %92 = vector.shape_cast %83 : vector<2x1xf32> to vector<2x1xf32>
    %93 = vector.broadcast %92 : vector<2x1xf32> to vector<2x8xf32>
    %94 = arith.select %91, %93, %72 : vector<2x8xi1>, vector<2x8xf32>
    %c2_i32_39 = arith.constant 2 : i32
    %95 = vector.broadcast %c2_i32_39 : i32 to vector<2x8xi32>
    %96 = arith.cmpi eq, %35, %95 : vector<2x8xi32>
    %97 = vector.shape_cast %89 : vector<2x1xi32> to vector<2x1xi32>
    %98 = vector.broadcast %97 : vector<2x1xi32> to vector<2x8xi32>
    %99 = arith.select %96, %98, %77 : vector<2x8xi1>, vector<2x8xi32>
    %100 = vector.broadcast %89 : vector<2x1xi32> to vector<2x16xi32>
    %101 = arith.cmpi eq, %34, %100 : vector<2x16xi32>
    %cst_40 = arith.constant -1.000000e+00 : f32
    %102 = vector.broadcast %cst_40 : f32 to vector<2x16xf32>
    %103 = arith.select %101, %102, %81 : vector<2x16xi1>, vector<2x16xf32>
    %cst_41 = arith.constant dense<0xFF800000> : vector<2xf32>
    %104 = vector.multi_reduction <maximumf>, %103, %cst_41 [1] : vector<2x16xf32> to vector<2xf32>
    %105 = vector.shape_cast %104 : vector<2xf32> to vector<2x1xf32>
    %106 = vector.broadcast %105 : vector<2x1xf32> to vector<2x16xf32>
    %107 = arith.cmpf oge, %103, %106 : vector<2x16xf32>
    %c16_i32_42 = arith.constant 16 : i32
    %108 = vector.broadcast %c16_i32_42 : i32 to vector<2x16xi32>
    %109 = arith.select %107, %34, %108 : vector<2x16xi1>, vector<2x16xi32>
    %cst_43 = arith.constant dense<2147483647> : vector<2xi32>
    %110 = vector.multi_reduction <minsi>, %109, %cst_43 [1] : vector<2x16xi32> to vector<2xi32>
    %111 = vector.shape_cast %110 : vector<2xi32> to vector<2x1xi32>
    %c3_i32 = arith.constant 3 : i32
    %112 = vector.broadcast %c3_i32 : i32 to vector<2x8xi32>
    %113 = arith.cmpi eq, %35, %112 : vector<2x8xi32>
    %114 = vector.shape_cast %105 : vector<2x1xf32> to vector<2x1xf32>
    %115 = vector.broadcast %114 : vector<2x1xf32> to vector<2x8xf32>
    %116 = arith.select %113, %115, %94 : vector<2x8xi1>, vector<2x8xf32>
    %c3_i32_44 = arith.constant 3 : i32
    %117 = vector.broadcast %c3_i32_44 : i32 to vector<2x8xi32>
    %118 = arith.cmpi eq, %35, %117 : vector<2x8xi32>
    %119 = vector.shape_cast %111 : vector<2x1xi32> to vector<2x1xi32>
    %120 = vector.broadcast %119 : vector<2x1xi32> to vector<2x8xi32>
    %121 = arith.select %118, %120, %99 : vector<2x8xi1>, vector<2x8xi32>
    %122 = vector.broadcast %111 : vector<2x1xi32> to vector<2x16xi32>
    %123 = arith.cmpi eq, %34, %122 : vector<2x16xi32>
    %cst_45 = arith.constant -1.000000e+00 : f32
    %124 = vector.broadcast %cst_45 : f32 to vector<2x16xf32>
    %125 = arith.select %123, %124, %103 : vector<2x16xi1>, vector<2x16xf32>
    %cst_46 = arith.constant dense<0xFF800000> : vector<2xf32>
    %126 = vector.multi_reduction <maximumf>, %125, %cst_46 [1] : vector<2x16xf32> to vector<2xf32>
    %127 = vector.shape_cast %126 : vector<2xf32> to vector<2x1xf32>
    %128 = vector.broadcast %127 : vector<2x1xf32> to vector<2x16xf32>
    %129 = arith.cmpf oge, %125, %128 : vector<2x16xf32>
    %c16_i32_47 = arith.constant 16 : i32
    %130 = vector.broadcast %c16_i32_47 : i32 to vector<2x16xi32>
    %131 = arith.select %129, %34, %130 : vector<2x16xi1>, vector<2x16xi32>
    %cst_48 = arith.constant dense<2147483647> : vector<2xi32>
    %132 = vector.multi_reduction <minsi>, %131, %cst_48 [1] : vector<2x16xi32> to vector<2xi32>
    %133 = vector.shape_cast %132 : vector<2xi32> to vector<2x1xi32>
    %c4_i32 = arith.constant 4 : i32
    %134 = vector.broadcast %c4_i32 : i32 to vector<2x8xi32>
    %135 = arith.cmpi eq, %35, %134 : vector<2x8xi32>
    %136 = vector.shape_cast %127 : vector<2x1xf32> to vector<2x1xf32>
    %137 = vector.broadcast %136 : vector<2x1xf32> to vector<2x8xf32>
    %138 = arith.select %135, %137, %116 : vector<2x8xi1>, vector<2x8xf32>
    %c4_i32_49 = arith.constant 4 : i32
    %139 = vector.broadcast %c4_i32_49 : i32 to vector<2x8xi32>
    %140 = arith.cmpi eq, %35, %139 : vector<2x8xi32>
    %141 = vector.shape_cast %133 : vector<2x1xi32> to vector<2x1xi32>
    %142 = vector.broadcast %141 : vector<2x1xi32> to vector<2x8xi32>
    %143 = arith.select %140, %142, %121 : vector<2x8xi1>, vector<2x8xi32>
    %144 = vector.broadcast %133 : vector<2x1xi32> to vector<2x16xi32>
    %145 = arith.cmpi eq, %34, %144 : vector<2x16xi32>
    %cst_50 = arith.constant -1.000000e+00 : f32
    %146 = vector.broadcast %cst_50 : f32 to vector<2x16xf32>
    %147 = arith.select %145, %146, %125 : vector<2x16xi1>, vector<2x16xf32>
    %cst_51 = arith.constant dense<0xFF800000> : vector<2xf32>
    %148 = vector.multi_reduction <maximumf>, %147, %cst_51 [1] : vector<2x16xf32> to vector<2xf32>
    %149 = vector.shape_cast %148 : vector<2xf32> to vector<2x1xf32>
    %150 = vector.broadcast %149 : vector<2x1xf32> to vector<2x16xf32>
    %151 = arith.cmpf oge, %147, %150 : vector<2x16xf32>
    %c16_i32_52 = arith.constant 16 : i32
    %152 = vector.broadcast %c16_i32_52 : i32 to vector<2x16xi32>
    %153 = arith.select %151, %34, %152 : vector<2x16xi1>, vector<2x16xi32>
    %cst_53 = arith.constant dense<2147483647> : vector<2xi32>
    %154 = vector.multi_reduction <minsi>, %153, %cst_53 [1] : vector<2x16xi32> to vector<2xi32>
    %155 = vector.shape_cast %154 : vector<2xi32> to vector<2x1xi32>
    %c5_i32 = arith.constant 5 : i32
    %156 = vector.broadcast %c5_i32 : i32 to vector<2x8xi32>
    %157 = arith.cmpi eq, %35, %156 : vector<2x8xi32>
    %158 = vector.shape_cast %149 : vector<2x1xf32> to vector<2x1xf32>
    %159 = vector.broadcast %158 : vector<2x1xf32> to vector<2x8xf32>
    %160 = arith.select %157, %159, %138 : vector<2x8xi1>, vector<2x8xf32>
    %c5_i32_54 = arith.constant 5 : i32
    %161 = vector.broadcast %c5_i32_54 : i32 to vector<2x8xi32>
    %162 = arith.cmpi eq, %35, %161 : vector<2x8xi32>
    %163 = vector.shape_cast %155 : vector<2x1xi32> to vector<2x1xi32>
    %164 = vector.broadcast %163 : vector<2x1xi32> to vector<2x8xi32>
    %165 = arith.select %162, %164, %143 : vector<2x8xi1>, vector<2x8xi32>
    %166 = vector.broadcast %155 : vector<2x1xi32> to vector<2x16xi32>
    %167 = arith.cmpi eq, %34, %166 : vector<2x16xi32>
    %cst_55 = arith.constant -1.000000e+00 : f32
    %168 = vector.broadcast %cst_55 : f32 to vector<2x16xf32>
    %169 = arith.select %167, %168, %147 : vector<2x16xi1>, vector<2x16xf32>
    %cst_56 = arith.constant dense<0xFF800000> : vector<2xf32>
    %170 = vector.multi_reduction <maximumf>, %169, %cst_56 [1] : vector<2x16xf32> to vector<2xf32>
    %171 = vector.shape_cast %170 : vector<2xf32> to vector<2x1xf32>
    %172 = vector.broadcast %171 : vector<2x1xf32> to vector<2x16xf32>
    %173 = arith.cmpf oge, %169, %172 : vector<2x16xf32>
    %c16_i32_57 = arith.constant 16 : i32
    %174 = vector.broadcast %c16_i32_57 : i32 to vector<2x16xi32>
    %175 = arith.select %173, %34, %174 : vector<2x16xi1>, vector<2x16xi32>
    %cst_58 = arith.constant dense<2147483647> : vector<2xi32>
    %176 = vector.multi_reduction <minsi>, %175, %cst_58 [1] : vector<2x16xi32> to vector<2xi32>
    %177 = vector.shape_cast %176 : vector<2xi32> to vector<2x1xi32>
    %c6_i32 = arith.constant 6 : i32
    %178 = vector.broadcast %c6_i32 : i32 to vector<2x8xi32>
    %179 = arith.cmpi eq, %35, %178 : vector<2x8xi32>
    %180 = vector.shape_cast %171 : vector<2x1xf32> to vector<2x1xf32>
    %181 = vector.broadcast %180 : vector<2x1xf32> to vector<2x8xf32>
    %182 = arith.select %179, %181, %160 : vector<2x8xi1>, vector<2x8xf32>
    %c6_i32_59 = arith.constant 6 : i32
    %183 = vector.broadcast %c6_i32_59 : i32 to vector<2x8xi32>
    %184 = arith.cmpi eq, %35, %183 : vector<2x8xi32>
    %185 = vector.shape_cast %177 : vector<2x1xi32> to vector<2x1xi32>
    %186 = vector.broadcast %185 : vector<2x1xi32> to vector<2x8xi32>
    %187 = arith.select %184, %186, %165 : vector<2x8xi1>, vector<2x8xi32>
    %188 = vector.broadcast %177 : vector<2x1xi32> to vector<2x16xi32>
    %189 = arith.cmpi eq, %34, %188 : vector<2x16xi32>
    %cst_60 = arith.constant -1.000000e+00 : f32
    %190 = vector.broadcast %cst_60 : f32 to vector<2x16xf32>
    %191 = arith.select %189, %190, %169 : vector<2x16xi1>, vector<2x16xf32>
    %cst_61 = arith.constant dense<0xFF800000> : vector<2xf32>
    %192 = vector.multi_reduction <maximumf>, %191, %cst_61 [1] : vector<2x16xf32> to vector<2xf32>
    %193 = vector.shape_cast %192 : vector<2xf32> to vector<2x1xf32>
    %194 = vector.broadcast %193 : vector<2x1xf32> to vector<2x16xf32>
    %195 = arith.cmpf oge, %191, %194 : vector<2x16xf32>
    %c16_i32_62 = arith.constant 16 : i32
    %196 = vector.broadcast %c16_i32_62 : i32 to vector<2x16xi32>
    %197 = arith.select %195, %34, %196 : vector<2x16xi1>, vector<2x16xi32>
    %cst_63 = arith.constant dense<2147483647> : vector<2xi32>
    %198 = vector.multi_reduction <minsi>, %197, %cst_63 [1] : vector<2x16xi32> to vector<2xi32>
    %199 = vector.shape_cast %198 : vector<2xi32> to vector<2x1xi32>
    %c7_i32 = arith.constant 7 : i32
    %200 = vector.broadcast %c7_i32 : i32 to vector<2x8xi32>
    %201 = arith.cmpi eq, %35, %200 : vector<2x8xi32>
    %202 = vector.shape_cast %193 : vector<2x1xf32> to vector<2x1xf32>
    %203 = vector.broadcast %202 : vector<2x1xf32> to vector<2x8xf32>
    %204 = arith.select %201, %203, %182 : vector<2x8xi1>, vector<2x8xf32>
    %c7_i32_64 = arith.constant 7 : i32
    %205 = vector.broadcast %c7_i32_64 : i32 to vector<2x8xi32>
    %206 = arith.cmpi eq, %35, %205 : vector<2x8xi32>
    %207 = vector.shape_cast %199 : vector<2x1xi32> to vector<2x1xi32>
    %208 = vector.broadcast %207 : vector<2x1xi32> to vector<2x8xi32>
    %209 = arith.select %206, %208, %187 : vector<2x8xi1>, vector<2x8xi32>
    %c0_65 = arith.constant 0 : index
    %c0_66 = arith.constant 0 : index
    %210 = vector.load %arg11[%c0_65, %c0_66] : memref<2x8xf32, #tpu.memory_space<vmem>>, vector<2x8xf32>
    tpu.vector_store %arg11[%c0_65, %c0_66], %204 {strides = array<i32>} : memref<2x8xf32, #tpu.memory_space<vmem>>, vector<2x8xf32>,
    %c0_67 = arith.constant 0 : index
    %c0_68 = arith.constant 0 : index
    %211 = vector.load %arg12[%c0_67, %c0_68] : memref<2x8xi32, #tpu.memory_space<vmem>>, vector<2x8xi32>
    tpu.vector_store %arg12[%c0_67, %c0_68], %209 {strides = array<i32>} : memref<2x8xi32, #tpu.memory_space<vmem>>, vector<2x8xi32>,
    return
  }
  func.func @transform_0(%arg0: i32) -> (i32, i32) {
    %c0_i32 = arith.constant 0 : i32
    %c0_i32_0 = arith.constant 0 : i32
    %c0_i32_1 = arith.constant 0 : i32
    return %c0_i32, %c0_i32_0 : i32, i32
  }
  func.func @transform_1(%arg0: i32) -> (i32, i32) {
    %c0_i32 = arith.constant 0 : i32
    %c0_i32_0 = arith.constant 0 : i32
    %c0_i32_1 = arith.constant 0 : i32
    return %c0_i32, %c0_i32_0 : i32, i32
  }
  func.func @transform_2(%arg0: i32) -> (i32, i32) {
    %c0_i32 = arith.constant 0 : i32
    %c0_i32_0 = arith.constant 0 : i32
    %c0_i32_1 = arith.constant 0 : i32
    return %c0_i32, %c0_i32_0 : i32, i32
  }
  func.func @transform_3(%arg0: i32) -> (i32, i32) {
    %c0_i32 = arith.constant 0 : i32
    %c0_i32_0 = arith.constant 0 : i32
    %c0_i32_1 = arith.constant 0 : i32
    return %c0_i32, %c0_i32_0 : i32, i32
  }
  func.func @transform_4(%arg0: i32) -> (i32, i32) {
    %c0_i32 = arith.constant 0 : i32
    %c0_i32_0 = arith.constant 0 : i32
    %c0_i32_1 = arith.constant 0 : i32
    return %c0_i32, %c0_i32_0 : i32, i32
  }
  func.func @transform_5(%arg0: i32) -> (i32, i32) {
    %c0_i32 = arith.constant 0 : i32
    %c0_i32_0 = arith.constant 0 : i32
    %c0_i32_1 = arith.constant 0 : i32
    return %c0_i32, %c0_i32_0 : i32, i32
  }
  func.func @transform_6(%arg0: i32) -> (i32, i32) {
    %c0_i32 = arith.constant 0 : i32
    %c0_i32_0 = arith.constant 0 : i32
    %c0_i32_1 = arith.constant 0 : i32
    return %c0_i32, %c0_i32_0 : i32, i32
  }
  func.func @transform_7(%arg0: i32) -> (i32, i32) {
    %c0_i32 = arith.constant 0 : i32
    %c0_i32_0 = arith.constant 0 : i32
    %c0_i32_1 = arith.constant 0 : i32
    return %c0_i32, %c0_i32_0 : i32, i32
  }
  func.func @transform_8(%arg0: i32) -> (i32, i32) {
    %c0_i32 = arith.constant 0 : i32
    %c0_i32_0 = arith.constant 0 : i32
    %c0_i32_1 = arith.constant 0 : i32
    return %c0_i32, %c0_i32_0 : i32, i32
  }
  func.func @transform_9(%arg0: i32) -> (i32, i32) {
    %c0_i32 = arith.constant 0 : i32
    %c0_i32_0 = arith.constant 0 : i32
    %c0_i32_1 = arith.constant 0 : i32
    return %c0_i32, %c0_i32_0 : i32, i32
  }
  func.func @transform_10(%arg0: i32) -> (i32, i32) {
    %c0_i32 = arith.constant 0 : i32
    %c0_i32_0 = arith.constant 0 : i32
    %c0_i32_1 = arith.constant 0 : i32
    return %c0_i32, %c0_i32_0 : i32, i32
  }
  func.func @transform_11(%arg0: i32) -> (i32, i32) {
    %c0_i32 = arith.constant 0 : i32
    %c0_i32_0 = arith.constant 0 : i32
    %c0_i32_1 = arith.constant 0 : i32
    return %c0_i32, %c0_i32_0 : i32, i32
  }
}

</mosaic_0001>

<bundles_post_ra>
// kernel: gated_expert_forward.4
= control target key start
LH: loop header
LB: loop body
LE: loop exit
PB: predicated region body
PF: predicated region fallthrough
CT: control target
= control target key end

     0   :  { %v1842_v0 = vmov 0.0   ;;  %vm1273_vm0 = vmmov 0   ;;  %vm87_vm1 = vcmask 130048   ;;  %v1274_v4 = vmov 0   ;;  %s1838_s0 = inlined_call_operand.vmem [shape: bf16[2,16,64], index: 0, kind: input, shape index: {}]   ;;  %s1839_s1 = inlined_call_operand.vmem [shape: bf16[48,16], index: 1, kind: input, shape index: {}]   ;;  %s1840_s2 = inlined_call_operand.vmem [shape: f32[48,1], index: 2, kind: input, shape index: {}]   ;;  %s1841_s3 = inlined_call_operand.vmem [shape: f32[16,2], index: 3, kind: output, shape index: {}]  }
   0x1   :  { %1137 = vmatprep.subr.bf16.mxu0 %v1842_v0  ;;  %1151 = vmatprep.subr.bf16.mxu1 %v1842_v0  ;;  %v1171_v1 = vld [vmem:[%s1838_s0] sm:$0xff]   ;;  %v1172_v2 = vld [vmem:[%s1838_s0 + $0x8] sm:$0xff]   ;;  %v30_v5 = vld [vmem:[%s1840_s2 + $0x10] sm:$0xff]  ;;  %v1275_v13 = vmov 1983009808   ;;  %v160_v15 = vlaneseq  ;;  %vm492_vm2 = vcmask 517120  }
   0x2   :  { %1139 = vmatprep.mubr.msk.bf16.mxu0 %vm1273_vm0, %v1842_v0  ;;  %1153 = vmatprep.mubr.msk.bf16.mxu1 %vm1273_vm0, %v1842_v0  ;;  %v1173_v3 = vld [vmem:[%s1839_s1] sm:$0xff]   ;;  %v31_v7 = vld [vmem:[%s1840_s2 + $0x18] sm:$0xff]  ;;  %v1174_v8 = vld [vmem:[%s1839_s1 + $0x8] sm:$0xff]   ;;  %v158_v14 = vunpack.c.l.s4 %v1275_v13  ;;  %vm19_vm3 = vcmask 15360   ;;  %vm785_vm4 = vcmask 523264   ;;  %vm796_vm5 = vcmask 7168  }
   0x3   :  { %1138 = vmatpush3.bf16.msra.mxu0 %v1171_v1  ;;  %1170 = vset.pattern.permute.xlu1 %v1274_v4  ;;  %v28_v6 = vld [vmem:[%s1840_s2] sm:$0xff]  ;;  %v29_v9 = vld [vmem:[%s1840_s2 + $0x8] sm:$0xff]  ;;  %v1175_v12 = vld [vmem:[%s1839_s1 + $0x10] sm:$0xff]   ;;  %v161_v18 = vshrl.u32 %v160_v15, 7  ;;  %vm1109_vm6 = vcmask 15368  }
   0x4   :  { %1152 = vmatpush3.bf16.msra.mxu1 %v1172_v2  ;;  %1169 = vset.pattern.permute.xlu0 %v1274_v4  ;;  %v33_v10 = vld [vmem:[%s1840_s2 + $0x28] sm:$0xff]  ;;  %v32_v11 = vld [vmem:[%s1840_s2 + $0x20] sm:$0xff]  ;;  %v159_v17 = vunpack.c.0.s8 %v158_v14 }
   0x5   :  { %48 = vperm.xlu1 %1170, %v30_v5   ;;  %38 = vperm.xlu0 %1169, %v28_v6  }
   0x6   :  { %1140 = vmatmul.mubr.msk.bf16.vlgmr.msra.gmra.mrb[0].mxu0 %vm87_vm1, %v1173_v3  ;;  %v1349_v22 = vsub.s32 %v159_v17, %v161_v18 }
   0x7   :  { %1154 = vmatmul.mubr.msk.bf16.vlgmr.msra.gmra.mrb[0].mxu1 %vm87_vm1, %v1173_v3  ;;  %1143 = vmatprep.mubr.msk.bf16.mxu0 %vm1273_vm0, %v1842_v0 }
   0x8   :  { %1157 = vmatprep.mubr.msk.bf16.mxu1 %vm1273_vm0, %v1842_v0 }
   0x9   :  { %53 = vperm.xlu1 %1170, %v31_v7   ;;  %43 = vperm.xlu0 %1169, %v29_v9  }
   0xd   :  { %63 = vperm.xlu1 %1170, %v33_v10   ;;  %58 = vperm.xlu0 %1169, %v32_v11  }
   0xe   :  { %1144 = vmatmul.mubr.msk.bf16.gmra.mrb[4].mxu0 %vm87_vm1, %v1174_v8 }
   0xf   :  { %1158 = vmatmul.mubr.msk.bf16.gmra.mrb[4].mxu1 %vm87_vm1, %v1174_v8  ;;  %1147 = vmatprep.mubr.msk.bf16.mxu0 %vm1273_vm0, %v1842_v0 }
  0x10   :  { %1161 = vmatprep.mubr.msk.bf16.mxu1 %vm1273_vm0, %v1842_v0 }
  0x16   :  { %1148 = vmatmul.mubr.msk.bf16.gmra.mrb[8].mxu0 %vm87_vm1, %v1175_v12 }
  0x17   :  { %1162 = vmatmul.mubr.msk.bf16.gmra.mrb[8].mxu1 %vm87_vm1, %v1175_v12 }
  0x84   :  { %v39_v16 = vpop.permute.xlu0 %38  ;;  %v49_v40 = vpop.permute.xlu1 %48 }
  0x88   :  { %v44_v20 = vpop.permute.xlu0 %43 }
  0xd9   :  { %v131_v19 = vpop.f32.mrb[0].mxu0 }
  0xda   :  { %v132_v21 = vadd.f32 %v131_v19, %v39_v16  ;;  %v329_v23 = vpop.f32.mrb[0].mxu1  ;;  %v1141_v24 = vpop.f32.mrb[1].mxu0 }
  0xdb   :  { %v330_v25 = vadd.f32 %v329_v23, %v39_v16  ;;  %v1155_v26 = vpop.f32.mrb[1].mxu1  ;;  %v134_v27 = vpop.f32.mrb[2].mxu0 }
  0xdc   :  { %v156_v28 = vcombine.high %v132_v21, %v132_v21  ;;  %v135_v29 = vadd.f32 %v134_v27, %v44_v20  ;;  %v332_v30 = vpop.f32.mrb[2].mxu1  ;;  %v1142_v31 = vpop.f32.mrb[3].mxu0  ;;  %v163_v35 = vrot.slane %v132_v21, %v1349_v22 }
  0xdd   :  { %v354_v32 = vcombine.high %v330_v25, %v330_v25  ;;  %v333_v33 = vadd.f32 %v332_v30, %v44_v20  ;;  %v1156_v34 = vpop.f32.mrb[3].mxu1  ;;  %v361_v37 = vrot.slane %v330_v25, %v1349_v22 }
  0xde   :  { %v1353_v36 = vrot.slane %v156_v28, %v1349_v22  ;;  %v173_v38 = vcombine.high %v135_v29, %v135_v29  ;;  %v1357_v39 = vrot.slane %v135_v29, %v1349_v22  ;;  %v1362_v44 = vcombine.high %v163_v35, %v163_v35 }
  0xdf   :  { %v1360_v41 = vrot.slane %v354_v32, %v1349_v22  ;;  %v371_v42 = vcombine.high %v333_v33, %v333_v33  ;;  %v1368_v49 = vcombine.high %v361_v37, %v361_v37  ;;  %v1371_v50 = vrot.slane %v333_v33, %v1349_v22 }
  0xe0   :  { %v1366_v48 = vcombine.high %v1353_v36, %v1353_v36  ;;  %v1376_v54 = vrot.slane %v173_v38, %v1349_v22  ;;  %v1380_v55 = vcombine.high %v1357_v39, %v1357_v39 }
  0xe1   :  { %v139_v43 = vpop.f32.mrb[4].mxu0  ;;  %v1387_v60 = vcombine.high %v1360_v41, %v1360_v41  ;;  %v1390_v61 = vrot.slane %v371_v42, %v1349_v22 }
  0xe2   :  { %v140_v45 = vadd.f32 %v139_v43, %v49_v40  ;;  %v337_v46 = vpop.f32.mrb[4].mxu1  ;;  %v1145_v47 = vpop.f32.mrb[5].mxu0 }
  0xe3   :  { %v338_v51 = vadd.f32 %v337_v46, %v49_v40  ;;  %v1159_v52 = vpop.f32.mrb[5].mxu1  ;;  %v1373_v53 = vpop.f32.mrb[6].mxu0 }
  0xe4   :  { %v200_v56 = vcombine.high %v140_v45, %v140_v45  ;;  %v207_v57 = vrot.slane %v140_v45, %v1349_v22  ;;  %v1383_v58 = vpop.f32.mrb[6].mxu1  ;;  %v1146_v59 = vpop.f32.mrb[7].mxu0 }
  0xe5   :  { %v398_v62 = vcombine.high %v338_v51, %v338_v51  ;;  %v405_v63 = vrot.slane %v338_v51, %v1349_v22  ;;  %v1160_v1 = vpop.f32.mrb[7].mxu1 }
  0xe6   :  { %v214_v2 = vrot.slane %v200_v56, %v1349_v22  ;;  %v215_v3 = vcombine.high %v207_v57, %v207_v57  ;;  %v484_v4 = vmul.f32 %v207_v57, %v163_v35  ;;  %v799_v5 = vmul.f32 %v361_v37, %v207_v57 }
  0xe7   :  { %v1395_v6 = vrot.slane %v398_v62, %v1349_v22  ;;  %v1397_v7 = vcombine.high %v405_v63, %v405_v63  ;;  %v1399_v8 = vmul.f32 %v405_v63, %v163_v35  ;;  %v1401_v9 = vmul.f32 %v405_v63, %v361_v37 }
  0xe8   :  { %v216_v10 = vcombine.high %v214_v2, %v214_v2  ;;  %v485_v11 = vmul.f32 %v215_v3, %v1362_v44  ;;  %v486_v12 = vmul.f32 %v214_v2, %v1353_v36  ;;  %v493_v13 = vsel %vm492_vm2, %v484_v4, 0.0 }
  0xe9   :  { %v494_v14 = vrot.slane %v493_v13, 4  ;;  %v800_v15 = vmul.f32 %v1368_v49, %v215_v3  ;;  %v801_v16 = vmul.f32 %v1360_v41, %v214_v2  ;;  %v807_v17 = vsel %vm492_vm2, %v799_v5, 0.0  ;;  %v1409_v18 = vpop.f32.mrb[8].mxu0 }
  0xea   :  { %v487_v19 = vmul.f32 %v216_v10, %v1366_v48  ;;  %v500_v20 = vsel %vm492_vm2, %v485_v11, 0.0  ;;  %v507_v21 = vsel %vm492_vm2, %v486_v12, 0.0  ;;  %v802_v23 = vmul.f32 %v1387_v60, %v216_v10  ;;  %v1415_v24 = vpop.f32.mrb[8].mxu1  ;;  %v1149_v25 = vpop.f32.mrb[9].mxu0 }
  0xeb   :  { %v495_v26 = vadd.f32 %v494_v14, %v493_v13  ;;  %v501_v27 = vrot.slane %v500_v20, 4  ;;  %v508_v28 = vrot.slane %v507_v21, 4  ;;  %v808_v29 = vrot.slane %v807_v17, 4  ;;  %v1163_v30 = vpop.f32.mrb[9].mxu1  ;;  %v1417_v31 = vpop.f32.mrb[10].mxu0 }
  0xec   :  { %v514_v32 = vsel %vm492_vm2, %v487_v19, 0.0  ;;  %v814_v33 = vsel %vm492_vm2, %v800_v15, 0.0  ;;  %v821_v34 = vsel %vm492_vm2, %v801_v16, 0.0  ;;  %v828_v35 = vsel %vm492_vm2, %v802_v23, 0.0  ;;  %v1423_v37 = vpop.f32.mrb[10].mxu1  ;;  %v1150_v38 = vpop.f32.mrb[11].mxu0 }
  0xed   :  { %v496_v40 = vrot.slane %v495_v26, 2  ;;  %v502_v42 = vadd.f32 %v501_v27, %v500_v20  ;;  %v509_v43 = vadd.f32 %v508_v28, %v507_v21  ;;  %v515_v45 = vrot.slane %v514_v32, 4  ;;  %v1164_v46 = vpop.f32.mrb[11].mxu1 }
  0xee   :  { %v809_v47 = vadd.f32 %v808_v29, %v807_v17  ;;  %v815_v51 = vrot.slane %v814_v33, 4  ;;  %v822_v52 = vrot.slane %v821_v34, 4  ;;  %v829_v56 = vrot.slane %v828_v35, 4 }
  0xef   :  { %v497_v57 = vadd.f32 %v496_v40, %v495_v26  ;;  %v503_v59 = vrot.slane %v502_v42, 2  ;;  %v510_v62 = vrot.slane %v509_v43, 2  ;;  %v516_v63 = vadd.f32 %v515_v45, %v514_v32 }
  0xf0   :  { %v810_v1 = vrot.slane %v809_v47, 2  ;;  %v816_v2 = vadd.f32 %v815_v51, %v814_v33  ;;  %v823_v3 = vadd.f32 %v822_v52, %v821_v34  ;;  %v830_v4 = vadd.f32 %v829_v56, %v828_v35 }
  0xf1   :  { %v498_v5 = vrot.slane %v497_v57, 1  ;;  %v504_v10 = vadd.f32 %v503_v59, %v502_v42  ;;  %v511_v11 = vadd.f32 %v510_v62, %v509_v43  ;;  %v517_v12 = vrot.slane %v516_v63, 2 }
  0xf2   :  { %v811_v13 = vadd.f32 %v810_v1, %v809_v47  ;;  %v817_v14 = vrot.slane %v816_v2, 2  ;;  %v824_v15 = vrot.slane %v823_v3, 2  ;;  %v831_v16 = vrot.slane %v830_v4, 2 }
  0xf3   :  { %v499_v17 = vadd.f32 %v498_v5, %v497_v57  ;;  %v505_v19 = vrot.slane %v504_v10, 1  ;;  %v512_v20 = vrot.slane %v511_v11, 1  ;;  %v518_v21 = vadd.f32 %v517_v12, %v516_v63 }
  0xf4   :  { %v812_v23 = vrot.slane %v811_v13, 1  ;;  %v818_v25 = vadd.f32 %v817_v14, %v816_v2  ;;  %v825_v26 = vadd.f32 %v824_v15, %v823_v3  ;;  %v832_v27 = vadd.f32 %v831_v16, %v830_v4 }
  0xf5   :  { %v506_v28 = vadd.f32 %v505_v19, %v504_v10  ;;  %v513_v29 = vadd.f32 %v512_v20, %v511_v11  ;;  %v519_v30 = vrot.slane %v518_v21, 1  ;;  %v1425_v32 = vmul.f32 0.70710677, %v499_v17 }
  0xf6   :  { %v813_v33 = vadd.f32 %v812_v23, %v811_v13  ;;  %v819_v34 = vrot.slane %v818_v25, 1  ;;  %v826_v35 = vrot.slane %v825_v26, 1  ;;  %v833_v38 = vrot.slane %v832_v27, 1 }
  0xf7   :  { %v520_v40 = vadd.f32 %v519_v30, %v518_v21  ;;  %v1427_v42 = vmul.f32 0.70710677, %v506_v28  ;;  %v1429_v43 = vmul.f32 0.70710677, %v513_v29  ;;  %v414_v45 = vcombine.high %v1395_v6, %v1395_v6 }
  0xf8   :  { %v820_v46 = vadd.f32 %v819_v34, %v818_v25  ;;  %v827_v47 = vadd.f32 %v826_v35, %v825_v26  ;;  %v834_v51 = vadd.f32 %v833_v38, %v832_v27  ;;  %v1433_v52 = vmul.f32 0.70710677, %v813_v33 }
  0xf9   :  { %v1435_v56 = vmul.f32 0.70710677, %v520_v40  ;;  %v558_v57 = vmul.f32 %v1397_v7, %v1362_v44  ;;  %v559_v59 = vmul.f32 %v1395_v6, %v1353_v36  ;;  %v560_v62 = vmul.f32 %v414_v45, %v1366_v48 }
  0xfa   :  { %v1442_v63 = vmul.f32 0.70710677, %v820_v46  ;;  %v1444_v1 = vmul.f32 0.70710677, %v827_v47  ;;  %v1446_v2 = vmul.f32 0.70710677, %v834_v51  ;;  %v872_v3 = vmul.f32 %v1397_v7, %v1368_v49 }
  0xfb   :  { %v565_v4 = vsel %vm492_vm2, %v1399_v8, 0.0  ;;  %v572_v5 = vsel %vm492_vm2, %v558_v57, 0.0  ;;  %v579_v44 = vsel %vm492_vm2, %v559_v59, 0.0  ;;  %v586_v36 = vsel %vm492_vm2, %v560_v62, 0.0 }
  0xfc   :  { %v566_v10 = vrot.slane %v565_v4, 4  ;;  %v573_v48 = vrot.slane %v572_v5, 4  ;;  %v580_v11 = vrot.slane %v579_v44, 4  ;;  %v587_v12 = vrot.slane %v586_v36, 4 }
  0xfd   :  { %v873_v13 = vmul.f32 %v1395_v6, %v1360_v41  ;;  %v874_v14 = vmul.f32 %v414_v45, %v1387_v60  ;;  %v879_v49 = vsel %vm492_vm2, %v1401_v9, 0.0  ;;  %v886_v7 = vsel %vm492_vm2, %v872_v3, 0.0 }
  0xfe   :  { %v567_v8 = vadd.f32 %v566_v10, %v565_v4  ;;  %v574_v15 = vadd.f32 %v573_v48, %v572_v5  ;;  %v581_v16 = vadd.f32 %v580_v11, %v579_v44  ;;  %v588_v17 = vadd.f32 %v587_v12, %v586_v36  ;;  %v1463_v48 = vpop.permute.xlu1 %53 }
  0xff   :  { %v880_v19 = vrot.slane %v879_v49, 4  ;;  %v887_v20 = vrot.slane %v886_v7, 4  ;;  %v893_v21 = vsel %vm492_vm2, %v873_v13, 0.0  ;;  %v900_v23 = vsel %vm492_vm2, %v874_v14, 0.0 }
 0x100   :  { %v568_v25 = vrot.slane %v567_v8, 2  ;;  %v575_v26 = vrot.slane %v574_v15, 2  ;;  %v582_v41 = vrot.slane %v581_v16, 2  ;;  %v589_v6 = vrot.slane %v588_v17, 2 }
 0x101   :  { %v881_v60 = vadd.f32 %v880_v19, %v879_v49  ;;  %v888_v27 = vadd.f32 %v887_v20, %v886_v7  ;;  %v894_v28 = vrot.slane %v893_v21, 4  ;;  %v901_v9 = vrot.slane %v900_v23, 4 }
 0x102   :  { %v569_v29 = vadd.f32 %v568_v25, %v567_v8  ;;  %v576_v30 = vadd.f32 %v575_v26, %v574_v15  ;;  %v583_v33 = vadd.f32 %v582_v41, %v581_v16  ;;  %v590_v34 = vadd.f32 %v589_v6, %v588_v17 }
 0x103   :  { %v882_v35 = vrot.slane %v881_v60, 2  ;;  %v889_v38 = vrot.slane %v888_v27, 2  ;;  %v895_v40 = vadd.f32 %v894_v28, %v893_v21  ;;  %v902_v45 = vadd.f32 %v901_v9, %v900_v23 }
 0x104   :  { %v570_v46 = vrot.slane %v569_v29, 1  ;;  %v577_v47 = vrot.slane %v576_v30, 1  ;;  %v584_v51 = vrot.slane %v583_v33, 1  ;;  %v591_v57 = vrot.slane %v590_v34, 1 }
 0x105   :  { %v883_v59 = vadd.f32 %v882_v35, %v881_v60  ;;  %v890_v62 = vadd.f32 %v889_v38, %v888_v27  ;;  %v896_v3 = vrot.slane %v895_v40, 2  ;;  %v903_v4 = vrot.slane %v902_v45, 2 }
 0x106   :  { %v571_v5 = vadd.f32 %v570_v46, %v569_v29  ;;  %v578_v44 = vadd.f32 %v577_v47, %v576_v30  ;;  %v585_v36 = vadd.f32 %v584_v51, %v583_v33  ;;  %v592_v10 = vadd.f32 %v591_v57, %v590_v34 }
 0x107   :  { %v884_v11 = vrot.slane %v883_v59, 1  ;;  %v891_v12 = vrot.slane %v890_v62, 1  ;;  %v897_v13 = vadd.f32 %v896_v3, %v895_v40  ;;  %v904_v14 = vadd.f32 %v903_v4, %v902_v45 }
 0x108   :  { %v621_v49 = vmul.f32 0.70710677, %v571_v5  ;;  %v622_v7 = vmul.f32 0.70710677, %v578_v44  ;;  %v623_v8 = vmul.f32 0.70710677, %v585_v36  ;;  %v1467_v15 = vadd.f32 %v1373_v53, %v1463_v48 }
 0x109   :  { %v624_v16 = vmul.f32 0.70710677, %v592_v10  ;;  %v885_v17 = vadd.f32 %v884_v11, %v883_v59  ;;  %v892_v19 = vadd.f32 %v891_v12, %v890_v62  ;;  %v898_v20 = vrot.slane %v897_v13, 1 }
 0x10a   :  { %v629_v21 = vmax.f32 %v1425_v32, %v621_v49  ;;  %v630_v23 = vmax.f32 %v1427_v42, %v622_v7  ;;  %v631_v25 = vmax.f32 %v1429_v43, %v623_v8  ;;  %v905_v26 = vrot.slane %v904_v14, 1 }
 0x10b   :  { %v1473_v41 = vmax.f32 %v1435_v56, %v624_v16  ;;  %v899_v6 = vadd.f32 %v898_v20, %v897_v13  ;;  %v935_v60 = vmul.f32 0.70710677, %v885_v17  ;;  %v936_v27 = vmul.f32 0.70710677, %v892_v19 }
 0x10c   :  { %v637_v53 = vsub.f32 %v1425_v32, %v629_v21  ;;  %v638_v28 = vsub.f32 %v1427_v42, %v630_v23  ;;  %v639_v9 = vsub.f32 %v1429_v43, %v631_v25  ;;  %v661_v29 = vsub.f32 %v621_v49, %v629_v21 }
 0x10d   :  { %v662_v33 = vsub.f32 %v622_v7, %v630_v23  ;;  %v663_v34 = vsub.f32 %v623_v8, %v631_v25  ;;  %v664_v35 = vsub.f32 %v624_v16, %v1473_v41  ;;  %v906_v46 = vadd.f32 %v905_v26, %v904_v14 }
 0x10e   :  { %v645_v38 = vmul.f32 1.442695, %v637_v53  ;;  %v647_v40 = vmul.f32 1.442695, %v638_v28  ;;  %v649_v45 = vmul.f32 1.442695, %v639_v9  ;;  %v943_v32 = vmax.f32 %v1433_v52, %v935_v60 }
 0x10f   :  { %v669_v47 = vmul.f32 1.442695, %v661_v29  ;;  %v671_v51 = vmul.f32 1.442695, %v662_v33  ;;  %v217_v42 = vcombine.high %v1467_v15, %v1467_v15  ;;  %v673_v43 = vmul.f32 1.442695, %v663_v34 }
 0x110   :  { %1176 = vpow2.f32 %v645_v38  ;;  %v675_v57 = vmul.f32 1.442695, %v664_v35  ;;  %v937_v59 = vmul.f32 0.70710677, %v899_v6  ;;  %v1484_v62 = vmul.f32 0.70710677, %v906_v46 }
 0x111   :  { %1178 = vpow2.f32 %v647_v40  ;;  %v944_v3 = vmax.f32 %v1442_v63, %v936_v27  ;;  %v951_v4 = vsub.f32 %v1433_v52, %v943_v32  ;;  %v975_v44 = vsub.f32 %v935_v60, %v943_v32 }
 0x112   :  { %1180 = vpow2.f32 %v649_v45  ;;  %v945_v5 = vmax.f32 %v1444_v1, %v937_v59  ;;  %v224_v36 = vrot.slane %v1467_v15, %v1349_v22  ;;  %v1493_v10 = vmax.f32 %v1446_v2, %v1484_v62 }
 0x113   :  { %1182 = vpow2.f32 %v669_v47  ;;  %v952_v11 = vsub.f32 %v1442_v63, %v944_v3  ;;  %v959_v12 = vmul.f32 1.442695, %v951_v4  ;;  %v976_v14 = vsub.f32 %v936_v27, %v944_v3 }
 0x114   :  { %1184 = vpow2.f32 %v671_v51  ;;  %v953_v13 = vsub.f32 %v1444_v1, %v945_v5  ;;  %v977_v52 = vsub.f32 %v937_v59, %v945_v5  ;;  %v978_v8 = vsub.f32 %v1484_v62, %v1493_v10 }
 0x115   :  { %1186 = vpow2.f32 %v673_v43  ;;  %v961_v7 = vmul.f32 1.442695, %v952_v11  ;;  %v1503_v15 = vcombine.high %v1371_v50, %v1371_v50  ;;  %v1507_v16 = vadd.f32 %v1383_v58, %v1463_v48 }
 0x116   :  { %1188 = vpow2.f32 %v675_v57  ;;  %v963_v63 = vmul.f32 1.442695, %v953_v13  ;;  %v1511_v1 = vcombine.high %v1376_v54, %v1376_v54  ;;  %v1515_v17 = vcombine.high %v1390_v61, %v1390_v61 }
 0x117   :  { %1190 = vpow2.f32 %v959_v12  ;;  %v983_v19 = vmul.f32 1.442695, %v975_v44  ;;  %v231_v20 = vrot.slane %v217_v42, %v1349_v22  ;;  %v232_v21 = vcombine.high %v224_v36, %v224_v36 }
 0x118   :  { %1192 = vpow2.f32 %v961_v7  ;;  %v488_v23 = vmul.f32 %v224_v36, %v1357_v39  ;;  %v985_v25 = vmul.f32 1.442695, %v976_v14  ;;  %v1519_v58 = vmul.f32 1.442695, %v977_v52 }
 0x119   :  { %1194 = vpow2.f32 %v963_v63  ;;  %v803_v48 = vmul.f32 %v1371_v50, %v224_v36  ;;  %v233_v6 = vcombine.high %v231_v20, %v231_v20  ;;  %v489_v60 = vmul.f32 %v232_v21, %v1380_v55 }
 0x11a   :  { %v1522_v26 = vpop.eup %1176  ;;  %v490_v27 = vmul.f32 %v231_v20, %v1376_v54  ;;  %v415_v53 = vcombine.high %v1507_v16, %v1507_v16  ;;  %v521_v9 = vsel %vm492_vm2, %v488_v23, 0.0  ;;  %v804_v29 = vmul.f32 %v1503_v15, %v232_v21 }
 0x11b   :  { %v1528_v28 = vpop.eup %1178  ;;  %v805_v33 = vmul.f32 %v1390_v61, %v231_v20  ;;  %v1535_v34 = vrot.slane %v1507_v16, %v1349_v22  ;;  %1196 = vpow2.f32 %v983_v19  ;;  %v491_v38 = vmul.f32 %v233_v6, %v1511_v1 }
 0x11c   :  { %v1537_v35 = vpop.eup %1180  ;;  %v522_v40 = vrot.slane %v521_v9, 4  ;;  %v528_v45 = vsel %vm492_vm2, %v489_v60, 0.0  ;;  %1198 = vpow2.f32 %v985_v25  ;;  %v535_v51 = vsel %vm492_vm2, %v490_v27, 0.0 }
 0x11d   :  { %v1541_v46 = vpop.eup %1182  ;;  %v529_v47 = vrot.slane %v528_v45, 4  ;;  %v806_v32 = vmul.f32 %v1515_v17, %v233_v6  ;;  %v536_v57 = vrot.slane %v535_v51, 4  ;;  %v542_v59 = vsel %vm492_vm2, %v491_v38, 0.0 }
 0x11e   :  { %v1545_v42 = vpop.eup %1184  ;;  %v523_v43 = vadd.f32 %v522_v40, %v521_v9  ;;  %v835_v3 = vsel %vm492_vm2, %v803_v48, 0.0  ;;  %v543_v44 = vrot.slane %v542_v59, 4  ;;  %v842_v11 = vsel %vm492_vm2, %v804_v29, 0.0 }
 0x11f   :  { %v1549_v4 = vpop.eup %1186  ;;  %v530_v5 = vadd.f32 %v529_v47, %v528_v45  ;;  %v836_v36 = vrot.slane %v835_v3, 4  ;;  %v537_v14 = vadd.f32 %v536_v57, %v535_v51  ;;  %v843_v52 = vrot.slane %v842_v11, 4 }
 0x120   :  { %v1552_v12 = vpop.eup %1188  ;;  %v524_v13 = vrot.slane %v523_v43, 2  ;;  %v849_v7 = vsel %vm492_vm2, %v805_v33, 0.0  ;;  %v544_v20 = vadd.f32 %v543_v44, %v542_v59  ;;  %v856_v27 = vsel %vm492_vm2, %v806_v32, 0.0 }
 0x121   :  { %v1555_v63 = vpop.eup %1190  ;;  %v531_v19 = vrot.slane %v530_v5, 2  ;;  %v837_v21 = vadd.f32 %v836_v36, %v835_v3  ;;  %v850_v23 = vrot.slane %v849_v7, 4  ;;  %v538_v6 = vrot.slane %v537_v14, 2 }
 0x122   :  { %v1557_v25 = vpop.eup %1192  ;;  %v525_v48 = vadd.f32 %v524_v13, %v523_v43  ;;  %v844_v60 = vadd.f32 %v843_v52, %v842_v11  ;;  %v545_v38 = vrot.slane %v544_v20, 2  ;;  %v857_v57 = vrot.slane %v856_v27, 4 }
 0x123   :  { %v1560_v9 = vpop.eup %1194  ;;  %v532_v29 = vadd.f32 %v531_v19, %v530_v5  ;;  %v838_v40 = vrot.slane %v837_v21, 2  ;;  %v851_v45 = vadd.f32 %v850_v23, %v849_v7  ;;  %v539_v47 = vadd.f32 %v538_v6, %v537_v14 }
 0x124   :  { %v526_v33 = vrot.slane %v525_v48, 1  ;;  %v845_v51 = vrot.slane %v844_v60, 2  ;;  %v546_v3 = vadd.f32 %v545_v38, %v544_v20  ;;  %v858_v32 = vadd.f32 %v857_v57, %v856_v27 }
 0x125   :  { %v533_v59 = vrot.slane %v532_v29, 1  ;;  %v839_v44 = vadd.f32 %v838_v40, %v837_v21  ;;  %v852_v36 = vrot.slane %v851_v45, 2  ;;  %v1562_v49 = vpop.eup %1196  ;;  %v540_v11 = vrot.slane %v539_v47, 1 }
 0x126   :  { %v527_v43 = vadd.f32 %v526_v33, %v525_v48  ;;  %v846_v13 = vadd.f32 %v845_v51, %v844_v60  ;;  %v1564_v52 = vpop.eup %1198  ;;  %v547_v19 = vrot.slane %v546_v3, 1  ;;  %v859_v0 = vrot.slane %v858_v32, 2 }
 0x127   :  { %v534_v5 = vadd.f32 %v533_v59, %v532_v29  ;;  %v840_v30 = vrot.slane %v839_v44, 1  ;;  %v853_v7 = vadd.f32 %v852_v36, %v851_v45  ;;  %v541_v23 = vadd.f32 %v540_v11, %v539_v47 }
 0x128   :  { %v1566_v14 = vmul.f32 0.70710677, %v527_v43  ;;  %v847_v6 = vrot.slane %v846_v13, 1  ;;  %v548_v20 = vadd.f32 %v547_v19, %v546_v3  ;;  %v860_v27 = vadd.f32 %v859_v0, %v858_v32 }
 0x129   :  { %v1568_v21 = vmul.f32 0.70710677, %v534_v5  ;;  %v841_v38 = vadd.f32 %v840_v30, %v839_v44  ;;  %v854_v40 = vrot.slane %v853_v7, 1  ;;  %v1570_v48 = vmul.f32 0.70710677, %v541_v23 }
 0x12a   :  { %v848_v60 = vadd.f32 %v847_v6, %v846_v13  ;;  %v429_v29 = vrot.slane %v415_v53, %v1349_v22  ;;  %v1576_v45 = vmul.f32 0.70710677, %v548_v20  ;;  %v430_v51 = vcombine.high %v1535_v34, %v1535_v34 }
 0x12b   :  { %v855_v33 = vadd.f32 %v854_v40, %v853_v7  ;;  %v1578_v47 = vmul.f32 0.70710677, %v841_v38  ;;  %v861_v57 = vrot.slane %v860_v27, 1  ;;  %v561_v0 = vmul.f32 %v1535_v34, %v1357_v39 }
 0x12c   :  { %v1582_v30 = vmul.f32 0.70710677, %v848_v60  ;;  %v431_v59 = vcombine.high %v429_v29, %v429_v29  ;;  %v562_v16 = vmul.f32 %v430_v51, %v1380_v55  ;;  %v563_v53 = vmul.f32 %v429_v29, %v1376_v54 }
 0x12d   :  { %v1586_v3 = vmul.f32 0.70710677, %v855_v33  ;;  %v875_v44 = vmul.f32 %v1535_v34, %v1371_v50  ;;  %v862_v36 = vadd.f32 %v861_v57, %v860_v27  ;;  %v593_v11 = vsel %vm492_vm2, %v561_v0, 0.0 }
 0x12e   :  { %v564_v43 = vmul.f32 %v431_v59, %v1511_v1  ;;  %v876_v13 = vmul.f32 %v430_v51, %v1503_v15  ;;  %v594_v32 = vrot.slane %v593_v11, 4  ;;  %v600_v5 = vsel %vm492_vm2, %v562_v16, 0.0 }
 0x12f   :  { %v607_v39 = vsel %vm492_vm2, %v563_v53, 0.0  ;;  %v877_v19 = vmul.f32 %v429_v29, %v1390_v61  ;;  %v1598_v55 = vmul.f32 0.70710677, %v862_v36  ;;  %v601_v54 = vrot.slane %v600_v5, 4 }
 0x130   :  { %v608_v7 = vrot.slane %v607_v39, 4  ;;  %v614_v50 = vsel %vm492_vm2, %v564_v43, 0.0  ;;  %v595_v34 = vadd.f32 %v594_v32, %v593_v11  ;;  %v878_v1 = vmul.f32 %v431_v59, %v1515_v17 }
 0x131   :  { %v615_v23 = vrot.slane %v614_v50, 4  ;;  %v907_v6 = vsel %vm492_vm2, %v875_v44, 0.0  ;;  %v602_v15 = vadd.f32 %v601_v54, %v600_v5  ;;  %v914_v40 = vsel %vm492_vm2, %v876_v13, 0.0 }
 0x132   :  { %v609_v20 = vadd.f32 %v608_v7, %v607_v39  ;;  %v908_v38 = vrot.slane %v907_v6, 4  ;;  %v596_v60 = vrot.slane %v595_v34, 2  ;;  %v915_v61 = vrot.slane %v914_v40, 4 }
 0x133   :  { %v616_v27 = vadd.f32 %v615_v23, %v614_v50  ;;  %v921_v29 = vsel %vm492_vm2, %v877_v19, 0.0  ;;  %v603_v33 = vrot.slane %v602_v15, 2  ;;  %v928_v17 = vsel %vm492_vm2, %v878_v1, 0.0 }
 0x134   :  { %v610_v51 = vrot.slane %v609_v20, 2  ;;  %v909_v57 = vadd.f32 %v908_v38, %v907_v6  ;;  %v922_v0 = vrot.slane %v921_v29, 4  ;;  %v597_v16 = vadd.f32 %v596_v60, %v595_v34 }
 0x135   :  { %v617_v53 = vrot.slane %v616_v27, 2  ;;  %v916_v36 = vadd.f32 %v915_v61, %v914_v40  ;;  %v604_v59 = vadd.f32 %v603_v33, %v602_v15  ;;  %v929_v39 = vrot.slane %v928_v17, 4 }
 0x136   :  { %v611_v44 = vadd.f32 %v610_v51, %v609_v20  ;;  %v910_v43 = vrot.slane %v909_v57, 2  ;;  %v923_v11 = vadd.f32 %v922_v0, %v921_v29  ;;  %v598_v32 = vrot.slane %v597_v16, 1 }
 0x137   :  { %v618_v13 = vadd.f32 %v617_v53, %v616_v27  ;;  %v917_v5 = vrot.slane %v916_v36, 2  ;;  %v605_v54 = vrot.slane %v604_v59, 1  ;;  %v930_v34 = vadd.f32 %v929_v39, %v928_v17 }
 0x138   :  { %v612_v7 = vrot.slane %v611_v44, 1  ;;  %v911_v19 = vadd.f32 %v910_v43, %v909_v57  ;;  %v924_v50 = vrot.slane %v923_v11, 2  ;;  %v599_v23 = vadd.f32 %v598_v32, %v597_v16 }
 0x139   :  { %v619_v6 = vrot.slane %v618_v13, 1  ;;  %v918_v38 = vadd.f32 %v917_v5, %v916_v36  ;;  %v606_v60 = vadd.f32 %v605_v54, %v604_v59  ;;  %v931_v29 = vrot.slane %v930_v34, 2 }
 0x13a   :  { %v613_v40 = vadd.f32 %v612_v7, %v611_v44  ;;  %v912_v61 = vrot.slane %v911_v19, 1  ;;  %v925_v1 = vadd.f32 %v924_v50, %v923_v11  ;;  %v625_v20 = vmul.f32 0.70710677, %v599_v23 }
 0x13b   :  { %v620_v15 = vadd.f32 %v619_v6, %v618_v13  ;;  %v919_v33 = vrot.slane %v918_v38, 1  ;;  %1200 = vpow2.f32 %v1519_v58  ;;  %v626_v27 = vmul.f32 0.70710677, %v606_v60 }
 0x13c   :  { %v627_v51 = vmul.f32 0.70710677, %v613_v40  ;;  %v926_v0 = vrot.slane %v925_v1, 1  ;;  %v633_v57 = vmax.f32 %v1566_v14, %v625_v20  ;;  %v913_v16 = vadd.f32 %v912_v61, %v911_v19 }
 0x13d   :  { %v628_v53 = vmul.f32 0.70710677, %v620_v15  ;;  %v932_v43 = vadd.f32 %v931_v29, %v930_v34  ;;  %v634_v36 = vmax.f32 %v1568_v21, %v626_v27  ;;  %v920_v59 = vadd.f32 %v919_v33, %v918_v38 }
 0x13e   :  { %v635_v17 = vmax.f32 %v1570_v48, %v627_v51  ;;  %v927_v44 = vadd.f32 %v926_v0, %v925_v1  ;;  %v641_v32 = vsub.f32 %v1566_v14, %v633_v57  ;;  %v665_v58 = vsub.f32 %v625_v20, %v633_v57 }
 0x13f   :  { %v1611_v11 = vmax.f32 %v1576_v45, %v628_v53  ;;  %v933_v13 = vrot.slane %v932_v43, 1  ;;  %v642_v5 = vsub.f32 %v1568_v21, %v634_v36  ;;  %v666_v54 = vsub.f32 %v626_v27, %v634_v36 }
 0x140   :  { %v643_v39 = vsub.f32 %v1570_v48, %v635_v17  ;;  %v667_v7 = vsub.f32 %v627_v51, %v635_v17  ;;  %v653_v50 = vmul.f32 1.442695, %v641_v32  ;;  %v939_v6 = vmul.f32 0.70710677, %v913_v16 }
 0x141   :  { %v644_v19 = vsub.f32 %v1576_v45, %v1611_v11  ;;  %v668_v23 = vsub.f32 %v628_v53, %v1611_v11  ;;  %v655_v38 = vmul.f32 1.442695, %v642_v5  ;;  %v677_v60 = vmul.f32 1.442695, %v665_v58 }
 0x142   :  { %v657_v34 = vmul.f32 1.442695, %v643_v39  ;;  %v934_v40 = vadd.f32 %v933_v13, %v932_v43  ;;  %v989_v14 = vmul.f32 1.442695, %v978_v8  ;;  %1202 = vpow2.f32 %v653_v50 }
 0x143   :  { %v679_v21 = vmul.f32 1.442695, %v666_v54  ;;  %v681_v48 = vmul.f32 1.442695, %v667_v7  ;;  %1204 = vpow2.f32 %v655_v38  ;;  %v940_v61 = vmul.f32 0.70710677, %v920_v59 }
 0x144   :  { %v941_v1 = vmul.f32 0.70710677, %v927_v44  ;;  %v942_v15 = vmul.f32 0.70710677, %v934_v40  ;;  %1206 = vpow2.f32 %v657_v34  ;;  %v683_v20 = vmul.f32 1.442695, %v668_v23  ;;  %v59_v40 = vpop.permute.xlu0 %58 }
 0x145   :  { %v947_v33 = vmax.f32 %v1578_v47, %v939_v6  ;;  %v685_v29 = vadd.f32 %v1541_v46, %v1522_v26  ;;  %v1625_v27 = vpop.eup %1200  ;;  %1208 = vpow2.f32 %v677_v60  ;;  %v948_v62 = vmax.f32 %v1582_v30, %v940_v61 }
 0x146   :  { %v949_v8 = vmax.f32 %v1586_v3, %v941_v1  ;;  %v1630_v51 = vmax.f32 %v1598_v55, %v942_v15  ;;  %1210 = vpow2.f32 %v679_v21  ;;  %v687_v54 = vadd.f32 %v1549_v4, %v1537_v35 }
 0x147   :  { %v955_v0 = vsub.f32 %v1578_v47, %v947_v33  ;;  %v979_v53 = vsub.f32 %v939_v6, %v947_v33  ;;  %1212 = vpow2.f32 %v681_v48  ;;  %v956_v57 = vsub.f32 %v1582_v30, %v948_v62 }
 0x148   :  { %v957_v16 = vsub.f32 %v1586_v3, %v949_v8  ;;  %v958_v43 = vsub.f32 %v1598_v55, %v1630_v51  ;;  %1214 = vpow2.f32 %v989_v14  ;;  %v980_v17 = vsub.f32 %v940_v61, %v948_v62 }
 0x149   :  { %v967_v36 = vmul.f32 1.442695, %v955_v0  ;;  %v981_v59 = vsub.f32 %v941_v1, %v949_v8  ;;  %1216 = vpow2.f32 %v683_v20  ;;  %v969_v44 = vmul.f32 1.442695, %v956_v57  ;;  %v64_v20 = vpop.permute.xlu1 %63 }
 0x14a   :  { %v971_v32 = vmul.f32 1.442695, %v957_v16  ;;  %v982_v58 = vsub.f32 %v942_v15, %v1630_v51  ;;  %v991_v47 = vmul.f32 1.442695, %v979_v53  ;;  %v993_v13 = vmul.f32 1.442695, %v980_v17 }
 0x14b   :  { %1218 = vpow2.f32 %v967_v36  ;;  %v995_v5 = vmul.f32 1.442695, %v981_v59  ;;  %v686_v3 = vadd.f32 %v1545_v42, %v1528_v28  ;;  %v999_v7 = vadd.f32 %v1562_v49, %v1555_v63 }
 0x14c   :  { %1220 = vpow2.f32 %v969_v44  ;;  %v997_v30 = vmul.f32 1.442695, %v982_v58  ;;  %v1638_v39 = vpop.eup %1202  ;;  %v1000_v23 = vadd.f32 %v1564_v52, %v1557_v25  ;;  %v1001_v38 = vadd.f32 %v1625_v27, %v1560_v9 }
 0x14d   :  { %1222 = vpow2.f32 %v971_v32  ;;  %v1646_v50 = vpop.eup %1204  ;;  %v1844_v14 = vmov 0.0   ;;  %v148_v48 = vadd.f32 %v1409_v18, %v59_v40  ;;  %v346_v33 = vadd.f32 %v1415_v24, %v59_v40 }
 0x14e   :  { %1224 = vpow2.f32 %v991_v47  ;;  %v1650_v6 = vpop.eup %1206  ;;  %20 = vst.msk [vmem:[%s1841_s3] sm:$0xff] %vm19_vm3, %v1844_v14  ;;  %21 = vst.msk [vmem:[%s1841_s3 + $0x8] sm:$0xff] %vm19_vm3, %v1844_v14  ;;  %v151_v8 = vadd.f32 %v1417_v31, %v64_v20  ;;  %v349_v0 = vadd.f32 %v1423_v37, %v64_v20  ;;  %v1845_v57 = vsub.f32 %v1435_v56, %v1473_v41 }
 0x14f   :  { %1226 = vpow2.f32 %v993_v13  ;;  %v1654_v34 = vpop.eup %1208  ;;  %v1846_v24 = vsub.f32 %v1446_v2, %v1493_v10  ;;  %v244_v31 = vcombine.high %v148_v48, %v148_v48  ;;  %v1699_v59 = vmul.f32 1.442695, %v644_v19 }
 0x150   :  { %1228 = vpow2.f32 %v995_v5  ;;  %v1656_v60 = vpop.eup %1210  ;;  %v689_v61 = vadd.f32 %v1654_v34, %v1638_v39  ;;  %v651_v16 = vmul.f32 1.442695, %v1845_v57  ;;  %v251_v37 = vrot.slane %v148_v48, %v1349_v22 }
 0x151   :  { %1230 = vpow2.f32 %v997_v30  ;;  %v1666_v21 = vpop.eup %1212  ;;  %v690_v1 = vadd.f32 %v1656_v60, %v1646_v50  ;;  %v1692_v36 = vmul.f32 1.442695, %v1846_v24  ;;  %v442_v44 = vcombine.high %v346_v33, %v346_v33 }
 0x152   :  { %1232 = vrcp.f32 %v685_v29  ;;  %v1673_v15 = vpop.eup %1214  ;;  %v691_v18 = vadd.f32 %v1666_v21, %v1650_v6  ;;  %v449_v41 = vrot.slane %v346_v33, %v1349_v22  ;;  %v261_v2 = vcombine.high %v151_v8, %v151_v8 }
 0x153   :  { %1234 = vrcp.f32 %v686_v3  ;;  %v1676_v62 = vpop.eup %1216  ;;  %v1706_v10 = vrot.slane %v151_v8, %v1349_v22  ;;  %v1713_v45 = vmul.f32 1.442695, %v958_v43  ;;  %v459_v19 = vcombine.high %v349_v0, %v349_v0 }
 0x154   :  { %1236 = vrcp.f32 %v687_v54  ;;  %v1720_v47 = vrot.slane %v244_v31, %v1349_v22  ;;  %v1725_v5 = vrot.slane %v349_v0, %v1349_v22  ;;  %v259_v51 = vcombine.high %v251_v37, %v251_v37 }
 0x155   :  { %v1681_v29 = vpop.eup %1218  ;;  %1238 = vrcp.f32 %v999_v7  ;;  %v1730_v43 = vrot.slane %v442_v44, %v1349_v22  ;;  %v457_v54 = vcombine.high %v449_v41, %v449_v41  ;;  %v1735_v7 = vrot.slane %v261_v2, %v1349_v22 }
 0x156   :  { %v1684_v53 = vpop.eup %1220  ;;  %1240 = vrcp.f32 %v1000_v23  ;;  %v276_v23 = vcombine.high %v1706_v10, %v1706_v10  ;;  %v1742_v48 = vrot.slane %v459_v19, %v1349_v22  ;;  %v474_v33 = vcombine.high %v1725_v5, %v1725_v5 }
 0x157   :  { %v1694_v17 = vpop.eup %1222  ;;  %1242 = vrcp.f32 %v1001_v38 }
 0x158   :  { %v1702_v56 = vpop.eup %1224  ;;  %1244 = vrcp.f32 %v689_v61 }
 0x159   :  { %v1708_v32 = vpop.eup %1226  ;;  %1246 = vrcp.f32 %v690_v1  ;;  %v1003_v11 = vadd.f32 %v1702_v56, %v1681_v29 }
 0x15a   :  { %v1717_v58 = vpop.eup %1228  ;;  %1248 = vrcp.f32 %v691_v18  ;;  %v1004_v13 = vadd.f32 %v1708_v32, %v1684_v53 }
 0x15b   :  { %v1727_v55 = vpop.eup %1230  ;;  %v1005_v30 = vadd.f32 %v1717_v58, %v1694_v17  ;;  %1250 = vrcp.f32 %v1003_v11 }
 0x15c   :  { %v1233_v3 = vpop.eup %1232  ;;  %1252 = vrcp.f32 %v1004_v13 }
 0x15d   :  { %v1235_v38 = vpop.eup %1234  ;;  %v701_v40 = vmul.f32 %v1233_v3, %v1522_v26  ;;  %v717_v14 = vmul.f32 %v1233_v3, %v1541_v46  ;;  %1254 = vrcp.f32 %v1005_v30 }
 0x15e   :  { %v1237_v61 = vpop.eup %1236  ;;  %v702_v1 = vmul.f32 %v1235_v38, %v1528_v28  ;;  %v718_v20 = vmul.f32 %v1235_v38, %v1545_v42  ;;  %1256 = vpow2.f32 %v651_v16 }
 0x15f   :  { %v1239_v8 = vpop.eup %1238  ;;  %v703_v18 = vmul.f32 %v1237_v61, %v1537_v35  ;;  %v709_v0 = vmul.f32 %v701_v40, %v251_v37  ;;  %v719_v26 = vmul.f32 %v1237_v61, %v1549_v4  ;;  %v725_v46 = vmul.f32 %v717_v14, %v449_v41 }
 0x160   :  { %v1241_v57 = vpop.eup %1240  ;;  %v710_v24 = vmul.f32 %v702_v1, %v259_v51  ;;  %v1015_v31 = vmul.f32 %v1239_v8, %v1555_v63  ;;  %v726_v44 = vmul.f32 %v718_v20, %v457_v54  ;;  %v1031_v28 = vmul.f32 %v1239_v8, %v1562_v49 }
 0x161   :  { %v1243_v2 = vpop.eup %1242  ;;  %v711_v42 = vmul.f32 %v703_v18, %v1720_v47  ;;  %v1016_v11 = vmul.f32 %v1241_v57, %v1557_v25  ;;  %v727_v16 = vmul.f32 %v719_v26, %v1730_v43  ;;  %v1032_v35 = vmul.f32 %v1241_v57, %v1564_v52 }
 0x162   :  { %v1245_v19 = vpop.eup %1244  ;;  %v1017_v4 = vmul.f32 %v1243_v2, %v1560_v9  ;;  %v1023_v13 = vmul.f32 %v1015_v31, %v251_v37  ;;  %v1033_v30 = vmul.f32 %v1243_v2, %v1625_v27  ;;  %v1039_v3 = vmul.f32 %v1031_v28, %v449_v41 }
 0x163   :  { %v1247_v63 = vpop.eup %1246  ;;  %v1024_v38 = vmul.f32 %v1016_v11, %v259_v51  ;;  %v1040_v40 = vmul.f32 %v1032_v35, %v457_v54  ;;  %v705_v49 = vmul.f32 %v1245_v19, %v1638_v39  ;;  %v721_v14 = vmul.f32 %v1245_v19, %v1654_v34 }
 0x164   :  { %v1249_v61 = vpop.eup %1248  ;;  %v1025_v25 = vmul.f32 %v1017_v4, %v1720_v47  ;;  %v1041_v1 = vmul.f32 %v1033_v30, %v1730_v43  ;;  %v706_v52 = vmul.f32 %v1247_v63, %v1646_v50  ;;  %v722_v9 = vmul.f32 %v1247_v63, %v1656_v60 }
 0x165   :  { %v1251_v37 = vpop.eup %1250  ;;  %v707_v27 = vmul.f32 %v1249_v61, %v1650_v6  ;;  %v713_v41 = vmul.f32 %v705_v49, %v1706_v10  ;;  %v723_v51 = vmul.f32 %v1249_v61, %v1666_v21  ;;  %v729_v39 = vmul.f32 %v721_v14, %v1725_v5 }
 0x166   :  { %v1253_v54 = vpop.eup %1252  ;;  %v714_v34 = vmul.f32 %v706_v52, %v276_v23  ;;  %v1019_v20 = vmul.f32 %v1251_v37, %v1681_v29  ;;  %v730_v8 = vmul.f32 %v722_v9, %v474_v33  ;;  %v1035_v18 = vmul.f32 %v1251_v37, %v1702_v56 }
 0x167   :  { %v1255_v26 = vpop.eup %1254  ;;  %v715_v50 = vmul.f32 %v707_v27, %v1735_v7  ;;  %v1020_v60 = vmul.f32 %v1253_v54, %v1684_v53  ;;  %v731_v6 = vmul.f32 %v723_v51, %v1742_v48  ;;  %v1036_v57 = vmul.f32 %v1253_v54, %v1708_v32 }
 0x168   :  { %v1257_v31 = vpop.eup %1256  ;;  %v1021_v21 = vmul.f32 %v1255_v26, %v1694_v17  ;;  %v1027_v28 = vmul.f32 %v1019_v20, %v1706_v10  ;;  %v1037_v2 = vmul.f32 %v1255_v26, %v1717_v58  ;;  %v1043_v29 = vmul.f32 %v1035_v18, %v1725_v5 }
 0x169   :  { %v1028_v11 = vmul.f32 %v1020_v60, %v276_v23  ;;  %v1044_v56 = vmul.f32 %v1036_v57, %v474_v33  ;;  %v688_v35 = vadd.f32 %v1257_v31, %v1552_v12  ;;  %v733_v19 = vadd.f32 %v725_v46, %v709_v0 }
 0x16a   :  { %v1029_v53 = vmul.f32 %v1021_v21, %v1735_v7  ;;  %v1045_v4 = vmul.f32 %v1037_v2, %v1742_v48  ;;  %v734_v30 = vadd.f32 %v726_v44, %v710_v24  ;;  %v735_v32 = vadd.f32 %v727_v16, %v711_v42 }
 0x16b   :  { %1258 = vrcp.f32 %v688_v35  ;;  %v1781_v63 = vadd.f32 %v729_v39, %v713_v41  ;;  %v738_v17 = vadd.f32 %v730_v8, %v714_v34  ;;  %v739_v10 = vadd.f32 %v731_v6, %v715_v50 }
 0x16c   :  { %v749_v49 = vcombine.low %v733_v19, %v734_v30  ;;  %1260 = vpow2.f32 %v1699_v59  ;;  %v1047_v58 = vadd.f32 %v1039_v3, %v1023_v13  ;;  %v1048_v5 = vadd.f32 %v1040_v40, %v1024_v38 }
 0x16d   :  { %v766_v23 = vcombine.low %v1781_v63, %v738_v17  ;;  %1262 = vpow2.f32 %v1692_v36  ;;  %v1049_v33 = vadd.f32 %v1041_v1, %v1025_v25  ;;  %v1051_v0 = vadd.f32 %v1043_v29, %v1027_v28 }
 0x16e   :  { %v1063_v46 = vcombine.low %v1047_v58, %v1048_v5  ;;  %1264 = vpow2.f32 %v1713_v45  ;;  %v1052_v24 = vadd.f32 %v1044_v56, %v1028_v11  ;;  %v1053_v44 = vadd.f32 %v1045_v4, %v1029_v53  ;;  %v792_v58 = vld [vmem:[%s1841_s3] sm:$0xff] }
 0x16f   :  { %v260_v61 = vcombine.high %v1720_v47, %v1720_v47  ;;  %v458_v59 = vcombine.high %v1730_v43, %v1730_v43  ;;  %v757_v43 = vrot.slane %v749_v49, %v1349_v22  ;;  %v277_v39 = vcombine.high %v1735_v7, %v1735_v7 }
 0x170   :  { %v1080_v42 = vcombine.low %v1051_v0, %v1052_v24  ;;  %v475_v54 = vcombine.high %v1742_v48, %v1742_v48 }
 0x175   :  { %v1259_v16 = vpop.eup %1258 }
 0x176   :  { %v1261_v14 = vpop.eup %1260  ;;  %v704_v13 = vmul.f32 %v1259_v16, %v1257_v31  ;;  %v720_v3 = vmul.f32 %v1259_v16, %v1552_v12 }
 0x177   :  { %v1263_v36 = vpop.eup %1262  ;;  %v692_v38 = vadd.f32 %v1261_v14, %v1676_v62 }
 0x178   :  { %v1265_v40 = vpop.eup %1264  ;;  %v712_v25 = vmul.f32 %v704_v13, %v260_v61  ;;  %v728_v45 = vmul.f32 %v720_v3, %v458_v59  ;;  %v1002_v1 = vadd.f32 %v1263_v36, %v1673_v15 }
 0x179   :  { %1266 = vrcp.f32 %v692_v38  ;;  %v1006_v52 = vadd.f32 %v1265_v40, %v1727_v55 }
 0x17a   :  { %v736_v9 = vadd.f32 %v728_v45, %v712_v25  ;;  %1268 = vrcp.f32 %v1002_v1 }
 0x17b   :  { %1270 = vrcp.f32 %v1006_v52 }
 0x17c   :  { %v750_v47 = vcombine.low %v735_v32, %v736_v9 }
 0x17e   :  { %v764_v37 = vrot.slane %v750_v47, %v1349_v22 }
 0x180   :  { %v765_v12 = vcombine.low %v757_v43, %v764_v37 }
 0x182   :  { %v786_v27 = vsel %vm785_vm4, %v765_v12, 0.0 }
 0x183   :  { %v1267_v41 = vpop.eup %1266  ;;  %787 = vadd.xlane.f32.xlu0 %v786_v27 }
 0x184   :  { %v1269_v51 = vpop.eup %1268  ;;  %v708_v34 = vmul.f32 %v1267_v41, %v1261_v14  ;;  %v724_v20 = vmul.f32 %v1267_v41, %v1676_v62  ;;  %v774_v62 = vrot.slane %v766_v23, %v1349_v22 }
 0x185   :  { %v1271_v8 = vpop.eup %1270  ;;  %v1018_v18 = vmul.f32 %v1269_v51, %v1263_v36  ;;  %v1034_v26 = vmul.f32 %v1269_v51, %v1673_v15  ;;  %v1071_v15 = vrot.slane %v1063_v46, %v1349_v22 }
 0x186   :  { %v716_v50 = vmul.f32 %v708_v34, %v277_v39  ;;  %v732_v60 = vmul.f32 %v724_v20, %v475_v54  ;;  %v1022_v6 = vmul.f32 %v1271_v8, %v1265_v40  ;;  %v1038_v57 = vmul.f32 %v1271_v8, %v1727_v55 }
 0x187   :  { %v1026_v31 = vmul.f32 %v1018_v18, %v260_v61  ;;  %v1042_v21 = vmul.f32 %v1034_v26, %v458_v59  ;;  %v1088_v55 = vrot.slane %v1080_v42, %v1349_v22 }
 0x188   :  { %v740_v28 = vadd.f32 %v732_v60, %v716_v50  ;;  %v1030_v2 = vmul.f32 %v1022_v6, %v277_v39  ;;  %v1046_v7 = vmul.f32 %v1038_v57, %v475_v54 }
 0x189   :  { %v1050_v29 = vadd.f32 %v1042_v21, %v1026_v31 }
 0x18a   :  { %v767_v11 = vcombine.low %v739_v10, %v740_v28  ;;  %v1054_v48 = vadd.f32 %v1046_v7, %v1030_v2 }
 0x18b   :  { %v1064_v56 = vcombine.low %v1049_v33, %v1050_v29 }
 0x18c   :  { %v781_v35 = vrot.slane %v767_v11, %v1349_v22  ;;  %v1081_v19 = vcombine.low %v1053_v44, %v1054_v48 }
 0x18d   :  { %v1078_v53 = vrot.slane %v1064_v56, %v1349_v22 }
 0x18e   :  { %v782_v4 = vcombine.low %v774_v62, %v781_v35  ;;  %v1095_v30 = vrot.slane %v1081_v19, %v1349_v22  ;;  %v793_v22 = vld [vmem:[%s1841_s3 + $0x8] sm:$0xff] }
 0x18f   :  { %v1079_v32 = vcombine.low %v1071_v15, %v1078_v53 }
 0x190   :  { %v789_v63 = vsel %vm785_vm4, %v782_v4, 0.0  ;;  %v1096_v17 = vcombine.low %v1088_v55, %v1095_v30 }
 0x191   :  { %790 = vadd.xlane.f32.xlu1 %v789_v63  ;;  %v1099_v10 = vsel %vm785_vm4, %v1079_v32, 0.0 }
 0x192   :  { %1100 = vadd.xlane.f32.xlu0 %v1099_v10  ;;  %v1102_v49 = vsel %vm785_vm4, %v1096_v17, 0.0 }
 0x196   :  { %1103 = vadd.xlane.f32.xlu0 %v1102_v49 }
 0x210   :  { %v788_v5 = vpop.xlane.xlu0 %787 }
 0x211   :  { %v794_v23 = vadd.f32 %v792_v58, %v788_v5 }
 0x213   :  { %797 = vst.msk [vmem:[%s1841_s3] sm:$0xff] %vm796_vm5, %v794_v23 }
 0x21a   :  { %v1105_v33 = vld [vmem:[%s1841_s3] sm:$0xff] }
 0x21e   :  { %v791_v0 = vpop.xlane.xlu1 %790 }
 0x21f   :  { %v795_v46 = vadd.f32 %v793_v22, %v791_v0  ;;  %v1101_v24 = vpop.xlane.xlu0 %1100 }
 0x220   :  { %v1107_v44 = vadd.f32 %v1105_v33, %v1101_v24 }
 0x221   :  { %798 = vst.msk [vmem:[%s1841_s3 + $0x8] sm:$0xff] %vm796_vm5, %v795_v46 }
 0x222   :  { %1110 = vst.msk [vmem:[%s1841_s3] sm:$0xff] %vm1109_vm6, %v1107_v44 }
 0x223   :  { %v1104_v42 = vpop.xlane.xlu0 %1103 }
 0x228   :  { %v1106_v16 = vld [vmem:[%s1841_s3 + $0x8] sm:$0xff] }
 0x229   :  { %v1108_v14 = vadd.f32 %v1106_v16, %v1104_v42 }
 0x22b   :  { %1111 = vst.msk [vmem:[%s1841_s3 + $0x8] sm:$0xff] %vm1109_vm6, %v1108_v14 }

// kernel: gated_expert_forward.3
= control target key start
LH: loop header
LB: loop body
LE: loop exit
PB: predicated region body
PF: predicated region fallthrough
CT: control target
= control target key end

     0   :  { %s1399_s12 = smov 0   ;;  %s1806_s0 = inlined_call_operand.vmem [shape: bf16[2,10,10,64], index: 0, kind: input, shape index: {}]   ;;  %s1807_s1 = inlined_call_operand.vmem [shape: bf16[9,16,64], index: 1, kind: input, shape index: {}]   ;;  %s1808_s2 = inlined_call_operand.vmem [shape: f32[16,1], index: 2, kind: input, shape index: {}]   ;;  %s1809_s3 = inlined_call_operand.vmem [shape: bf16[2,16,64], index: 3, kind: output, shape index: {}]  }
   0x1 LB: > { %s1098_s13 = sadd.s32 4294967295, %s1374_s12   ;;  %p1102_p0 = scmp.ge.s32.totalorder %s1374_s12, 1  ;;  %s1374_s12 = sphi %s1399_s12, %s13_s12  }
   0x2   : > { %p137_p1 = scmp.lt.s32.totalorder %s1374_s12, 3 }
   0x4   : > { %p138_p2 = pnand %p1102_p0, %p137_p1 }
   0x5   : > { %p161_p3 = scmp.lt.s32.totalorder (!%p138_p2), %s1098_s13, 1  ;;  %v1376_v0 = vmov (!%p138_p2), 0.0   ;;  %vm1377_vm0 = vmmov (!%p138_p2), 0   ;;  %vm194_vm1 = vsmask.f32 (!%p138_p2), 3328  ;;  %vm329_vm3 = vcmask (!%p138_p2), 523264  }
   0x6   : > { %141 = sbr.rel (%p138_p2) target bundleno = 411 (0x19b), region = 32  ;;  %1229 = vmatprep.subr.bf16.mxu0 (!%p138_p2), %v1376_v0  ;;  %1241 = vmatprep.subr.bf16.mxu1 (!%p138_p2), %v1376_v0  ;;  %vm195_vm2 = vsmask.f32 (!%p138_p2), 7440  ;;  %vm475_vm5 = vcmask (!%p138_p2), 1042432   ;;  %vm476_vm6 = vcmask (!%p138_p2), 1046532   ;;  %vm1040_vm8 = vcmask (!%p138_p2), 519168  }
   0x7   : > { %1237 = vmatprep.mubr.msk.bf16.mxu0 (!%p138_p2), %vm1377_vm0, %v1376_v0  ;;  %1249 = vmatprep.mubr.msk.bf16.mxu1 (!%p138_p2), %vm1377_vm0, %v1376_v0  ;;  %vm1458_vm4 = vmor (!%p138_p2), %vm194_vm1, %vm195_vm2 }
   0x8   : > { %vm1571_vm7 = vmor (!%p138_p2), %vm475_vm5, %vm476_vm6 }
   0xd   : > { %s1815_s13 = smov (!%p161_p3, %s1098_s13), 1 }
   0xe   : > { %s1337_s14 = smul.u32 80, %s1815_s13  ;;  %s1181_s15 = sshll.u32 %s1815_s13, 3 }
   0xf   : > { %s170_s18 = scalar_lea.vmem %s1809_s3, %s1181_s15 }
  0x10   : > { %s1419_s17 = scalar_lea.vmem %s1806_s0, %s1337_s14 }
  0x11   : > { %v1422_v1 = vld [vmem:[%s1419_s17] sm:$0xf]  ;;  %v1425_v2 = vld [vmem:[%s1419_s17 + $0x4] sm:$0x1]  ;;  %v1428_v3 = vld [vmem:[%s1419_s17 + $0x8] sm:$0xf] }
  0x12   : > { %v1431_v4 = vld [vmem:[%s1419_s17 + $0xc] sm:$0x1]  ;;  %v1434_v5 = vld [vmem:[%s1419_s17 + $0x10] sm:$0xf]  ;;  %v1115_v6 = vcombine.low %v1422_v1, %v1428_v3  ;;  %v198_v7 = vshrl.u32 %v1422_v1, 16  ;;  %v201_v8 = vshll.u32 %v1422_v1, 16 }
  0x13   : > { %v207_v9 = vshll.u32 %v1425_v2, 16  ;;  %v212_v10 = vshrl.u32 %v1428_v3, 16  ;;  %v1443_v11 = vld [vmem:[%s1419_s17 + $0x14] sm:$0x1]  ;;  %v215_v12 = vshll.u32 %v1428_v3, 16  ;;  %v221_v13 = vshll.u32 %v1431_v4, 16 }
  0x14   : > { %v226_v14 = vshrl.u32 %v1434_v5, 16  ;;  %v229_v15 = vshll.u32 %v1434_v5, 16  ;;  %v200_v16 = vrot.slane %v198_v7, 4  ;;  %v203_v17 = vrot.slane %v201_v8, 5  ;;  %v1450_v19 = vld [vmem:[%s1419_s17 + $0x18] sm:$0xf] }
  0x15   : > { %v214_v18 = vrot.slane %v212_v10, 4  ;;  %v217_v20 = vrot.slane %v215_v12, 5  ;;  %v1453_v23 = vld [vmem:[%s1419_s17 + $0x1c] sm:$0x1]  ;;  %v209_v25 = vrot.slane %v207_v9, 5  ;;  %v223_v26 = vrot.slane %v221_v13, 5 }
  0x16   : > { %v228_v21 = vrot.slane %v226_v14, 4  ;;  %v231_v22 = vrot.slane %v229_v15, 5  ;;  %v204_v24 = vor.u32 %v203_v17, %v200_v16  ;;  %v235_v27 = vshll.u32 %v1443_v11, 16  ;;  %v1465_v33 = vld [vmem:[%s1419_s17 + $0x20] sm:$0xf] }
  0x17   : > { %v218_v29 = vor.u32 %v217_v20, %v214_v18  ;;  %v415_v31 = vsel %vm329_vm3, %v1115_v6, 0  ;;  %v240_v32 = vshrl.u32 %v1450_v19, 16  ;;  %v243_v35 = vshll.u32 %v1450_v19, 16  ;;  %v1473_v41 = vld [vmem:[%s1419_s17 + $0x24] sm:$0x1] }
  0x18   : > { %v232_v30 = vor.u32 %v231_v22, %v228_v21  ;;  %v205_v34 = vrot.slane %v204_v24, 4  ;;  %1242 = vmatpush3.bf16.xpose.msra.mxu1 %v415_v31  ;;  %v249_v36 = vshll.u32 %v1453_v23, 16  ;;  %v237_v38 = vrot.slane %v235_v27, 5  ;;  %v1478_v45 = vld [vmem:[%s1419_s17 + $0x28] sm:$0xf] }
  0x19   : > { %v219_v37 = vrot.slane %v218_v29, 4  ;;  %1243 = vmatprep.subr.bf16.mxu1 %v1376_v0  ;;  %v242_v39 = vrot.slane %v240_v32, 4  ;;  %v1116_v40 = vcombine.low %v1434_v5, %v1450_v19  ;;  %v245_v44 = vrot.slane %v243_v35, 5  ;;  %v1486_v49 = vld [vmem:[%s1419_s17 + $0x2c] sm:$0x1] }
  0x1a   : > { %v210_v42 = vsel %vm1458_vm4, %v205_v34, %v209_v25  ;;  %v233_v43 = vrot.slane %v232_v30, 4  ;;  %v254_v46 = vshrl.u32 %v1465_v33, 16  ;;  %v251_v48 = vrot.slane %v249_v36, 5  ;;  %v1497_v59 = vld [vmem:[%s1419_s17 + $0x30] sm:$0xf] }
  0x1b   : > { %v1483_v47 = vsel %vm1458_vm4, %v219_v37, %v223_v26  ;;  %v257_v50 = vshll.u32 %v1465_v33, 16  ;;  %v246_v52 = vor.u32 %v245_v44, %v242_v39  ;;  %v1491_v53 = vsel %vm329_vm3, %v1116_v40, 0  ;;  %v1508_v10 = vld [vmem:[%s1419_s17 + $0x34] sm:$0x1]  ;;  %v1511_v12 = vld [vmem:[%s1419_s17 + $0x38] sm:$0xf] }
  0x1c   : > { %v1109_v51 = vcombine.low %v210_v42, %v1483_v47  ;;  %v256_v54 = vrot.slane %v254_v46, 4  ;;  %v263_v56 = vshll.u32 %v1473_v41, 16  ;;  %v268_v57 = vshrl.u32 %v1478_v45, 16  ;;  %v1520_v16 = vld [vmem:[%s1419_s17 + $0x3c] sm:$0x1] }
  0x1d   : > { %v259_v55 = vrot.slane %v257_v50, 5  ;;  %v271_v58 = vshll.u32 %v1478_v45, 16  ;;  %v1501_v60 = vsel %vm1458_vm4, %v233_v43, %v237_v38  ;;  %v247_v62 = vrot.slane %v246_v52, 4 }
  0x1e   : > { %v334_v61 = vsel %vm329_vm3, %v1109_v51, 0  ;;  %v277_v63 = vshll.u32 %v1486_v49, 16  ;;  %v270_v7 = vrot.slane %v268_v57, 4  ;;  %v1117_v9 = vcombine.low %v1465_v33, %v1478_v45 }
  0x1f   : > { %1230 = vmatpush3.bf16.xpose.msra.mxu0 %v334_v61  ;;  %v260_v6 = vor.u32 %v259_v55, %v256_v54  ;;  %v273_v8 = vrot.slane %v271_v58, 5  ;;  %v1516_v13 = vsel %vm1458_vm4, %v247_v62, %v251_v48  ;;  %v265_v14 = vrot.slane %v263_v56, 5 }
  0x20   : > { %1231 = vmatprep.subr.bf16.mxu0 %v1376_v0  ;;  %1244 = vmatpush3.bf16.xpose.msra.mxu1 %v1491_v53  ;;  %v279_v15 = vrot.slane %v277_v63, 5  ;;  %v282_v17 = vshrl.u32 %v1497_v59, 16  ;;  %v1110_v18 = vcombine.low %v1501_v60, %v1516_v13  ;;  %v285_v22 = vshll.u32 %v1497_v59, 16 }
  0x21   : > { %1245 = vmatprep.subr.bf16.mxu1 %v1376_v0  ;;  %v261_v20 = vrot.slane %v260_v6, 4  ;;  %v274_v21 = vor.u32 %v273_v8, %v270_v7  ;;  %v296_v25 = vshrl.u32 %v1511_v12, 16  ;;  %v299_v26 = vshll.u32 %v1511_v12, 16  ;;  %v189_v6 = vld [vmem:[%s1419_s17 + $0x44] sm:$0x1] }
  0x22   : > { %v284_v24 = vrot.slane %v282_v17, 4  ;;  %v1530_v29 = vsel %vm329_vm3, %v1117_v9, 0  ;;  %v287_v30 = vrot.slane %v285_v22, 5  ;;  %v1533_v31 = vsel %vm329_vm3, %v1110_v18, 0  ;;  %v1355_v7 = vld [vmem:[%s1807_s1] sm:$0xff]  }
  0x23   : > { %v275_v27 = vrot.slane %v274_v21, 4  ;;  %v291_v32 = vshll.u32 %v1508_v10, 16  ;;  %v298_v34 = vrot.slane %v296_v25, 4  ;;  %v301_v35 = vrot.slane %v299_v26, 5  ;;  %v1595_v9 = vld [vmem:[%s1419_s17 + $0x40] sm:$0xf] }
  0x24   : > { %v1538_v36 = vsel %vm1458_vm4, %v261_v20, %v265_v14  ;;  %v288_v38 = vor.u32 %v287_v30, %v284_v24  ;;  %v305_v39 = vshll.u32 %v1520_v16, 16  ;;  %v1118_v50 = vcombine.low %v1497_v59, %v1511_v12  ;;  %v1598_v14 = vld [vmem:[%s1419_s17 + $0x48] sm:$0xf]  ;;  %v191_v20 = vld [vmem:[%s1419_s17 + $0x4c] sm:$0x1] }
  0x25   : > { %v1542_v37 = vsel %vm1458_vm4, %v275_v27, %v279_v15  ;;  %v302_v40 = vor.u32 %v301_v35, %v298_v34  ;;  %v293_v43 = vrot.slane %v291_v32, 5  ;;  %v480_v51 = vrot.slane %v1425_v2, 5 }
  0x26   : > { %v1111_v42 = vcombine.low %v1538_v36, %v1542_v37  ;;  %v289_v44 = vrot.slane %v288_v38, 4  ;;  %v307_v48 = vrot.slane %v305_v39, 5  ;;  %v484_v52 = vrot.slane %v1431_v4, 5 }
  0x27   : > { %1232 = vmatpush3.bf16.xpose.msra.mxu0 %v1533_v31  ;;  %v303_v46 = vrot.slane %v302_v40, 4  ;;  %v1120_v55 = vrot.slane %v1422_v1, 9  ;;  %v1568_v2 = vsel %vm329_vm3, %v1118_v50, 0  ;;  %v1121_v4 = vrot.slane %v1428_v3, 9  ;;  %v1354_v50 = vld [vmem:[%s1807_s1 + $0x8] sm:$0xff]  }
  0x28   : > { %1233 = vmatprep.subr.bf16.mxu0 %v1376_v0  ;;  %1246 = vmatpush3.bf16.xpose.msra.mxu1 %v1530_v29  ;;  %v1556_v54 = vsel %vm329_vm3, %v1111_v42, 0  ;;  %v1561_v56 = vsel %vm1458_vm4, %v289_v44, %v293_v43  ;;  %v1139_v63 = vcombine.low %v1428_v3, %v1434_v5  ;;  %v1122_v8 = vrot.slane %v1434_v5, 9 }
  0x29   : > { %1247 = vmatprep.subr.bf16.mxu1 %v1376_v0  ;;  %v1565_v57 = vsel %vm1458_vm4, %v303_v46, %v307_v48  ;;  %v481_v61 = vsel %vm1571_vm7, %v1120_v55, %v480_v51  ;;  %v1584_v62 = vsel %vm1571_vm7, %v1121_v4, %v484_v52  ;;  %v661_v18 = vshrl.u32 %v1595_v9, 16 }
  0x2a   : > { %v1112_v1 = vcombine.low %v1561_v56, %v1565_v57  ;;  %v1131_v17 = vcombine.low %v481_v61, %v1584_v62  ;;  %v664_v3 = vshll.u32 %v1595_v9, 16  ;;  %v606_v21 = vsel %vm329_vm3, %v1139_v63, 0 }
  0x2b   : > { %v488_v22 = vrot.slane %v1443_v11, 5  ;;  %v1123_v5 = vrot.slane %v1450_v19, 9  ;;  %v670_v24 = vshll.u32 %v189_v6, 16  ;;  %v663_v25 = vrot.slane %v661_v18, 4 }
  0x2c   : > { %v1601_v15 = vsel %vm329_vm3, %v1112_v1, 0  ;;  %v666_v26 = vrot.slane %v664_v3, 5  ;;  %v1164_v27 = vcombine.low %v1595_v9, %v1598_v14  ;;  %v882_v30 = vshrl.u32 %v1598_v14, 16 }
  0x2d   : > { %v1152_v32 = vrot.slane %v1595_v9, 9  ;;  %v748_v34 = vrot.slane %v189_v6, 5  ;;  %v885_v35 = vshll.u32 %v1598_v14, 16  ;;  %v891_v11 = vshll.u32 %v191_v20, 16 }
  0x2e   : > { %v492_v38 = vrot.slane %v1453_v23, 5  ;;  %v667_v39 = vor.u32 %v666_v26, %v663_v25  ;;  %v672_v40 = vrot.slane %v670_v24, 5  ;;  %v884_v42 = vrot.slane %v882_v30, 4 }
  0x2f   : > { %1234 = vmatpush3.bf16.xpose.msra.mxu0 %v1556_v54  ;;  %v1140_v43 = vcombine.low %v1450_v19, %v1465_v33  ;;  %v887_v44 = vrot.slane %v885_v35, 5  ;;  %v1171_v46 = vrot.slane %v1598_v14, 9  ;;  %v957_v48 = vrot.slane %v191_v20, 5 }
  0x30   : > { %1235 = vmatprep.subr.bf16.mxu0 %v1376_v0  ;;  %1248 = vmatpush3.bf16.xpose.msra.mxu1 %v1568_v2  ;;  %v668_v23 = vrot.slane %v667_v39, 4  ;;  %v1630_v51 = vsel %vm1571_vm7, %v1152_v32, %v748_v34  ;;  %v893_v55 = vrot.slane %v891_v11, 5  ;;  %v534_v4 = vsel %vm329_vm3, %v1131_v17, 0  ;;  %v1018_v17 = vld [vmem:[%s1808_s2] sm:$0xff] }
  0x31   : > { %1265 = vmatprep.subr.bf16.mxu1 %v1376_v0  ;;  %v888_v52 = vor.u32 %v887_v44, %v884_v42  ;;  %v1634_v19 = vsel %vm1571_vm7, %v1171_v46, %v957_v48  ;;  %v489_v1 = vsel %vm1571_vm7, %v1122_v8, %v488_v22  ;;  %v493_v6 = vsel %vm1571_vm7, %v1123_v5, %v492_v38  ;;  %v1361_v42 = vld [vmem:[%s1807_s1 + $0x18] sm:$0xff]   ;;  %v1360_v46 = vld [vmem:[%s1807_s1 + $0x10] sm:$0xff]  }
  0x32   : > { %v1641_v61 = vsel %vm1458_vm4, %v668_v23, %v672_v40  ;;  %v1175_v63 = vcombine.low %v1630_v51, %v1634_v19  ;;  %v1132_v20 = vcombine.low %v489_v1, %v493_v6  ;;  %v496_v5 = vrot.slane %v1473_v41, 5 }
  0x33   : > { %v1150_v18 = vcombine.low %v1565_v57, %v1641_v61  ;;  %v889_v3 = vrot.slane %v888_v52, 4  ;;  %v1125_v24 = vrot.slane %v1478_v45, 9  ;;  %v500_v28 = vrot.slane %v1486_v49, 5  ;;  %v1365_v57 = vld [vmem:[%s1807_s1 + $0x30] sm:$0xff]  }
  0x34   : > { %v1141_v25 = vcombine.low %v1478_v45, %v1497_v59  ;;  %v1378_v26 = vmov 0   ;;  %v1670_v30 = vsel %vm329_vm3, %v1132_v20, 0  ;;  %v1126_v45 = vrot.slane %v1497_v59, 9 }
  0x35   : > { %v894_v8 = vsel %vm1458_vm4, %v889_v3, %v893_v55  ;;  %1349 = vset.pattern.permute.xlu0 %v1378_v26  ;;  %v501_v41 = vsel %vm1571_vm7, %v1125_v24, %v500_v28  ;;  %v504_v34 = vrot.slane %v1508_v10, 5  ;;  %v1127_v35 = vrot.slane %v1511_v12, 9 }
  0x36   : > { %v1661_v22 = vcombine.low %v1641_v61, %v894_v8  ;;  %1022 = vperm.xlu0 %1349, %v1018_v17   ;;  %v612_v32 = vsel %vm329_vm3, %v1141_v25, 0  ;;  %v508_v11 = vrot.slane %v1520_v16, 5  ;;  %v1142_v38 = vcombine.low %v1511_v12, %v1595_v9  ;;  %v1367_v9 = vld [vmem:[%s1807_s1 + $0x40] sm:$0xff]  }
  0x37   : > { %1236 = vmatpush3.bf16.xpose.msra.mxu0 %v1601_v15  ;;  %1250 = vmatmul.mubr.msk.bf16.vlgmr.msra.gmra.mrb[0].mxu1 %vm329_vm3, %v1355_v7  ;;  %v609_v7 = vsel %vm329_vm3, %v1140_v43, 0  ;;  %v505_v40 = vsel %vm1571_vm7, %v1126_v45, %v504_v34  ;;  %v1156_v12 = vcombine.low %v1584_v62, %v489_v1  ;;  %v1147_v44 = vcombine.low %v1483_v47, %v1501_v60  ;;  %v1363_v1 = vld [vmem:[%s1807_s1 + $0x28] sm:$0xff]  }
  0x38   : > { %1253 = vmatprep.subr.bf16.mxu0 %v1376_v0  ;;  %1266 = vmatpush3.bf16.xpose.msra.mxu1 %v606_v21  ;;  %v1124_v21 = vrot.slane %v1465_v33, 9  ;;  %v509_v59 = vsel %vm1571_vm7, %v1127_v35, %v508_v11  ;;  %v615_v10 = vsel %vm329_vm3, %v1142_v38, 0  ;;  %v1148_v47 = vcombine.low %v1516_v13, %v1538_v36 }
  0x39   : > { %1267 = vmatprep.subr.bf16.mxu1 %v1376_v0  ;;  %1273 = vmatprep.mubr.msk.bf16.mxu1 %vm1377_vm0, %v1376_v0  ;;  %v1134_v16 = vcombine.low %v505_v40, %v509_v59  ;;  %v767_v58 = vsel %vm329_vm3, %v1156_v12, 0  ;;  %v691_v48 = vsel %vm329_vm3, %v1147_v44, 0  ;;  %v1158_v60 = vcombine.low %v501_v41, %v505_v40 }
  0x3a   : > { %v497_v33 = vsel %vm1571_vm7, %v1124_v21, %v496_v5  ;;  %v694_v23 = vsel %vm329_vm3, %v1148_v47, 0  ;;  %v1149_v55 = vcombine.low %v1542_v37, %v1561_v56  ;;  %v700_v37 = vsel %vm329_vm3, %v1150_v18, 0  ;;  %v1362_v56 = vld [vmem:[%s1807_s1 + $0x20] sm:$0xff]  }
  0x3b   : > { %v1133_v49 = vcombine.low %v497_v33, %v501_v41  ;;  %v1702_v43 = vsel %vm329_vm3, %v1134_v16, 0  ;;  %v1157_v62 = vcombine.low %v493_v6, %v497_v33  ;;  %v773_v52 = vsel %vm329_vm3, %v1158_v60, 0 }
  0x3c   : > { %v697_v13 = vsel %vm329_vm3, %v1149_v55, 0 }
  0x3d   : > { %v1687_v39 = vsel %vm329_vm3, %v1133_v49, 0 }
  0x3e   : > { %1238 = vmatmul.mubr.msk.bf16.vlgmr.msra.gmra.mrb[0].mxu0 %vm329_vm3, %v1354_v50  ;;  %v770_v50 = vsel %vm329_vm3, %v1157_v62, 0 }
  0x3f   : > { %1254 = vmatpush3.bf16.xpose.msra.mxu0 %v534_v4  ;;  %1261 = vmatprep.mubr.msk.bf16.mxu0 %vm1377_vm0, %v1376_v0  ;;  %v1159_v4 = vcombine.low %v509_v59, %v1630_v51 }
  0x40   : > { %1255 = vmatprep.subr.bf16.mxu0 %v1376_v0  ;;  %1268 = vmatpush3.bf16.xpose.msra.mxu1 %v609_v7 }
  0x41   : > { %1269 = vmatprep.subr.bf16.mxu1 %v1376_v0  ;;  %v776_v36 = vsel %vm329_vm3, %v1159_v4, 0 }
  0x47   : > { %1256 = vmatpush3.bf16.xpose.msra.mxu0 %v1670_v30 }
  0x48   : > { %1257 = vmatprep.subr.bf16.mxu0 %v1376_v0  ;;  %1270 = vmatpush3.bf16.xpose.msra.mxu1 %v612_v32 }
  0x49   : > { %1271 = vmatprep.subr.bf16.mxu1 %v1376_v0 }
  0x4f   : > { %1258 = vmatpush3.bf16.xpose.msra.mxu0 %v1687_v39 }
  0x50   : > { %1259 = vmatprep.subr.bf16.mxu0 %v1376_v0  ;;  %1272 = vmatpush3.bf16.xpose.msra.mxu1 %v615_v10 }
  0x51   : > { %1289 = vmatprep.subr.bf16.mxu1 %v1376_v0 }
  0x57   : > { %1260 = vmatpush3.bf16.xpose.msra.mxu0 %v1702_v43  ;;  %1274 = vmatmul.mubr.msk.bf16.vlgmr.msra.gmra.mrb[4].mxu1 %vm329_vm3, %v1361_v42 }
  0x58   : > { %1277 = vmatprep.subr.bf16.mxu0 %v1376_v0  ;;  %1290 = vmatpush3.bf16.xpose.msra.mxu1 %v767_v58 }
  0x59   : > { %1291 = vmatprep.subr.bf16.mxu1 %v1376_v0  ;;  %1297 = vmatprep.mubr.msk.bf16.mxu1 %vm1377_vm0, %v1376_v0 }
  0x5e   : > { %1262 = vmatmul.mubr.msk.bf16.vlgmr.msra.gmra.mrb[4].mxu0 %vm329_vm3, %v1360_v46 }
  0x5f   : > { %1278 = vmatpush3.bf16.xpose.msra.mxu0 %v691_v48  ;;  %1285 = vmatprep.mubr.msk.bf16.mxu0 %vm1377_vm0, %v1376_v0 }
  0x60   : > { %1279 = vmatprep.subr.bf16.mxu0 %v1376_v0  ;;  %1292 = vmatpush3.bf16.xpose.msra.mxu1 %v770_v50 }
  0x61   : > { %1293 = vmatprep.subr.bf16.mxu1 %v1376_v0 }
  0x67   : > { %1280 = vmatpush3.bf16.xpose.msra.mxu0 %v694_v23 }
  0x68   : > { %1281 = vmatprep.subr.bf16.mxu0 %v1376_v0  ;;  %1294 = vmatpush3.bf16.xpose.msra.mxu1 %v773_v52 }
  0x69   : > { %1295 = vmatprep.subr.bf16.mxu1 %v1376_v0 }
  0x6f   : > { %1282 = vmatpush3.bf16.xpose.msra.mxu0 %v697_v13 }
  0x70   : > { %1283 = vmatprep.subr.bf16.mxu0 %v1376_v0  ;;  %1296 = vmatpush3.bf16.xpose.msra.mxu1 %v776_v36 }
  0x71   : > { %1313 = vmatprep.subr.bf16.mxu1 %v1376_v0 }
  0x77   : > { %1284 = vmatpush3.bf16.xpose.msra.mxu0 %v700_v37  ;;  %1298 = vmatmul.mubr.msk.bf16.vlgmr.msra.gmra.mrb[8].mxu1 %vm329_vm3, %v1363_v1 }
  0x78   : > { %1301 = vmatprep.subr.bf16.mxu0 %v1376_v0  ;;  %1314 = vmatpush3.bf16.xpose.msra.mxu1 %v1533_v31  ;;  %v1019_v31 = vld [vmem:[%s1808_s2 + $0x8] sm:$0xff] }
  0x79   : > { %1315 = vmatprep.subr.bf16.mxu1 %v1376_v0  ;;  %1321 = vmatprep.mubr.msk.bf16.mxu1 %vm1377_vm0, %v1376_v0 }
  0x7a   : > { %1027 = vperm.xlu0 %1349, %v1019_v31  }
  0x7e   : > { %1286 = vmatmul.mubr.msk.bf16.vlgmr.msra.gmra.mrb[8].mxu0 %vm329_vm3, %v1362_v56 }
  0x7f   : > { %1302 = vmatpush3.bf16.xpose.msra.mxu0 %v1491_v53  ;;  %1309 = vmatprep.mubr.msk.bf16.mxu0 %vm1377_vm0, %v1376_v0  ;;  %v909_v53 = vsel %vm329_vm3, %v1661_v22, 0 }
  0x80   : > { %1303 = vmatprep.subr.bf16.mxu0 %v1376_v0  ;;  %1316 = vmatpush3.bf16.xpose.msra.mxu1 %v1556_v54  ;;  %v836_v54 = vsel %vm329_vm3, %v1164_v27, 0 }
  0x81   : > { %1317 = vmatprep.subr.bf16.mxu1 %v1376_v0 }
  0x87   : > { %1304 = vmatpush3.bf16.xpose.msra.mxu0 %v1530_v29  ;;  %v1366_v29 = vld [vmem:[%s1807_s1 + $0x38] sm:$0xff]  }
  0x88   : > { %1305 = vmatprep.subr.bf16.mxu0 %v1376_v0  ;;  %1318 = vmatpush3.bf16.xpose.msra.mxu1 %v1601_v15 }
  0x89   : > { %1319 = vmatprep.subr.bf16.mxu1 %v1376_v0 }
  0x8f   : > { %1306 = vmatpush3.bf16.xpose.msra.mxu0 %v1568_v2  ;;  %v973_v2 = vsel %vm329_vm3, %v1175_v63, 0 }
  0x90   : > { %1307 = vmatprep.subr.bf16.mxu0 %v1376_v0  ;;  %1320 = vmatpush3.bf16.xpose.msra.mxu1 %v909_v53 }
  0x97   : > { %1308 = vmatpush3.bf16.xpose.msra.mxu0 %v836_v54  ;;  %1322 = vmatmul.mubr.msk.bf16.vlgmr.msra.gmra.mrb[12].mxu1 %vm329_vm3, %v1366_v29 }
  0x98   : > { %1325 = vmatprep.subr.bf16.mxu0 %v1376_v0 }
  0x9e   : > { %1310 = vmatmul.mubr.msk.bf16.vlgmr.msra.gmra.mrb[12].mxu0 %vm329_vm3, %v1365_v57 }
  0x9f   : > { %1326 = vmatpush3.bf16.xpose.msra.mxu0 %v1670_v30  ;;  %1333 = vmatprep.mubr.msk.bf16.mxu0 %vm1377_vm0, %v1376_v0 }
  0xa0   : > { %1327 = vmatprep.subr.bf16.mxu0 %v1376_v0 }
  0xa7   : > { %1328 = vmatpush3.bf16.xpose.msra.mxu0 %v1687_v39 }
  0xa8   : > { %1329 = vmatprep.subr.bf16.mxu0 %v1376_v0 }
  0xaf   : > { %1330 = vmatpush3.bf16.xpose.msra.mxu0 %v1702_v43 }
  0xb0   : > { %1331 = vmatprep.subr.bf16.mxu0 %v1376_v0 }
  0xb5   : > { %v1023_v47 = vpop.permute.xlu0 %1022 }
  0xb7   : > { %1332 = vmatpush3.bf16.xpose.msra.mxu0 %v973_v2 }
  0xbe   : > { %1334 = vmatmul.mubr.msk.bf16.vlgmr.msra.gmra.mrb[16].mxu0 %vm329_vm3, %v1367_v9 }
  0xf9   : > { %v1028_v1 = vpop.permute.xlu0 %1027 }
 0x10a   : > { %v460_v14 = vpop.f32.mrb[0].mxu1 }
 0x10b   : > { %v1251_v15 = vpop.f32.mrb[1].mxu1 }
 0x10c   : > { %v463_v27 = vpop.f32.mrb[2].mxu1 }
 0x10d   : > { %v1252_v61 = vpop.f32.mrb[3].mxu1 }
 0x111   : > { %v379_v6 = vpop.f32.mrb[0].mxu0 }
 0x112   : > { %v461_v7 = vadd.f32 %v460_v14, %v379_v6  ;;  %v1239_v18 = vpop.f32.mrb[1].mxu0 }
 0x113   : > { %v382_v0 = vpop.f32.mrb[2].mxu0 }
 0x114   : > { %v464_v3 = vadd.f32 %v463_v27, %v382_v0  ;;  %v1240_v8 = vpop.f32.mrb[3].mxu0 }
 0x12a   : > { %v651_v51 = vpop.f32.mrb[4].mxu1 }
 0x12b   : > { %v1275_v19 = vpop.f32.mrb[5].mxu1 }
 0x12c   : > { %v654_v63 = vpop.f32.mrb[6].mxu1 }
 0x12d   : > { %v1276_v17 = vpop.f32.mrb[7].mxu1 }
 0x131   : > { %v579_v20 = vpop.f32.mrb[4].mxu0 }
 0x132   : > { %v586_v21 = vadd.f32 %v579_v20, %v461_v7  ;;  %v1263_v22 = vpop.f32.mrb[5].mxu0 }
 0x133   : > { %v582_v5 = vpop.f32.mrb[6].mxu0 }
 0x134   : > { %v587_v24 = vadd.f32 %v582_v5, %v464_v3  ;;  %v658_v28 = vadd.f32 %v651_v51, %v586_v21  ;;  %v1264_v25 = vpop.f32.mrb[7].mxu0 }
 0x136   : > { %v659_v26 = vadd.f32 %v654_v63, %v587_v24 }
 0x14a   : > { %v812_v30 = vpop.f32.mrb[8].mxu1 }
 0x14b   : > { %v1299_v33 = vpop.f32.mrb[9].mxu1 }
 0x14c   : > { %v815_v41 = vpop.f32.mrb[10].mxu1 }
 0x14d   : > { %v1300_v32 = vpop.f32.mrb[11].mxu1 }
 0x151   : > { %v736_v49 = vpop.f32.mrb[8].mxu0 }
 0x152   : > { %v743_v45 = vadd.f32 %v736_v49, %v658_v28  ;;  %v1287_v34 = vpop.f32.mrb[9].mxu0 }
 0x153   : > { %v739_v35 = vpop.f32.mrb[10].mxu0 }
 0x154   : > { %v744_v11 = vadd.f32 %v739_v35, %v659_v26  ;;  %v819_v38 = vadd.f32 %v812_v30, %v743_v45  ;;  %v1288_v39 = vpop.f32.mrb[11].mxu0 }
 0x156   : > { %v820_v40 = vadd.f32 %v815_v41, %v744_v11 }
 0x16a   : > { %v945_v59 = vpop.f32.mrb[12].mxu1 }
 0x16b   : > { %v1323_v10 = vpop.f32.mrb[13].mxu1 }
 0x16c   : > { %v948_v16 = vpop.f32.mrb[14].mxu1 }
 0x16d   : > { %v1324_v12 = vpop.f32.mrb[15].mxu1 }
 0x171   : > { %v872_v42 = vpop.f32.mrb[12].mxu0 }
 0x172   : > { %v879_v43 = vadd.f32 %v872_v42, %v819_v38  ;;  %v1311_v58 = vpop.f32.mrb[13].mxu0 }
 0x173   : > { %v875_v44 = vpop.f32.mrb[14].mxu0 }
 0x174   : > { %v880_v62 = vadd.f32 %v875_v44, %v820_v40  ;;  %v952_v46 = vadd.f32 %v945_v59, %v879_v43  ;;  %v1312_v48 = vpop.f32.mrb[15].mxu0 }
 0x176   : > { %v953_v50 = vadd.f32 %v948_v16, %v880_v62 }
 0x191   : > { %v1009_v60 = vpop.f32.mrb[16].mxu0 }
 0x192   : > { %v1016_v23 = vadd.f32 %v1009_v60, %v952_v46  ;;  %v1335_v52 = vpop.f32.mrb[17].mxu0 }
 0x193   : > { %v1012_v55 = vpop.f32.mrb[18].mxu0 }
 0x194   : > { %v1030_v4 = vadd.f32 %v1023_v47, %v1016_v23  ;;  %v1017_v13 = vadd.f32 %v1012_v55, %v953_v50  ;;  %v1336_v36 = vpop.f32.mrb[19].mxu0 }
 0x196   : > { %v1182_v37 = vpack.c.bf16 %v1030_v4, %v1030_v4  ;;  %v1031_v56 = vadd.f32 %v1028_v1, %v1017_v13 }
 0x198   : > { %1041 = vst.msk [vmem:[%s170_s18] sm:$0xf] %vm1040_vm8, %v1182_v37  ;;  %v1183_v53 = vpack.c.bf16 %v1031_v56, %v1031_v56 }
 0x19a   : > { %1042 = vst.msk [vmem:[%s170_s18 + $0x4] sm:$0xf] %vm1040_vm8, %v1183_v53 }
 0x19b PF: > { %s13_s12 = sadd.s32 1, %s1374_s12  }
 0x19c   : > { %p10_p4 = scmp.ge.s32.totalorder %s13_s12, 4  }
 0x19e   :  { %12 = sbr.rel (!%p10_p4) target bundleno = 1 (0x1), region = 70 }

// kernel: gated_expert_forward.5
= control target key start
LH: loop header
LB: loop body
LE: loop exit
PB: predicated region body
PF: predicated region fallthrough
CT: control target
= control target key end

     0   :  { %17 = vsyncpa [#allocation3], 0  ;;  %v816_v2 = vmov 0.0|0.0   ;;  %vm817_vm0 = vmmov 0   ;;  %v818_v4 = vmov 0.0   ;;  %s1053_s0 = inlined_call_operand.vmem [shape: f32[2,16], index: 0, kind: input, shape index: {}]   ;;  %s1054_s1 = inlined_call_operand.vmem [shape: f32[16,16], index: 1, kind: input, shape index: {}]   ;;  %s1055_s2 = inlined_call_operand.vmem [shape: f32[1,16], index: 2, kind: input, shape index: {}]   ;;  %s1056_s3 = inlined_call_operand.vmem [shape: f32[16,16], index: 3, kind: input, shape index: {}]   ;;  %s1057_s4 = inlined_call_operand.vmem [shape: f32[1,16], index: 4, kind: input, shape index: {}]   ;;  %s1058_s5 = inlined_call_operand.vmem [shape: f32[16,16], index: 5, kind: input, shape index: {}]   ;;  %s1059_s6 = inlined_call_operand.vmem [shape: f32[1,16], index: 6, kind: input, shape index: {}]   ;;  %s1060_s7 = inlined_call_operand.vmem [shape: f32[16,16], index: 7, kind: input, shape index: {}]   ;;  %s1061_s8 = inlined_call_operand.vmem [shape: f32[16,16], index: 8, kind: input, shape index: {}]   ;;  %s1062_s9 = inlined_call_operand.vmem [shape: f32[1,16], index: 9, kind: input, shape index: {}]   ;;  %s1063_s10 = inlined_call_operand.hbm [shape: f32[2,8], index: 10, kind: output, shape index: {0}]   ;;  %s1064_s11 = inlined_call_operand.hbm [shape: s32[2,8], index: 11, kind: output, shape index: {1}]  }
   0x1   :  { %v40_v0 = vld [vmem:[%s1054_s1] sm:$0xff]  ;;  %v41_v1 = vld [vmem:[%s1054_s1 + $0x8] sm:$0xff]  ;;  %744 = vmatprep.subr.bf16.mxu0 %v816_v2  ;;  %713 = vmatprep.mubr.msk.f32.mxu0 %vm817_vm0, %v818_v4 }
   0x2   :  { %v745_v3 = vpack.c.bf16 %v41_v1, %v40_v0 }
   0x3   :  { %18 = vsyncpa [#allocation5], 0  ;;  %747 = vmatprep.subr.bf16.mxu1 %v816_v2  ;;  %720 = vmatprep.mubr.msk.f32.mxu1 %vm817_vm0, %v818_v4  ;;  %v39_v5 = vld [vmem:[%s1053_s0] sm:$0x3]  ;;  %vm49_vm1 = vcmask 130048   ;;  %v124_v7 = vld [vmem:[%s1056_s3 + $0x8] sm:$0xff]  ;;  %v454_v47 = vlaneseq }
   0x4   :  { %746 = vmatpush3.bf16.msra.mxu0 %v745_v3  ;;  %v123_v6 = vld [vmem:[%s1056_s3] sm:$0xff]  ;;  %v206_v10 = vld [vmem:[%s1058_s5 + $0x8] sm:$0xff]  ;;  %vm442_vm2 = vcmask 123904  }
   0x5   :  { %750 = vmatprep.subr.bf16.mxu0 %v816_v2  ;;  %v748_v8 = vpack.c.bf16 %v124_v7, %v123_v6  ;;  %v205_v9 = vld [vmem:[%s1058_s5] sm:$0xff]  ;;  %v290_v17 = vld [vmem:[%s1061_s8 + $0x8] sm:$0xff]  ;;  %v939_v48 = vand.u32 127, %v454_v47 }
   0x6   :  { %v751_v11 = vpack.c.bf16 %v206_v10, %v205_v9  ;;  %v685_v12 = vld [vmem:[%s1055_s2] ss:$0 sm:$0xff]  ;;  %v288_v20 = vld [vmem:[%s1060_s7 + $0x8] sm:$0xff] }
   0x7   :  { %714 = vmatmul.mubr.msk.f32.vlgmr.msra.gmra.mrb[0].mxu0 %vm49_vm1, %v39_v5  ;;  %749 = vmatpush3.bf16.msra.mxu1 %v748_v8  ;;  %v289_v16 = vld [vmem:[%s1061_s8] sm:$0xff]  ;;  %vm476_vm8 = vcmp.eq.s32.totalorder %v939_v48, 0  ;;  %vm501_vm9 = vcmp.eq.s32.totalorder %v939_v48, 1  ;;  %vm526_vm13 = vcmp.eq.s32.totalorder %v939_v48, 2 }
   0x8   :  { %727 = vmatprep.mubr.msk.f32.mxu0 %vm817_vm0, %v818_v4  ;;  %753 = vmatprep.subr.bf16.mxu1 %v816_v2  ;;  %v754_v18 = vpack.c.bf16 %v290_v17, %v289_v16  ;;  %v287_v19 = vld [vmem:[%s1060_s7] sm:$0xff] }
   0x9   :  { %752 = vmatpush3.bf16.msra.mxu0 %v751_v11  ;;  %v687_v21 = vld [vmem:[%s1057_s4] ss:$0 sm:$0xff]  ;;  %v757_v23 = vpack.c.bf16 %v288_v20, %v287_v19 }
   0xa   :  { %756 = vmatprep.subr.bf16.mxu0 %v816_v2  ;;  %v689_v26 = vld [vmem:[%s1059_s6] ss:$0 sm:$0xff]  ;;  %s819_s6 = smov [#allocation2]  }
   0xb   :  { %v693_v33 = vld [vmem:[%s1062_s9] ss:$0 sm:$0xff]  ;;  %s663_s9 = sshll.u32 %s819_s6, 4  ;;  %s664_s9 = int_to_ptr.vmem [resolvable:$true] %s663_s9 }
   0xc   :  { %s768_s20 = scalar_lea.vmem %s664_s9, 32  ;;  %p773_p1 = scmp.lt.s32.totalorder %s664_s9, %s664_s9 }
   0xd   :  { %p769_p0 = scmp.ne.s32.totalorder %s664_s9, %s768_s20  ;;  %p774_p2 = scmp.lt.s32.totalorder %s768_s20, %s768_s20 }
   0xf   :  { %p775_p3 = por %p774_p2, %p773_p1 }
  0x11   :  { %p776_p4 = pnand %p775_p3, %p769_p0 }
  0xda   :  { %v119_v13 = vpop.f32.mrb[0].mxu0 }
  0xdb   :  { %v120_v14 = vadd.f32 %v685_v12, %v119_v13  ;;  %v715_v15 = vpop.f32.mrb[1].mxu0 }
  0xdd   :  { %721 = vmatmul.mubr.msk.f32.vlgmr.msra.gmra.mrb[0].mxu1 %vm49_vm1, %v120_v14 }
  0xde   :  { %734 = vmatprep.mubr.msk.f32.mxu1 %vm817_vm0, %v818_v4  ;;  %755 = vmatpush3.bf16.msra.mxu1 %v754_v18 }
 0x1b0   :  { %v201_v22 = vpop.f32.mrb[0].mxu1 }
 0x1b1   :  { %v202_v24 = vadd.f32 %v687_v21, %v201_v22  ;;  %v722_v25 = vpop.f32.mrb[1].mxu1 }
 0x1b3   :  { %728 = vmatmul.mubr.msk.f32.vlgmr.msra.gmra.mrb[2].mxu0 %vm49_vm1, %v202_v24 }
 0x1b4   :  { %758 = vmatpush3.bf16.msra.mxu0 %v757_v23  ;;  %741 = vmatprep.mubr.msk.f32.mxu0 %vm817_vm0, %v818_v4 }
 0x1b7   :  { %742 = vmatmul.mubr.msk.f32.vlgmr.msra.gmra.mrb[4].mxu0 %vm49_vm1, %v120_v14 }
 0x286   :  { %v283_v27 = vpop.f32.mrb[2].mxu0 }
 0x287   :  { %v284_v28 = vadd.f32 %v689_v26, %v283_v27  ;;  %v729_v29 = vpop.f32.mrb[3].mxu0 }
 0x289   :  { %735 = vmatmul.mubr.msk.f32.vlgmr.msra.gmra.mrb[2].mxu1 %vm49_vm1, %v284_v28  ;;  %vm551_vm1 = vcmp.eq.s32.totalorder %v939_v48, 3 }
 0x28a   :  { %v430_v30 = vpop.f32.mrb[4].mxu0 }
 0x28b   :  { %v743_v31 = vpop.f32.mrb[5].mxu0 }
 0x35c   :  { %v360_v32 = vpop.f32.mrb[2].mxu1 }
 0x35d   :  { %v431_v34 = vadd.f32 %v430_v30, %v360_v32  ;;  %v736_v35 = vpop.f32.mrb[3].mxu1 }
 0x35f   :  { %v441_v36 = vadd.f32 %v693_v33, %v431_v34 }
 0x361   :  { %v443_v37 = vsel %vm442_vm2, %v441_v36, -inf }
 0x362   :  { %444 = vmax.xlane.f32.xlu0 %v443_v37 }
 0x3ef   :  { %v445_v38 = vpop.xlane.xlu0 %444 }
 0x3f0   :  { %v446_v39 = vsub.f32 %v441_v36, %v445_v38 }
 0x3f2   :  { %v447_v40 = vmul.f32 1.442695, %v446_v39 }
 0x3f4   :  { %764 = vpow2.f32 %v447_v40 }
 0x3fe   :  { %v765_v41 = vpop.eup %764 }
 0x3ff   :  { %v449_v42 = vsel %vm442_vm2, %v765_v41, 0.0 }
 0x400   :  { %450 = vadd.xlane.f32.xlu0 %v449_v42 }
 0x48d   :  { %v451_v43 = vpop.xlane.xlu0 %450 }
 0x48e   :  { %766 = vrcp.f32 %v451_v43 }
 0x498   :  { %v767_v44 = vpop.eup %766 }
 0x499   :  { %v453_v45 = vmul.f32 %v767_v44, %v765_v41 }
 0x49b   :  { %v456_v46 = vsel %vm442_vm2, %v453_v45, -inf }
 0x49c   :  { %457 = vmax.xlane.f32.xlu1 %v456_v46 }
 0x529   :  { %v941_v49 = vpop.xlane.xlu1 %457 }
 0x52a   :  { %vm459_vm3 = vcmp.ge.f32.partialorder %v453_v45, %v941_v49 }
 0x52b   :  { %v460_v50 = vsel %vm459_vm3, %v939_v48, 16 }
 0x52c   :  { %v461_v51 = vsel %vm442_vm2, %v460_v50, 2147483647 }
 0x52d   :  { %v463_v52 = vshra.s32 %v461_v51, 16  ;;  %v462_v54 = vand.u32 65535, %v461_v51 }
 0x52f   :  { %v465_v53 = vcvt.s32.f32 %v463_v52  ;;  %v464_v56 = vcvt.s32.f32 %v462_v54 }
 0x531   :  { %466 = vmin.xlane.f32.xlu1 %v465_v53 }
 0x5be   :  { %v467_v55 = vpop.xlane.xlu1 %466 }
 0x5bf   :  { %vm468_vm4 = vcmp.eq.f32.partialorder %v465_v53, %v467_v55  ;;  %v473_v58 = vcvt.f32.s32 %v467_v55 }
 0x5c0   :  { %v469_v57 = vsel %vm468_vm4, %v464_v56, inf }
 0x5c1   :  { %470 = vmin.xlane.f32.xlu0 %v469_v57  ;;  %v474_v60 = vshll.u32 %v473_v58, 16 }
 0x64e   :  { %v471_v59 = vpop.xlane.xlu0 %470 }
 0x64f   :  { %v472_v61 = vcvt.f32.s32 %v471_v59 }
 0x651   :  { %v475_v62 = vadd.s32 %v474_v60, %v472_v61 }
 0x653   :  { %vm479_vm5 = vcmp.eq.s32.totalorder %v939_v48, %v475_v62  ;;  %v478_v15 = vsel %vm476_vm8, %v475_v62, 0 }
 0x654   :  { %v480_v63 = vsel %vm479_vm5, -1.0, %v453_v45 }
 0x655   :  { %v481_v0 = vsel %vm442_vm2, %v480_v63, -inf }
 0x656   :  { %482 = vmax.xlane.f32.xlu1 %v481_v0 }
 0x6e3   :  { %v948_v1 = vpop.xlane.xlu1 %482 }
 0x6e4   :  { %vm484_vm6 = vcmp.ge.f32.partialorder %v480_v63, %v948_v1 }
 0x6e5   :  { %v485_v2 = vsel %vm484_vm6, %v939_v48, 16  ;;  %vm576_vm6 = vcmp.eq.s32.totalorder %v939_v48, 4 }
 0x6e6   :  { %v486_v3 = vsel %vm442_vm2, %v485_v2, 2147483647 }
 0x6e7   :  { %v488_v4 = vshra.s32 %v486_v3, 16  ;;  %v487_v6 = vand.u32 65535, %v486_v3 }
 0x6e9   :  { %v490_v5 = vcvt.s32.f32 %v488_v4  ;;  %v489_v8 = vcvt.s32.f32 %v487_v6 }
 0x6eb   :  { %491 = vmin.xlane.f32.xlu0 %v490_v5 }
 0x778   :  { %v492_v7 = vpop.xlane.xlu0 %491 }
 0x779   :  { %vm493_vm7 = vcmp.eq.f32.partialorder %v490_v5, %v492_v7  ;;  %v498_v10 = vcvt.f32.s32 %v492_v7 }
 0x77a   :  { %v494_v9 = vsel %vm493_vm7, %v489_v8, inf }
 0x77b   :  { %495 = vmin.xlane.f32.xlu1 %v494_v9  ;;  %v499_v12 = vshll.u32 %v498_v10, 16 }
 0x808   :  { %v496_v11 = vpop.xlane.xlu1 %495 }
 0x809   :  { %v497_v13 = vcvt.f32.s32 %v496_v11 }
 0x80b   :  { %v500_v14 = vadd.s32 %v499_v12, %v497_v13 }
 0x80d   :  { %v503_v16 = vsel %vm501_vm9, %v500_v14, %v478_v15  ;;  %vm504_vm10 = vcmp.eq.s32.totalorder %v939_v48, %v500_v14 }
 0x80e   :  { %v505_v17 = vsel %vm504_vm10, -1.0, %v480_v63 }
 0x80f   :  { %v506_v18 = vsel %vm442_vm2, %v505_v17, -inf }
 0x810   :  { %507 = vmax.xlane.f32.xlu0 %v506_v18 }
 0x89d   :  { %v961_v19 = vpop.xlane.xlu0 %507 }
 0x89e   :  { %vm509_vm11 = vcmp.ge.f32.partialorder %v505_v17, %v961_v19 }
 0x89f   :  { %v510_v20 = vsel %vm509_vm11, %v939_v48, 16 }
 0x8a0   :  { %v511_v21 = vsel %vm442_vm2, %v510_v20, 2147483647 }
 0x8a1   :  { %v513_v22 = vshra.s32 %v511_v21, 16  ;;  %v512_v24 = vand.u32 65535, %v511_v21 }
 0x8a3   :  { %v515_v23 = vcvt.s32.f32 %v513_v22  ;;  %v514_v26 = vcvt.s32.f32 %v512_v24 }
 0x8a5   :  { %516 = vmin.xlane.f32.xlu1 %v515_v23 }
 0x932   :  { %v517_v25 = vpop.xlane.xlu1 %516 }
 0x933   :  { %vm518_vm12 = vcmp.eq.f32.partialorder %v515_v23, %v517_v25  ;;  %v523_v28 = vcvt.f32.s32 %v517_v25 }
 0x934   :  { %v519_v27 = vsel %vm518_vm12, %v514_v26, inf  ;;  %vm601_vm12 = vcmp.eq.s32.totalorder %v939_v48, 5 }
 0x935   :  { %520 = vmin.xlane.f32.xlu0 %v519_v27  ;;  %v524_v30 = vshll.u32 %v523_v28, 16 }
 0x9c2   :  { %v521_v29 = vpop.xlane.xlu0 %520 }
 0x9c3   :  { %v522_v31 = vcvt.f32.s32 %v521_v29 }
 0x9c5   :  { %v525_v32 = vadd.s32 %v524_v30, %v522_v31 }
 0x9c7   :  { %v528_v33 = vsel %vm526_vm13, %v525_v32, %v503_v16  ;;  %vm529_vm14 = vcmp.eq.s32.totalorder %v939_v48, %v525_v32 }
 0x9c8   :  { %v530_v34 = vsel %vm529_vm14, -1.0, %v505_v17 }
 0x9c9   :  { %v531_v35 = vsel %vm442_vm2, %v530_v34, -inf }
 0x9ca   :  { %532 = vmax.xlane.f32.xlu1 %v531_v35 }
 0xa57   :  { %v971_v36 = vpop.xlane.xlu1 %532 }
 0xa58   :  { %vm534_vm15 = vcmp.ge.f32.partialorder %v530_v34, %v971_v36 }
 0xa59   :  { %v535_v37 = vsel %vm534_vm15, %v939_v48, 16 }
 0xa5a   :  { %v536_v38 = vsel %vm442_vm2, %v535_v37, 2147483647 }
 0xa5b   :  { %v538_v39 = vshra.s32 %v536_v38, 16  ;;  %v537_v41 = vand.u32 65535, %v536_v38 }
 0xa5d   :  { %v540_v40 = vcvt.s32.f32 %v538_v39  ;;  %v539_v43 = vcvt.s32.f32 %v537_v41 }
 0xa5f   :  { %541 = vmin.xlane.f32.xlu0 %v540_v40 }
 0xaec   :  { %v542_v42 = vpop.xlane.xlu0 %541 }
 0xaed   :  { %vm543_vm0 = vcmp.eq.f32.partialorder %v540_v40, %v542_v42  ;;  %v548_v45 = vcvt.f32.s32 %v542_v42 }
 0xaee   :  { %v544_v44 = vsel %vm543_vm0, %v539_v43, inf }
 0xaef   :  { %545 = vmin.xlane.f32.xlu1 %v544_v44  ;;  %v549_v47 = vshll.u32 %v548_v45, 16  ;;  %v477_v45 = vsel %vm476_vm8, %v941_v49, 0.0  ;;  %vm654_vm8 = vcmask 58368  }
 0xb7c   :  { %v546_v46 = vpop.xlane.xlu1 %545 }
 0xb7d   :  { %v547_v50 = vcvt.f32.s32 %v546_v46  ;;  %v502_v46 = vsel %vm501_vm9, %v948_v1, %v477_v45 }
 0xb7f   :  { %v550_v51 = vadd.s32 %v549_v47, %v547_v50  ;;  %v527_v47 = vsel %vm526_vm13, %v961_v19, %v502_v46 }
 0xb80   :  { %v552_v50 = vsel %vm551_vm1, %v971_v36, %v527_v47 }
 0xb81   :  { %v553_v52 = vsel %vm551_vm1, %v550_v51, %v528_v33  ;;  %vm554_vm3 = vcmp.eq.s32.totalorder %v939_v48, %v550_v51 }
 0xb82   :  { %v555_v53 = vsel %vm554_vm3, -1.0, %v530_v34  ;;  %vm626_vm3 = vcmp.eq.s32.totalorder %v939_v48, 6 }
 0xb83   :  { %v556_v54 = vsel %vm442_vm2, %v555_v53, -inf }
 0xb84   :  { %557 = vmax.xlane.f32.xlu0 %v556_v54 }
 0xc11   :  { %v981_v55 = vpop.xlane.xlu0 %557 }
 0xc12   :  { %vm559_vm4 = vcmp.ge.f32.partialorder %v555_v53, %v981_v55  ;;  %v577_v51 = vsel %vm576_vm6, %v981_v55, %v552_v50 }
 0xc13   :  { %v560_v56 = vsel %vm559_vm4, %v939_v48, 16 }
 0xc14   :  { %v561_v57 = vsel %vm442_vm2, %v560_v56, 2147483647 }
 0xc15   :  { %v563_v58 = vshra.s32 %v561_v57, 16  ;;  %v562_v60 = vand.u32 65535, %v561_v57 }
 0xc17   :  { %v565_v59 = vcvt.s32.f32 %v563_v58  ;;  %v564_v62 = vcvt.s32.f32 %v562_v60 }
 0xc19   :  { %566 = vmin.xlane.f32.xlu1 %v565_v59 }
 0xca6   :  { %v567_v61 = vpop.xlane.xlu1 %566 }
 0xca7   :  { %vm568_vm5 = vcmp.eq.f32.partialorder %v565_v59, %v567_v61  ;;  %v573_v0 = vcvt.f32.s32 %v567_v61 }
 0xca8   :  { %v569_v63 = vsel %vm568_vm5, %v564_v62, inf  ;;  %vm651_vm5 = vcmp.eq.s32.totalorder %v939_v48, 7 }
 0xca9   :  { %570 = vmin.xlane.f32.xlu0 %v569_v63  ;;  %v574_v3 = vshll.u32 %v573_v0, 16 }
 0xd36   :  { %v571_v2 = vpop.xlane.xlu0 %570 }
 0xd37   :  { %v572_v4 = vcvt.f32.s32 %v571_v2 }
 0xd39   :  { %v575_v5 = vadd.s32 %v574_v3, %v572_v4 }
 0xd3b   :  { %v578_v6 = vsel %vm576_vm6, %v575_v5, %v553_v52  ;;  %vm579_vm7 = vcmp.eq.s32.totalorder %v939_v48, %v575_v5 }
 0xd3c   :  { %v580_v7 = vsel %vm579_vm7, -1.0, %v555_v53 }
 0xd3d   :  { %v581_v8 = vsel %vm442_vm2, %v580_v7, -inf }
 0xd3e   :  { %582 = vmax.xlane.f32.xlu1 %v581_v8 }
 0xdcb   :  { %v583_v9 = vpop.xlane.xlu1 %582 }
 0xdcc   :  { %vm584_vm10 = vcmp.ge.f32.partialorder %v580_v7, %v583_v9  ;;  %v602_v49 = vsel %vm601_vm12, %v583_v9, %v577_v51 }
 0xdcd   :  { %v585_v10 = vsel %vm584_vm10, %v939_v48, 16 }
 0xdce   :  { %v586_v11 = vsel %vm442_vm2, %v585_v10, 2147483647 }
 0xdcf   :  { %v588_v12 = vshra.s32 %v586_v11, 16  ;;  %v587_v14 = vand.u32 65535, %v586_v11 }
 0xdd1   :  { %v590_v13 = vcvt.s32.f32 %v588_v12  ;;  %v589_v16 = vcvt.s32.f32 %v587_v14 }
 0xdd3   :  { %591 = vmin.xlane.f32.xlu0 %v590_v13 }
 0xe60   :  { %v592_v15 = vpop.xlane.xlu0 %591 }
 0xe61   :  { %vm593_vm11 = vcmp.eq.f32.partialorder %v590_v13, %v592_v15  ;;  %v598_v18 = vcvt.f32.s32 %v592_v15 }
 0xe62   :  { %v594_v17 = vsel %vm593_vm11, %v589_v16, inf }
 0xe63   :  { %595 = vmin.xlane.f32.xlu1 %v594_v17  ;;  %v599_v21 = vshll.u32 %v598_v18, 16 }
 0xef0   :  { %v596_v20 = vpop.xlane.xlu1 %595 }
 0xef1   :  { %v597_v22 = vcvt.f32.s32 %v596_v20 }
 0xef3   :  { %v600_v23 = vadd.s32 %v599_v21, %v597_v22 }
 0xef5   :  { %v603_v24 = vsel %vm601_vm12, %v600_v23, %v578_v6  ;;  %vm604_vm14 = vcmp.eq.s32.totalorder %v939_v48, %v600_v23 }
 0xef6   :  { %v605_v25 = vsel %vm604_vm14, -1.0, %v580_v7 }
 0xef7   :  { %v606_v26 = vsel %vm442_vm2, %v605_v25, -inf }
 0xef8   :  { %607 = vmax.xlane.f32.xlu0 %v606_v26 }
 0xf85   :  { %v608_v27 = vpop.xlane.xlu0 %607 }
 0xf86   :  { %vm609_vm15 = vcmp.ge.f32.partialorder %v605_v25, %v608_v27  ;;  %v627_v52 = vsel %vm626_vm3, %v608_v27, %v602_v49 }
 0xf87   :  { %v610_v28 = vsel %vm609_vm15, %v939_v48, 16 }
 0xf88   :  { %v611_v29 = vsel %vm442_vm2, %v610_v28, 2147483647 }
 0xf89   :  { %v613_v30 = vshra.s32 %v611_v29, 16  ;;  %v612_v32 = vand.u32 65535, %v611_v29 }
 0xf8b   :  { %v615_v31 = vcvt.s32.f32 %v613_v30  ;;  %v614_v34 = vcvt.s32.f32 %v612_v32 }
 0xf8d   :  { %616 = vmin.xlane.f32.xlu1 %v615_v31 }
0x101a   :  { %v617_v33 = vpop.xlane.xlu1 %616 }
0x101b   :  { %vm618_vm0 = vcmp.eq.f32.partialorder %v615_v31, %v617_v33  ;;  %v623_v37 = vcvt.f32.s32 %v617_v33 }
0x101c   :  { %v619_v35 = vsel %vm618_vm0, %v614_v34, inf }
0x101d   :  { %620 = vmin.xlane.f32.xlu0 %v619_v35  ;;  %v624_v39 = vshll.u32 %v623_v37, 16 }
0x10aa   :  { %v621_v38 = vpop.xlane.xlu0 %620 }
0x10ab   :  { %v622_v40 = vcvt.f32.s32 %v621_v38 }
0x10ad   :  { %v625_v41 = vadd.s32 %v624_v39, %v622_v40 }
0x10af   :  { %vm629_vm4 = vcmp.eq.s32.totalorder %v939_v48, %v625_v41  ;;  %v628_v42 = vsel %vm626_vm3, %v625_v41, %v603_v24 }
0x10b0   :  { %v630_v43 = vsel %vm629_vm4, -1.0, %v605_v25 }
0x10b1   :  { %v631_v44 = vsel %vm442_vm2, %v630_v43, -inf }
0x10b2   :  { %632 = vmax.xlane.f32.xlu1 %v631_v44 }
0x113f   :  { %v633_v1 = vpop.xlane.xlu1 %632 }
0x1140   :  { %vm634_vm9 = vcmp.ge.f32.partialorder %v630_v43, %v633_v1  ;;  %v652_v19 = vsel %vm651_vm5, %v633_v1, %v627_v52 }
0x1141   :  { %v635_v53 = vsel %vm634_vm9, %v939_v48, 16  ;;  %655 = vst.msk [vmem:[#allocation2] sm:$0x3] %vm654_vm8, %v652_v19 }
0x1142   :  { %v636_v36 = vsel %vm442_vm2, %v635_v53, 2147483647 }
0x1143   :  { %v638_v54 = vshra.s32 %v636_v36, 16  ;;  %v637_v56 = vand.u32 65535, %v636_v36 }
0x1145   :  { %v640_v55 = vcvt.s32.f32 %v638_v54  ;;  %v639_v58 = vcvt.s32.f32 %v637_v56 }
0x1147   :  { %641 = vmin.xlane.f32.xlu0 %v640_v55 }
0x11d4   :  { %v642_v57 = vpop.xlane.xlu0 %641 }
0x11d5   :  { %vm643_vm13 = vcmp.eq.f32.partialorder %v640_v55, %v642_v57 }
0x11d6   :  { %v644_v59 = vsel %vm643_vm13, %v639_v58, inf }
0x11d7   :  { %645 = vmin.xlane.f32.xlu1 %v644_v59 }
0x11d8   :  { %779 = shalt.err (!%p776_p4)
}
0x11d9   :  { %s780_s1 = scalar_lea.hbm %s1063_s10, 32 }
0x11da   :  { %p781_p5 = scmp.ne.s32.totalorder %s1063_s10, %s780_s1  ;;  %p784_p6 = scmp.lt.u32.totalorder %s780_s1, %s1063_s10 }
0x11dc   :  { %p786_p7 = pnand %p784_p6, %p781_p5 }
0x11de   :  { %789 = shalt.err (!%p786_p7)
}
0x11df   :  { %666 = dma.vmem_to_hbm [thread:$0]  %s664_s9, 32, %s1063_s10, [#allocation3]   ;;  %v648_v60 = vcvt.f32.s32 %v642_v57 }
0x11e0   :  { %s820_s28 = smov [#allocation4]  }
0x11e1   :  { %v649_v62 = vshll.u32 %v648_v60, 16  ;;  %s673_s29 = sshll.u32 %s820_s28, 4  ;;  %s674_s29 = int_to_ptr.vmem [resolvable:$true] %s673_s29 }
0x11e2   :  { %s790_s30 = scalar_lea.vmem %s674_s29, 32  ;;  %p795_p9 = scmp.lt.s32.totalorder %s674_s29, %s674_s29 }
0x11e3   :  { %p791_p8 = scmp.ne.s32.totalorder %s674_s29, %s790_s30  ;;  %p796_p10 = scmp.lt.s32.totalorder %s790_s30, %s790_s30 }
0x11e5   :  { %p797_p11 = por %p796_p10, %p795_p9 }
0x11e7   :  { %p798_p12 = pnand %p797_p11, %p791_p8 }
0x1264   :  { %v646_v61 = vpop.xlane.xlu1 %645 }
0x1265   :  { %v647_v63 = vcvt.f32.s32 %v646_v61 }
0x1267   :  { %v650_v0 = vadd.s32 %v649_v62, %v647_v63 }
0x1269   :  { %v653_v2 = vsel %vm651_vm5, %v650_v0, %v628_v42 }
0x126a   :  { %656 = vst.msk [vmem:[#allocation4] sm:$0x3] %vm654_vm8, %v653_v2 }
0x126b   :  { %801 = shalt.err (!%p798_p12)
}
0x126c   :  { %s802_s12 = scalar_lea.hbm %s1064_s11, 32 }
0x126d   :  { %p803_p13 = scmp.ne.s32.totalorder %s1064_s11, %s802_s12  ;;  %p806_p0 = scmp.lt.u32.totalorder %s802_s12, %s1064_s11 }
0x126f   :  { %p808_p1 = pnand %p806_p0, %p803_p13 }
0x1271   :  { %811 = shalt.err (!%p808_p1)
}
0x1272   :  { %676 = dma.vmem_to_hbm [thread:$0]  %s674_s29, 32, %s1064_s11, [#allocation5]  }
0x1273   :  { %812 = dma.done.wait [#allocation3], 32  }
0x1274   :  { %813 = vsyncadd [#allocation3], 4294967264 }
0x1275   :  { %814 = dma.done.wait [#allocation5], 32  }
0x1276   :  { %815 = vsyncadd [#allocation5], 4294967264 }
0x1277   :  { %683 = vsyncpa [#allocation3], 1 }
0x1278   :  { %684 = vsyncpa [#allocation5], 1 }

</bundles_post_ra>
